<compile_context>
chip_gen: v5e
topology: v5e:2x2
jax: 0.10.0
libtpu: 0.0.40
codegen_flags: <defaults>
</compile_context>

<pallas_src>
import functools

import jax
import jax.numpy as jnp
from jax.experimental import pallas as pl
from jax.experimental.pallas import tpu as pltpu


def _round_up(x, m):
    return ((x + m - 1) // m) * m


def graphsage_kernel(adj_ref, h_hi_ref, h_lo_ref, h_dst_ref, w_self_ref,
                     w_neigh_ref, b_ref, out_ref, acc_ref, *,
                     deg_col, tk, resident_h):
    # grid = (row tiles i, contraction tiles k); k is the innermost / last axis.
    k = pl.program_id(1)

    @pl.when(k == 0)
    def _init():
        acc_ref[...] = jnp.zeros_like(acc_ref)

    # int8 {0,1} adjacency tile -> bf16 in-register (exact); int never feeds the MXU.
    adj = adj_ref[...].astype(jnp.bfloat16)                       # [TM, TK]

    if resident_h:
        # Full source-feature table is VMEM-resident; slice the k-th slab.
        row0 = pl.multiple_of(k * tk, tk)
        h_hi = h_hi_ref[pl.ds(row0, tk), :]
        h_lo = h_lo_ref[pl.ds(row0, tk), :]
    else:
        h_hi = h_hi_ref[...]
        h_lo = h_lo_ref[...]

    # Neighbor feature sum on the MXU (bf16 x bf16 -> f32 accumulate).  Because adj is
    # 0/1 the products are exact; hi/lo split recovers ~f32 accuracy of h.  The ones
    # column (deg_col) makes the in-degree ride along in the same matmul.
    acc_ref[...] += (jnp.dot(adj, h_hi, preferred_element_type=jnp.float32)
                     + jnp.dot(adj, h_lo, preferred_element_type=jnp.float32))

    @pl.when(k == pl.num_programs(1) - 1)
    def _finalize():
        acc = acc_ref[...]                                        # [TM, Fp_in]
        # MeanAggregator: c = (sum over in-neighbors) / max(deg, 1)
        deg = jnp.maximum(acc[:, deg_col:deg_col + 1], 1.0)       # [TM, 1]
        c = acc * pl.reciprocal(deg, approx=False)

        # Bundler: Linear(cat(h, c)) as split matmuls (avoids lane concat).
        z = (jnp.dot(h_dst_ref[...], w_self_ref[...],
                     preferred_element_type=jnp.float32)
             + jnp.dot(c, w_neigh_ref[...],
                       preferred_element_type=jnp.float32)
             + b_ref[...])                                        # [TM, Fp_out]

        # F.normalize(z, p=2, dim=1), eps = 1e-12 (padded cols are exactly 0 -> no
        # effect on the row norm).  rsqrt = single EUP op.
        inv_norm = jax.lax.rsqrt(
            jnp.maximum(jnp.sum(z * z, axis=1, keepdims=True), 1e-24))
        # activation (ReLU)
        out_ref[...] = jnp.maximum(z * inv_norm, 0.0).astype(out_ref.dtype)


def graphsage_forward(adj, h, w_self, w_neigh, b, *, tm=512, tk=2048):
    """adj: [N, N] binary 0/1 (row i = in-neighbors of node i, self-loops included);
    h: [N, F_in]; w_self / w_neigh: [F_in, F_out]; b: [1, F_out].

    NOTE: the int8 adjacency storage and bf16 hi/lo aggregation are only exact because
    adj is binary 0/1; weighted edges would need the f32 path back.
    """
    n, f_in = h.shape
    f_out = w_self.shape[1]

    # ---- tile sizes -----------------------------------------------------------
    tm = max(256, _round_up(tm, 256))
    tk = max(256, _round_up(tk, 256))
    # Keep >= 2 row tiles whenever the graph allows it so the "parallel" row axis can
    # be sharded across both v7x TensorCores.
    tm = min(tm, max(256, (_round_up(n, 256) // 2) // 256 * 256))
    tk = min(tk, _round_up(n, 256))

    n_pad_m = _round_up(n, tm)      # destination rows, padded to a multiple of tm
    n_pad_k = _round_up(n, tk)      # source/contraction cols, padded to a multiple of tk

    # Lane-dense feature padding; reserve one extra input column for the degree ones.
    fpi = _round_up(f_in + 1, 128)
    fpo = _round_up(f_out, 128)
    deg_col = f_in

    # ---- operand preparation (cast to compact dtypes BEFORE padding) -----------
    adj_p = jnp.pad(adj.astype(jnp.int8),
                    ((0, n_pad_m - n), (0, n_pad_k - n)))         # int8 0/1

    h_f32 = h.astype(jnp.float32)
    ones = jnp.ones((n, 1), jnp.float32)                          # degree column
    h_src = jnp.pad(jnp.concatenate([h_f32, ones], axis=1),
                    ((0, n_pad_k - n), (0, fpi - (f_in + 1))))
    h_hi = h_src.astype(jnp.bfloat16)                             # exact bf16 head
    h_lo = (h_src - h_hi.astype(jnp.float32)).astype(jnp.bfloat16)  # residual

    h_dst = jnp.pad(h_f32, ((0, n_pad_m - n), (0, fpi - f_in)))   # self term, f32

    w_self_p = jnp.pad(w_self.astype(jnp.float32),
                       ((0, fpi - f_in), (0, fpo - f_out)))       # zero-padded rows/cols
    w_neigh_p = jnp.pad(w_neigh.astype(jnp.float32),
                        ((0, fpi - f_in), (0, fpo - f_out)))
    b_p = jnp.pad(b.astype(jnp.float32), ((0, 0), (0, fpo - f_out)))

    grid = (n_pad_m // tm, n_pad_k // tk)

    # ---- h residency: fetch source features once when small enough -------------
    # Budget (hi + lo, bf16, double-buffered) <= 12 MiB.
    resident_h = (n_pad_k * fpi * 2 * 2 * 2) <= (12 * 1024 * 1024)
    if resident_h:
        h_hi_spec = pl.BlockSpec((n_pad_k, fpi), lambda i, k: (0, 0))
        h_lo_spec = pl.BlockSpec((n_pad_k, fpi), lambda i, k: (0, 0))
        h_block_rows = n_pad_k
    else:
        h_hi_spec = pl.BlockSpec((tk, fpi), lambda i, k: (k, 0))
        h_lo_spec = pl.BlockSpec((tk, fpi), lambda i, k: (k, 0))
        h_block_rows = tk

    # ---- explicit VMEM budget (cap at 48 MiB so defaults also fit v7x's 64 MiB) ---
    vmem_est = (
        2 * tm * tk * 1                       # adj tiles (int8, double-buffered)
        + 2 * 2 * h_block_rows * fpi * 2      # h hi + lo (bf16, double-buffered)
        + 2 * tm * fpi * 4                    # h_dst (f32, double-buffered)
        + 2 * 2 * fpi * fpo * 4               # weights
        + 2 * fpo * 4                         # bias
        + tm * fpi * 4                        # accumulator scratch
        + 2 * tm * fpo * 4                    # output tiles (double-buffered)
    )
    vmem_limit = int(min(48 * 1024 * 1024,
                         max(32 * 1024 * 1024, int(vmem_est * 1.5))))

    kernel = functools.partial(graphsage_kernel, deg_col=deg_col, tk=tk,
                               resident_h=resident_h)

    out = pl.pallas_call(
        kernel,
        out_shape=jax.ShapeDtypeStruct((n_pad_m, fpo), jnp.float32),
        grid=grid,
        in_specs=[
            pl.BlockSpec((tm, tk), lambda i, k: (i, k)),      # adj tile (int8 0/1)
            h_hi_spec,                                        # h source, bf16 head
            h_lo_spec,                                        # h source, bf16 residual
            pl.BlockSpec((tm, fpi), lambda i, k: (i, 0)),     # h destination (self term)
            pl.BlockSpec((fpi, fpo), lambda i, k: (0, 0)),    # W_self
            pl.BlockSpec((fpi, fpo), lambda i, k: (0, 0)),    # W_neigh
            pl.BlockSpec((1, fpo), lambda i, k: (0, 0)),      # bias
        ],
        out_specs=pl.BlockSpec((tm, fpo), lambda i, k: (i, 0)),
        scratch_shapes=[
            pltpu.VMEM((tm, fpi), jnp.float32),               # neighbor-sum accumulator
        ],
        compiler_params=pltpu.CompilerParams(
            dimension_semantics=("parallel", "arbitrary"),
            vmem_limit_bytes=vmem_limit,
        ),
    )(adj_p, h_hi, h_lo, h_dst, w_self_p, w_neigh_p, b_p)

    return out[:n, :f_out]


def reference_forward(adj, h, w_self, w_neigh, b):
    hp = jax.lax.Precision.HIGHEST
    deg = jnp.maximum(jnp.sum(adj, axis=1, keepdims=True), 1.0)
    c = jnp.dot(adj, h, precision=hp) / deg
    z = (jnp.dot(h, w_self, precision=hp)
         + jnp.dot(c, w_neigh, precision=hp) + b)
    norm = jnp.maximum(jnp.sqrt(jnp.sum(z * z, axis=1, keepdims=True)), 1e-12)
    return jnp.maximum(z / norm, 0.0)


if __name__ == "__main__":
    key = jax.random.PRNGKey(0)
    k_adj, k_h, k_w, k_b = jax.random.split(key, 4)

    N = 512          # number of nodes (2 row tiles -> exercises init/finalize + megacore)
    in_feats = 32
    out_feats = 32

    # Synthetic directed binary graph with self-loops (every node gets >= 1 message,
    # matching the DGL assumption that update_all reaches all nodes).
    adj = (jax.random.uniform(k_adj, (N, N)) < 0.05).astype(jnp.float32)
    adj = jnp.maximum(adj, jnp.eye(N, dtype=jnp.float32))

    # Node features.
    h = jax.random.normal(k_h, (N, in_feats), dtype=jnp.float32)

    # Bundler linear: nn.Linear(2*in_feats, out_feats), xavier_uniform with relu gain.
    gain = jnp.sqrt(2.0)
    fan_in, fan_out = 2 * in_feats, out_feats
    bound = gain * jnp.sqrt(6.0 / (fan_in + fan_out))
    W = jax.random.uniform(k_w, (out_feats, 2 * in_feats),
                           minval=-bound, maxval=bound, dtype=jnp.float32)
    Wt = W.T                                  # [2*in_feats, out_feats]
    w_self = Wt[:in_feats, :]                 # acts on the node's own h
    w_neigh = Wt[in_feats:, :]                # acts on the aggregated c
    bias = jax.random.uniform(k_b, (1, out_feats),
                              minval=-1.0 / jnp.sqrt(fan_in),
                              maxval=1.0 / jnp.sqrt(fan_in),
                              dtype=jnp.float32)

    # TODO(synk): dropout is identity here (eval mode); use_bn=False path only
    # (lazy nn.BatchNorm1d in train mode and maxpool/LSTM aggregators not modeled).

    out = graphsage_forward(adj, h, w_self, w_neigh, bias)
    out = jax.block_until_ready(out)

    ref = reference_forward(adj, h, w_self, w_neigh, bias)
    assert out.shape == (N, out_feats)
    assert jnp.allclose(out, ref, atol=1e-4, rtol=1e-4), "mismatch vs reference"

    print("KERNEL_OK")
</pallas_src>

<mosaic_0001>
module attributes {stable_mosaic.version = 11 : i64} {
  func.func @graphsage_kernel(%arg0: i32, %arg1: i32, %arg2: memref<256x512xi8, #tpu.memory_space<vmem>>, %arg3: memref<512x128xbf16, #tpu.memory_space<vmem>>, %arg4: memref<512x128xbf16, #tpu.memory_space<vmem>>, %arg5: memref<256x128xf32, #tpu.memory_space<vmem>>, %arg6: memref<128x128xf32, #tpu.memory_space<vmem>>, %arg7: memref<128x128xf32, #tpu.memory_space<vmem>>, %arg8: memref<1x128xf32, #tpu.memory_space<vmem>>, %arg9: memref<256x128xf32, #tpu.memory_space<vmem>>, %arg10: memref<256x128xf32, #tpu.memory_space<vmem>>) attributes {dimension_semantics = [#tpu.dimension_semantics<parallel>, #tpu.dimension_semantics<arbitrary>], iteration_bounds = array<i64: 2, 1>, scalar_prefetch = 0 : i64, scratch_operands = 1 : i64, tpu.core_type = #tpu.core_type<tc>, window_params = [{transform_indices = @transform_0, window_bounds = array<i64: 256, 512>}, {pipeline_mode = #tpu.pipeline_mode<synchronous>, transform_indices = @transform_1, window_bounds = array<i64: 512, 128>}, {pipeline_mode = #tpu.pipeline_mode<synchronous>, transform_indices = @transform_2, window_bounds = array<i64: 512, 128>}, {transform_indices = @transform_3, window_bounds = array<i64: 256, 128>}, {pipeline_mode = #tpu.pipeline_mode<synchronous>, transform_indices = @transform_4, window_bounds = array<i64: 128, 128>}, {pipeline_mode = #tpu.pipeline_mode<synchronous>, transform_indices = @transform_5, window_bounds = array<i64: 128, 128>}, {pipeline_mode = #tpu.pipeline_mode<synchronous>, transform_indices = @transform_6, window_bounds = array<i64: 1, 128>}, {transform_indices = @transform_7, window_bounds = array<i64: 256, 128>}]} {
    %c0_i32 = arith.constant 0 : i32
    %0 = arith.cmpi eq, %arg1, %c0_i32 : i32
    %1 = arith.extui %0 : i1 to i32
    %c0_i32_0 = arith.constant 0 : i32
    %2 = arith.cmpi ne, %1, %c0_i32_0 : i32
    scf.if %2 {
      %cst_11 = arith.constant 0.000000e+00 : f32
      %20 = vector.broadcast %cst_11 : f32 to vector<256x128xf32>
      %c0_12 = arith.constant 0 : index
      %c0_13 = arith.constant 0 : index
      %21 = vector.load %arg10[%c0_12, %c0_13] : memref<256x128xf32, #tpu.memory_space<vmem>>, vector<256x128xf32>
      tpu.vector_store %arg10[%c0_12, %c0_13], %20 {strides = array<i32>} : memref<256x128xf32, #tpu.memory_space<vmem>>, vector<256x128xf32>,
    } else {
    }
    %c0 = arith.constant 0 : index
    %c0_1 = arith.constant 0 : index
    %3 = vector.load %arg2[%c0, %c0_1] : memref<256x512xi8, #tpu.memory_space<vmem>>, vector<256x512xi8>
    %4 = arith.sitofp %3 : vector<256x512xi8> to vector<256x512xbf16>
    %c512_i32 = arith.constant 512 : i32
    %5 = arith.muli %arg1, %c512_i32 : i32
    %6 = tpu.assume_multiple %5, 512 : i32
    %7 = arith.index_cast %6 : i32 to index
    %c0_2 = arith.constant 0 : index
    %8 = vector.load %arg3[%7, %c0_2] : memref<512x128xbf16, #tpu.memory_space<vmem>>, vector<512x128xbf16>
    %9 = arith.index_cast %6 : i32 to index
    %c0_3 = arith.constant 0 : index
    %10 = vector.load %arg4[%9, %c0_3] : memref<512x128xbf16, #tpu.memory_space<vmem>>, vector<512x128xbf16>
    %c0_4 = arith.constant 0 : index
    %c0_5 = arith.constant 0 : index
    %11 = vector.load %arg10[%c0_4, %c0_5] : memref<256x128xf32, #tpu.memory_space<vmem>>, vector<256x128xf32>
    %cst = arith.constant dense<0.000000e+00> : vector<256x128xf32>
    %12 = tpu.matmul %4, %8, %cst {dimension_numbers = #tpu.dot_dimension_numbers<[1], [0], [0], [1], [0, 0, 1, 1], [], []>} : vector<256x512xbf16>, vector<512x128xbf16>, vector<256x128xf32> -> vector<256x128xf32>
    %cst_6 = arith.constant dense<0.000000e+00> : vector<256x128xf32>
    %13 = tpu.matmul %4, %10, %cst_6 {dimension_numbers = #tpu.dot_dimension_numbers<[1], [0], [0], [1], [0, 0, 1, 1], [], []>} : vector<256x512xbf16>, vector<512x128xbf16>, vector<256x128xf32> -> vector<256x128xf32>
    %14 = arith.addf %12, %13 : vector<256x128xf32>
    %15 = arith.addf %11, %14 : vector<256x128xf32>
    %c0_7 = arith.constant 0 : index
    %c0_8 = arith.constant 0 : index
    %16 = vector.load %arg10[%c0_7, %c0_8] : memref<256x128xf32, #tpu.memory_space<vmem>>, vector<256x128xf32>
    tpu.vector_store %arg10[%c0_7, %c0_8], %15 {strides = array<i32>} : memref<256x128xf32, #tpu.memory_space<vmem>>, vector<256x128xf32>,
    %c0_i32_9 = arith.constant 0 : i32
    %17 = arith.cmpi eq, %arg1, %c0_i32_9 : i32
    %18 = arith.extui %17 : i1 to i32
    %c0_i32_10 = arith.constant 0 : i32
    %19 = arith.cmpi ne, %18, %c0_i32_10 : i32
    scf.if %19 {
      %c0_11 = arith.constant 0 : index
      %c0_12 = arith.constant 0 : index
      %20 = vector.load %arg10[%c0_11, %c0_12] : memref<256x128xf32, #tpu.memory_space<vmem>>, vector<256x128xf32>
      %21 = vector.extract_strided_slice %20 {offsets = [0, 32], sizes = [256, 1], strides = [1, 1]} : vector<256x128xf32> to vector<256x1xf32>
      %cst_13 = arith.constant 1.000000e+00 : f32
      %22 = vector.broadcast %cst_13 : f32 to vector<256x1xf32>
      %23 = arith.maximumf %21, %22 : vector<256x1xf32>
      %24 = tpu.reciprocal %23 : vector<256x1xf32> -> vector<256x1xf32>
      %25 = vector.broadcast %24 : vector<256x1xf32> to vector<256x128xf32>
      %26 = arith.mulf %20, %25 : vector<256x128xf32>
      %c0_14 = arith.constant 0 : index
      %c0_15 = arith.constant 0 : index
      %27 = vector.load %arg5[%c0_14, %c0_15] : memref<256x128xf32, #tpu.memory_space<vmem>>, vector<256x128xf32>
      %c0_16 = arith.constant 0 : index
      %c0_17 = arith.constant 0 : index
      %28 = vector.load %arg6[%c0_16, %c0_17] : memref<128x128xf32, #tpu.memory_space<vmem>>, vector<128x128xf32>
      %cst_18 = arith.constant dense<0.000000e+00> : vector<256x128xf32>
      %29 = tpu.matmul %27, %28, %cst_18 {dimension_numbers = #tpu.dot_dimension_numbers<[1], [0], [0], [1], [0, 0, 1, 1], [], []>} : vector<256x128xf32>, vector<128x128xf32>, vector<256x128xf32> -> vector<256x128xf32>
      %c0_19 = arith.constant 0 : index
      %c0_20 = arith.constant 0 : index
      %30 = vector.load %arg7[%c0_19, %c0_20] : memref<128x128xf32, #tpu.memory_space<vmem>>, vector<128x128xf32>
      %cst_21 = arith.constant dense<0.000000e+00> : vector<256x128xf32>
      %31 = tpu.matmul %26, %30, %cst_21 {dimension_numbers = #tpu.dot_dimension_numbers<[1], [0], [0], [1], [0, 0, 1, 1], [], []>} : vector<256x128xf32>, vector<128x128xf32>, vector<256x128xf32> -> vector<256x128xf32>
      %32 = arith.addf %29, %31 : vector<256x128xf32>
      %c0_22 = arith.constant 0 : index
      %c0_23 = arith.constant 0 : index
      %33 = vector.load %arg8[%c0_22, %c0_23] : memref<1x128xf32, #tpu.memory_space<vmem>>, vector<1x128xf32>
      %34 = vector.broadcast %33 : vector<1x128xf32> to vector<256x128xf32>
      %35 = arith.addf %32, %34 : vector<256x128xf32>
      %36 = arith.mulf %35, %35 : vector<256x128xf32>
      %cst_24 = arith.constant dense<0.000000e+00> : vector<256xf32>
      %37 = vector.multi_reduction <add>, %36, %cst_24 [1] : vector<256x128xf32> to vector<256xf32>
      %38 = vector.shape_cast %37 : vector<256xf32> to vector<256x1xf32>
      %cst_25 = arith.constant 1.000000e-24 : f32
      %39 = vector.broadcast %cst_25 : f32 to vector<256x1xf32>
      %40 = arith.maximumf %38, %39 : vector<256x1xf32>
      %41 = math.rsqrt %40 : vector<256x1xf32>
      %42 = vector.broadcast %41 : vector<256x1xf32> to vector<256x128xf32>
      %43 = arith.mulf %35, %42 : vector<256x128xf32>
      %cst_26 = arith.constant 0.000000e+00 : f32
      %44 = vector.broadcast %cst_26 : f32 to vector<256x128xf32>
      %45 = arith.maximumf %43, %44 : vector<256x128xf32>
      %c0_27 = arith.constant 0 : index
      %c0_28 = arith.constant 0 : index
      %46 = vector.load %arg9[%c0_27, %c0_28] : memref<256x128xf32, #tpu.memory_space<vmem>>, vector<256x128xf32>
      tpu.vector_store %arg9[%c0_27, %c0_28], %45 {strides = array<i32>} : memref<256x128xf32, #tpu.memory_space<vmem>>, vector<256x128xf32>,
    } else {
    }
    return
  }
  func.func @transform_0(%arg0: i32, %arg1: i32) -> (i32, i32) {
    %c0_i32 = arith.constant 0 : i32
    return %arg0, %arg1 : i32, i32
  }
  func.func @transform_1(%arg0: i32, %arg1: i32) -> (i32, i32) {
    %c0_i32 = arith.constant 0 : i32
    %c0_i32_0 = arith.constant 0 : i32
    %c0_i32_1 = arith.constant 0 : i32
    return %c0_i32, %c0_i32_0 : i32, i32
  }
  func.func @transform_2(%arg0: i32, %arg1: i32) -> (i32, i32) {
    %c0_i32 = arith.constant 0 : i32
    %c0_i32_0 = arith.constant 0 : i32
    %c0_i32_1 = arith.constant 0 : i32
    return %c0_i32, %c0_i32_0 : i32, i32
  }
  func.func @transform_3(%arg0: i32, %arg1: i32) -> (i32, i32) {
    %c0_i32 = arith.constant 0 : i32
    %c0_i32_0 = arith.constant 0 : i32
    return %arg0, %c0_i32 : i32, i32
  }
  func.func @transform_4(%arg0: i32, %arg1: i32) -> (i32, i32) {
    %c0_i32 = arith.constant 0 : i32
    %c0_i32_0 = arith.constant 0 : i32
    %c0_i32_1 = arith.constant 0 : i32
    return %c0_i32, %c0_i32_0 : i32, i32
  }
  func.func @transform_5(%arg0: i32, %arg1: i32) -> (i32, i32) {
    %c0_i32 = arith.constant 0 : i32
    %c0_i32_0 = arith.constant 0 : i32
    %c0_i32_1 = arith.constant 0 : i32
    return %c0_i32, %c0_i32_0 : i32, i32
  }
  func.func @transform_6(%arg0: i32, %arg1: i32) -> (i32, i32) {
    %c0_i32 = arith.constant 0 : i32
    %c0_i32_0 = arith.constant 0 : i32
    %c0_i32_1 = arith.constant 0 : i32
    return %c0_i32, %c0_i32_0 : i32, i32
  }
  func.func @transform_7(%arg0: i32, %arg1: i32) -> (i32, i32) {
    %c0_i32 = arith.constant 0 : i32
    %c0_i32_0 = arith.constant 0 : i32
    return %arg0, %c0_i32 : i32, i32
  }
}

</mosaic_0001>

<bundles_post_ra>
// kernel: tpu_custom_call.1
= control target key start
LH: loop header
LB: loop body
LE: loop exit
PB: predicated region body
PF: predicated region fallthrough
CT: control target
= control target key end

     0   :  { %s6236_s0 = inlined_call_operand.hbm [shape: s8[512,512], index: 0, kind: input, shape index: {}]   ;;  %s6237_s1 = inlined_call_operand.hbm [shape: bf16[512,128], index: 1, kind: input, shape index: {}]   ;;  %s6238_s2 = inlined_call_operand.hbm [shape: bf16[512,128], index: 2, kind: input, shape index: {}]   ;;  %s6239_s3 = inlined_call_operand.hbm [shape: f32[512,128], index: 3, kind: input, shape index: {}]   ;;  %s6240_s4 = inlined_call_operand.hbm [shape: f32[128,128], index: 4, kind: input, shape index: {}]   ;;  %s6241_s5 = inlined_call_operand.hbm [shape: f32[128,128], index: 5, kind: input, shape index: {}]   ;;  %s6242_s6 = inlined_call_operand.vmem [shape: f32[1,128], index: 6, kind: input, shape index: {}]   ;;  %s6243_s7 = inlined_call_operand.hbm [shape: f32[512,128], index: 7, kind: output, shape index: {}]  }
   0x1   :  { %6263 = sst [smem:[#allocation50_spill]] %s6236_s0 }
   0x2   :  { %6264 = sst [smem:[#allocation51_spill]] %s6237_s1 }
   0x3   :  { %6265 = sst [smem:[#allocation52_spill]] %s6238_s2 }
   0x4   :  { %6266 = sst [smem:[#allocation53_spill]] %s6240_s4 }
   0x5   :  { %6267 = sst [smem:[#allocation54_spill]] %s6241_s5 }
   0x6   :  { %12 = vsyncpa [#allocation4], 0 }
   0x7   :  { %14 = vsyncpa [#allocation4 + $0x1], 0 }
   0x8   :  { %15 = vsyncpa [#allocation7], 0 }
   0x9   :  { %16 = vsyncpa [#allocation10], 0 }
   0xa   :  { %18 = vsyncpa [#allocation10 + $0x1], 0 }
   0xb   :  { %19 = vsyncpa [#allocation13], 0 }
   0xc   :  { %20 = vsyncpa [#allocation5], 0 }
   0xd   :  { %22 = vsyncpa [#allocation5 + $0x1], 0  ;;  %s4835_s24 = smov 0   ;;  %s4837_s25 = smov 0  }
   0xe   :  { %s4839_s26 = smov 0   ;;  %s4841_s27 = smov 0  }
   0xf   :  { %s4843_s28 = smov 0   ;;  %s4845_s29 = smov 0  }
  0x10 LB: > { %6268 = sst [smem:[#allocation21_spill]] %s4768_s26  ;;  %s4866_s30 = sadd.s32 4294967295, %s4780_s29   ;;  %s4780_s29 = sphi %s4845_s29, %s28_s29   ;;  %s4776_s28 = sphi %s4843_s28, %s6350_s28   ;;  %s4772_s27 = sphi %s4841_s27, %s6349_s27   ;;  %s4768_s26 = sphi %s4839_s26, %s6353_s26   ;;  %s4764_s25 = sphi %s4837_s25, %s6352_s25   ;;  %s4760_s24 = sphi %s4835_s24, %s6351_s24  }
  0x11   : > { %6269 = sst [smem:[#allocation22_spill]] %s4776_s28  ;;  %s3886_s8 = sadd.s32 4294967294, %s4780_s29  }
  0x12   : > { %p62_p0 = scmp.ne.s32.totalorder %s4764_s25, %s4760_s24  ;;  %p63_p1 = scmp.eq.s32.totalorder %s4866_s30, 0 }
  0x13   : > { %p217_p2 = scmp.eq.s32.totalorder %s4866_s30, 1  ;;  %p223_p3 = scmp.eq.s32.totalorder %s3886_s8, 1 }
  0x14   : > { %p4875_p4 = por %p63_p1, %p62_p0  ;;  %p3887_p5 = scmp.ge.s32.totalorder %s4780_s29, 1 }
  0x15   : > { %p4880_p6 = por %p223_p3, %p62_p0  ;;  %p230_p7 = scmp.lt.s32.totalorder %s4780_s29, 3 }
  0x16   : > { %s6272_s1 = sld [smem:[#allocation51_spill]]  ;;  %s4782_s15 = smov [#allocation6]  }
  0x17   : > { %p4888_p8 = pnand %p3887_p5, %p230_p7  ;;  %s243_s16 = sshll.u32 %s4782_s15, 4  ;;  %s244_s16 = int_to_ptr.vmem [resolvable:$true] %s243_s16 }
  0x18   : > { %p3892_p11 = scmp.ge.s32.totalorder %s4780_s29, 2  ;;  %s6275_s4 = sld [smem:[#allocation53_spill]] }
  0x19   : > { %p4275_p9 = pneg %p4888_p8  ;;  %s4783_s21 = smov 64  }
  0x1a   : > { %s4784_s22 = smov 4   ;;  %s4785_s23 = smov [#allocation11]  }
  0x1b   : > { %p4896_p10 = pnand %p4275_p9, %p63_p1  ;;  %s271_s8 = sshll.u32 %s4785_s23, 4  ;;  %s272_s8 = int_to_ptr.vmem [resolvable:$true] %s271_s8 }
  0x1c   : > { %s241_s13 = sshll.u32 %s6272_s1, 4  ;;  %s6244_s11 = smov 128   ;;  %s242_s13 = int_to_ptr.hbm [resolvable:$true] %s241_s13 }
  0x1d   : > { %4278 = dma.hbm_to_vmem [thread:$0]  (!%p4896_p10), %s242_s13, 4096, %s244_s16, [#allocation7], %s4783_s21, %s4783_s21, %s4784_s22  }
  0x1e   : > { %s269_s20 = sshll.u32 %s6275_s4, 4  ;;  %s6245_s12 = smov 8   ;;  %s270_s20 = int_to_ptr.hbm [resolvable:$true] %s269_s20 }
  0x1f   : > { %4284 = dma.hbm_to_vmem [thread:$0]  (!%p4896_p10), %s270_s20, 2048, %s272_s8, [#allocation10], %s6244_s11, %s6244_s11, %s6245_s12  }
  0x20   : > { %s6276_s2 = sld [smem:[#allocation52_spill]]  ;;  %s4788_s13 = smov [#allocation8]  }
  0x21   : > { %s257_s16 = sshll.u32 %s4788_s13, 4  ;;  %s6277_s5 = sld [smem:[#allocation54_spill]]  ;;  %s258_s16 = int_to_ptr.vmem [resolvable:$true] %s257_s16 }
  0x22   : > { %s4789_s20 = smov [#allocation12]   ;;  %s40_s15 = sadd.s32 1, %s4776_s28 }
  0x23   : > { %s285_s8 = sshll.u32 %s4789_s20, 4  ;;  %s49_s18 = sadd.s32 1, %s4768_s26  ;;  %s286_s8 = int_to_ptr.vmem [resolvable:$true] %s285_s8 }
  0x24   : > { %p42_p12 = scmp.ge.s32.totalorder %s40_s15, 2  ;;  %p56_p13 = scmp.ne.s32.totalorder %s4768_s26, %s4764_s25 }
  0x25   : > { %p57_p0 = scmp.eq.s32.totalorder %s4780_s29, 0  ;;  %p4303_p3 = scmp.lt.s32.totalorder %s4780_s29, 2 }
  0x26   : > { %s255_s19 = sshll.u32 %s6276_s2, 4  ;;  %s6355_s15 = smov (%p42_p12, %s40_s15), 0  ;;  %s256_s19 = int_to_ptr.hbm [resolvable:$true] %s255_s19 }
  0x27   : > { %s283_s4 = sshll.u32 %s6277_s5, 4  ;;  %6278 = sst [smem:[#allocation23_spill]] %s6355_s15  ;;  %s284_s4 = int_to_ptr.hbm [resolvable:$true] %s283_s4 }
  0x28   : > { %4281 = dma.hbm_to_vmem [thread:$0]  (!%p4896_p10), %s256_s19, 4096, %s258_s16, [#allocation7], %s4783_s21, %s4783_s21, %s4784_s22  }
  0x29   : > { %4287 = dma.hbm_to_vmem [thread:$0]  (!%p4896_p10), %s284_s4, 2048, %s286_s8, [#allocation13], %s6244_s11, %s6244_s11, %s6245_s12  }
  0x2a   : > { %p4932_p5 = por %p57_p0, %p56_p13  ;;  %p4938_p7 = por %p217_p2, %p56_p13 }
  0x2b   : > { %s44_s4 = ssub.s32 %s4776_s28, %s6355_s15  ;;  %s302_s21 = sand.u32 1, %s4768_s26  }
  0x2c   : > { %p47_p9 = scmp.eq.s32.totalorder %s44_s4, 0  ;;  %s3893_s22 = sshll.u32 %s302_s21, 8 }
  0x2d   : > { %s4170_s19 = sshll.u32 %s4776_s28, 8  ;;  %s6282_s0 = sld [smem:[#allocation50_spill]] }
  0x2e   : > { %s4947_s13 = scalar_select %p47_p9, %s4768_s26, %s49_s18  }
  0x2f   : > { %s306_s11 = scalar_lea.vmem [#allocation3], %s3893_s22  ;;  %p4289_p2 = pnand %p4303_p3, %p4932_p5 }
  0x30   : > { %6281 = sst [smem:[#allocation24_spill]] %s4947_s13  ;;  %s317_s12 = sshll.u32 %s306_s11, 4  ;;  %s318_s12 = int_to_ptr.vmem [resolvable:$true] %s317_s12 }
  0x31   : > { %s336_s4 = scalar_lea.hbm %s6239_s3, %s4170_s19  ;;  %s303_s15 = scalar_lea.sflag [#allocation4], %s302_s21 }
  0x32   : > { %s4790_s18 = smov 512   ;;  %s4791_s28 = smov 32  }
  0x33   : > { %s314_s20 = scalar_lea.hbm %s6282_s0, %s4170_s19  ;;  %s337_s13 = sshll.u32 %s336_s4, 4  ;;  %s338_s13 = int_to_ptr.hbm [resolvable:$true] %s337_s13 }
  0x34   : > { %s315_s8 = sshll.u32 %s314_s20, 4  ;;  %s331_s16 = scalar_lea.vmem [#allocation9], %s3893_s22  ;;  %s316_s8 = int_to_ptr.hbm [resolvable:$true] %s315_s8 }
  0x35   : > { %4291 = dma.hbm_to_vmem [thread:$0]  (!%p4289_p2), %s316_s8, 4096, %s318_s12, %s303_s15, %s4790_s18, %s4790_s18, %s4791_s28  }
  0x36   : > { %s339_s23 = sshll.u32 %s331_s16, 4  ;;  %s327_s20 = sand.u32 1, %s4780_s29   ;;  %s340_s23 = int_to_ptr.vmem [resolvable:$true] %s339_s23 }
  0x37   : > { %s328_s11 = scalar_lea.sflag [#allocation10], %s327_s20  ;;  %s6283_s0 = smov 8  }
  0x38   : > { %s6284_s26 = smov 128   ;;  %351 = sbr.rel (%p4888_p8) target bundleno = 1286 (0x506), region = 48 }
  0x39   : > { %4294 = dma.hbm_to_vmem [thread:$0]  (!%p4289_p2), %s338_s13, 4096, %s340_s23, %s328_s11, %s6284_s26, %s6284_s26, %s6283_s0  }
  0x3d   : > { %s4966_s2 = sand.u32 1, %s4764_s25  }
  0x3e   : > { %s4969_s5 = sshll.u32 %s4966_s2, 8  ;;  %s354_s28 = scalar_lea.sflag [#allocation4], %s4966_s2 }
  0x3f   : > { %s4973_s12 = scalar_lea.vmem [#allocation3], %s4969_s5 }
  0x40   : > { %4735 = dma.done.wait (%p4875_p4), %s354_s28, 4096  }
  0x41   : > { %4737 = vsyncadd (%p4875_p4), %s354_s28, 4294963200 }
  0x42   : > { %4739 = dma.done.wait (%p63_p1), [#allocation7], 8192  }
  0x43   : > { %4741 = vsyncadd (%p63_p1), [#allocation7], 4294959104  ;;  %s373_s0 = sand.u32 1, %s4866_s30   ;;  %s4985_s14 = scalar_lea.vmem [#allocation9], %s4969_s5 }
  0x44   : > { %s374_s26 = scalar_lea.sflag [#allocation10], %s373_s0 }
  0x45   : > { %4743 = dma.done.wait (%p4875_p4), %s374_s26, 4096  }
  0x46   : > { %4745 = vsyncadd (%p4875_p4), %s374_s26, 4294963200 }
  0x47   : > { %4747 = dma.done.wait (%p63_p1), [#allocation10], 2048  }
  0x48   : > { %4749 = vsyncadd (%p63_p1), [#allocation10], 4294965248 }
  0x49   : > { %4751 = dma.done.wait (%p63_p1), [#allocation13], 2048  }
  0x4a   : > { %4753 = vsyncadd (%p63_p1), [#allocation13], 4294965248  ;;  %v4211_v0 = vld [vmem:[#allocation8 + $0x38] sm:$0xff]  ;;  %v4210_v2 = vld [vmem:[#allocation8 + $0x30] sm:$0xff]  ;;  %s6056_s15 = scalar_lea.vmem [#allocation14], %s4969_s5  ;;  %s4236_s1 = sshll.u32 %s4772_s27, 8 }
  0x4b   : > { %v4219_v1 = vld [vmem:[#allocation8 + $0x78] sm:$0xff]  ;;  %4237 = vmatpush.bf16.msra.mxu2 %v4211_v0  ;;  %v4218_v3 = vld [vmem:[#allocation8 + $0x70] sm:$0xff]  ;;  %1175 = vmatpush.bf16.msra.mxu0 %v4211_v0  ;;  %v4209_v4 = vld [vmem:[#allocation8 + $0x28] sm:$0xff]  ;;  %s3732_s19 = scalar_lea.hbm %s6243_s7, %s4236_s1  ;;  %s3733_s13 = sshll.u32 %s6056_s15, 4  ;;  %s3734_s13 = int_to_ptr.vmem [resolvable:$true] %s3733_s13 }
  0x4c   : > { %4245 = vmatpush.bf16.msra.mxu3 %v4219_v1  ;;  %1264 = vmatpush.bf16.msra.mxu1 %v4219_v1  ;;  %v4217_v5 = vld [vmem:[#allocation8 + $0x68] sm:$0xff]  ;;  %v4208_v6 = vld [vmem:[#allocation8 + $0x20] sm:$0xff]  ;;  %v4207_v8 = vld [vmem:[#allocation8 + $0x18] sm:$0xff]  ;;  %s3735_s8 = sshll.u32 %s3732_s19, 4  ;;  %s3721_s27 = scalar_lea.sflag [#allocation5], %s4966_s2  ;;  %s3736_s8 = int_to_ptr.hbm [resolvable:$true] %s3735_s8 }
  0x4d   : > { %v4216_v7 = vld [vmem:[#allocation8 + $0x60] sm:$0xff]  ;;  %v4215_v9 = vld [vmem:[#allocation8 + $0x58] sm:$0xff]  ;;  %v4206_v10 = vld [vmem:[#allocation8 + $0x10] sm:$0xff]  ;;  %s4696_s4 = sshra.s32 %s3736_s8, 4  ;;  %s4702_s20 = scalar_lea.hbm %s6243_s7, 512  ;;  %s4697_s4 = int_to_ptr.hbm [resolvable:$true] %s4696_s4 }
  0x4e   : > { %v4214_v11 = vld [vmem:[#allocation8 + $0x50] sm:$0xff]  ;;  %v5000_v12 = vld [vmem:[%s4973_s12 + $0x80] sm:$0xff]  ;;  %v5003_v13 = vld [vmem:[%s4973_s12 + $0x88] sm:$0xff]  ;;  %s4698_s18 = scalar_lea.hbm %s4697_s4, 256  ;;  %p4703_p10 = scmp.lt.s32.totalorder %s4697_s4, %s6243_s7 }
  0x4f   : > { %4238 = vmatpush.bf16.msra.mxu2 %v4210_v2  ;;  %1176 = vmatpush.bf16.msra.mxu0 %v4210_v2  ;;  %v5006_v14 = vld [vmem:[%s4973_s12] sm:$0xff]  ;;  %v5009_v15 = vld [vmem:[%s4973_s12 + $0x8] sm:$0xff]  ;;  %v560_v16 = vunpack.c.0.s8 %v5000_v12  ;;  %v564_v17 = vunpack.c.1.s8 %v5000_v12  ;;  %v561_v18 = vunpack.c.0.s8 %v5003_v13  ;;  %v565_v19 = vunpack.c.1.s8 %v5003_v13  ;;  %v4227_v32 = vld [vmem:[#allocation8 + $0xb8] sm:$0xff]  ;;  %p4699_p1 = scmp.ne.s32.totalorder %s4697_s4, %s4698_s18  ;;  %p4704_p12 = scmp.lt.s32.totalorder %s4702_s20, %s4698_s18 }
  0x50   : > { %4246 = vmatpush.bf16.msra.mxu3 %v4218_v3  ;;  %1265 = vmatpush.bf16.msra.mxu1 %v4218_v3  ;;  %v4205_v20 = vld [vmem:[#allocation8 + $0x8] sm:$0xff]  ;;  %v496_v22 = vunpack.c.0.s8 %v5006_v14  ;;  %v500_v23 = vunpack.c.1.s8 %v5006_v14  ;;  %v497_v24 = vunpack.c.0.s8 %v5009_v15  ;;  %v501_v25 = vunpack.c.1.s8 %v5009_v15  ;;  %v4204_v30 = vld [vmem:[#allocation8] sm:$0xff]  ;;  %v4235_v33 = vld [vmem:[#allocation8 + $0xf8] sm:$0xff] }
  0x51   : > { %v4213_v21 = vld [vmem:[#allocation8 + $0x48] sm:$0xff]  ;;  %v688_v26 = vcvt.s32.f32 %v560_v16  ;;  %v692_v27 = vcvt.s32.f32 %v564_v17  ;;  %v689_v28 = vcvt.s32.f32 %v561_v18  ;;  %v693_v29 = vcvt.s32.f32 %v565_v19  ;;  %v4212_v31 = vld [vmem:[#allocation8 + $0x40] sm:$0xff]  ;;  %v4226_v42 = vld [vmem:[#allocation8 + $0xb0] sm:$0xff]  ;;  %p4700_p4 = pnand %p4699_p1, %p4938_p7  ;;  %p4705_p13 = por %p4704_p12, %p4703_p10 }
  0x52   : > { %v624_v34 = vcvt.s32.f32 %v496_v22  ;;  %v628_v35 = vcvt.s32.f32 %v500_v23  ;;  %v625_v36 = vcvt.s32.f32 %v497_v24  ;;  %v629_v37 = vcvt.s32.f32 %v501_v25  ;;  %v4234_v43 = vld [vmem:[#allocation8 + $0xf0] sm:$0xff]  ;;  %v4225_v44 = vld [vmem:[#allocation8 + $0xa8] sm:$0xff]  ;;  %v4224_v2 = vld [vmem:[#allocation8 + $0xa0] sm:$0xff] }
  0x53   : > { %4239 = vmatpush.bf16.msra.mxu2 %v4209_v4  ;;  %1177 = vmatpush.bf16.msra.mxu0 %v4209_v4  ;;  %v5019_v38 = vpack.c.bf16 %v692_v27, %v688_v26  ;;  %v5021_v39 = vpack.c.bf16 %v693_v29, %v689_v28  ;;  %v4233_v45 = vld [vmem:[#allocation8 + $0xe8] sm:$0xff]  ;;  %v568_v46 = vunpack.c.2.s8 %v5000_v12  ;;  %v572_v47 = vunpack.c.3.s8 %v5000_v12  ;;  %v4232_v3 = vld [vmem:[#allocation8 + $0xe0] sm:$0xff]  ;;  %v4223_v28 = vld [vmem:[#allocation8 + $0x98] sm:$0xff]  ;;  %p4701_p8 = pneg %p4700_p4 }
  0x54   : > { %4247 = vmatpush.bf16.msra.mxu3 %v4217_v5  ;;  %1266 = vmatpush.bf16.msra.mxu1 %v4217_v5  ;;  %v5023_v40 = vpack.c.bf16 %v628_v35, %v624_v34  ;;  %v5025_v41 = vpack.c.bf16 %v629_v37, %v625_v36  ;;  %v569_v48 = vunpack.c.2.s8 %v5003_v13  ;;  %v573_v49 = vunpack.c.3.s8 %v5003_v13  ;;  %v484_v4 = vld [vmem:[%s4973_s12 + $0xa0] sm:$0xff]  ;;  %v485_v5 = vld [vmem:[%s4973_s12 + $0xa8] sm:$0xff]  ;;  %v4231_v29 = vld [vmem:[#allocation8 + $0xd8] sm:$0xff] }
  0x55   : > { %v504_v50 = vunpack.c.2.s8 %v5006_v14  ;;  %v508_v51 = vunpack.c.3.s8 %v5006_v14  ;;  %v505_v52 = vunpack.c.2.s8 %v5009_v15  ;;  %v509_v53 = vunpack.c.3.s8 %v5009_v15  ;;  %p4706_p0 = pnand %p4705_p13, %p4701_p8 }
  0x56   : > { %v696_v54 = vcvt.s32.f32 %v568_v46  ;;  %v700_v55 = vcvt.s32.f32 %v572_v47  ;;  %v697_v56 = vcvt.s32.f32 %v569_v48  ;;  %v701_v57 = vcvt.s32.f32 %v573_v49 }
  0x57   : > { %4240 = vmatpush.bf16.msra.mxu2 %v4208_v6  ;;  %1178 = vmatpush.bf16.msra.mxu0 %v4208_v6  ;;  %v632_v58 = vcvt.s32.f32 %v504_v50  ;;  %v636_v59 = vcvt.s32.f32 %v508_v51  ;;  %v633_v60 = vcvt.s32.f32 %v505_v52  ;;  %v637_v61 = vcvt.s32.f32 %v509_v53  ;;  %v468_v6 = vld [vmem:[%s4973_s12 + $0x20] sm:$0xff] }
  0x58   : > { %4248 = vmatpush.bf16.msra.mxu3 %v4216_v7  ;;  %1267 = vmatpush.bf16.msra.mxu1 %v4216_v7  ;;  %v5039_v62 = vpack.c.bf16 %v700_v55, %v696_v54  ;;  %v5041_v63 = vpack.c.bf16 %v701_v57, %v697_v56  ;;  %v469_v7 = vld [vmem:[%s4973_s12 + $0x28] sm:$0xff]  ;;  %v512_v12 = vunpack.c.0.s8 %v468_v6  ;;  %v516_v13 = vunpack.c.1.s8 %v468_v6  ;;  %v4222_v54 = vld [vmem:[#allocation8 + $0x90] sm:$0xff]  ;;  %v488_v56 = vld [vmem:[%s4973_s12 + $0xc0] sm:$0xff] }
  0x59   : > { %v5043_v0 = vpack.c.bf16 %v636_v59, %v632_v58  ;;  %v5045_v1 = vpack.c.bf16 %v637_v61, %v633_v60  ;;  %v513_v14 = vunpack.c.0.s8 %v469_v7  ;;  %v517_v15 = vunpack.c.1.s8 %v469_v7  ;;  %v4230_v55 = vld [vmem:[#allocation8 + $0xd0] sm:$0xff]  ;;  %v489_v57 = vld [vmem:[%s4973_s12 + $0xc8] sm:$0xff]  ;;  %v472_v58 = vld [vmem:[%s4973_s12 + $0x40] sm:$0xff] }
  0x5a   : > { %v520_v34 = vunpack.c.2.s8 %v468_v6  ;;  %v524_v35 = vunpack.c.3.s8 %v468_v6  ;;  %v521_v36 = vunpack.c.2.s8 %v469_v7  ;;  %v525_v37 = vunpack.c.3.s8 %v469_v7  ;;  %v473_v59 = vld [vmem:[%s4973_s12 + $0x48] sm:$0xff] }
  0x5b   : > { %4241 = vmatpush.bf16.msra.mxu2 %v4207_v8  ;;  %1179 = vmatpush.bf16.msra.mxu0 %v4207_v8  ;;  %v576_v8 = vunpack.c.0.s8 %v484_v4  ;;  %v641_v22 = vcvt.s32.f32 %v513_v14  ;;  %v645_v23 = vcvt.s32.f32 %v517_v15  ;;  %v592_v60 = vunpack.c.0.s8 %v488_v56 }
  0x5c   : > { %4249 = vmatpush.bf16.msra.mxu3 %v4215_v9  ;;  %1268 = vmatpush.bf16.msra.mxu1 %v4215_v9  ;;  %v580_v9 = vunpack.c.1.s8 %v484_v4  ;;  %v648_v46 = vcvt.s32.f32 %v520_v34  ;;  %v652_v47 = vcvt.s32.f32 %v524_v35  ;;  %v649_v48 = vcvt.s32.f32 %v521_v36 }
  0x5d   : > { %v704_v16 = vcvt.s32.f32 %v576_v8  ;;  %v5061_v27 = vpack.c.bf16 %v645_v23, %v641_v22  ;;  %v653_v49 = vcvt.s32.f32 %v525_v37  ;;  %v596_v61 = vunpack.c.1.s8 %v488_v56  ;;  %v4179_v22 = vld [vmem:[#allocation6 + $0x38] sm:$0xff] }
  0x5e   : > { %v708_v17 = vcvt.s32.f32 %v580_v9  ;;  %v5071_v52 = vpack.c.bf16 %v652_v47, %v648_v46  ;;  %v529_v6 = vunpack.c.0.s8 %v473_v59  ;;  %v533_v7 = vunpack.c.1.s8 %v473_v59  ;;  %v4187_v23 = vld [vmem:[#allocation6 + $0x78] sm:$0xff] }
  0x5f   : > { %4242 = vmatpush.bf16.msra.mxu2 %v4206_v10  ;;  %1180 = vmatpush.bf16.msra.mxu0 %v4206_v10  ;;  %v577_v10 = vunpack.c.0.s8 %v485_v5  ;;  %v5073_v53 = vpack.c.bf16 %v653_v49, %v649_v48  ;;  %v720_v8 = vcvt.s32.f32 %v592_v60  ;;  %v724_v9 = vcvt.s32.f32 %v596_v61  ;;  %v4177_v60 = vld [vmem:[#allocation6 + $0x28] sm:$0xff]  ;;  %v5106_v61 = vld [vmem:[%s4973_s12 + $0xe0] sm:$0xff] }
  0x60   : > { %4250 = vmatpush.bf16.msra.mxu3 %v4214_v11  ;;  %1269 = vmatpush.bf16.msra.mxu1 %v4214_v11  ;;  %v581_v11 = vunpack.c.1.s8 %v485_v5  ;;  %v5055_v24 = vpack.c.bf16 %v708_v17, %v704_v16  ;;  %v657_v14 = vcvt.s32.f32 %v529_v6  ;;  %v661_v15 = vcvt.s32.f32 %v533_v7 }
  0x61   : > { %v705_v18 = vcvt.s32.f32 %v577_v10  ;;  %v5083_v16 = vpack.c.bf16 %v724_v9, %v720_v8  ;;  %v540_v34 = vunpack.c.3.s8 %v472_v58  ;;  %v537_v35 = vunpack.c.2.s8 %v473_v59 }
  0x62   : > { %v709_v19 = vcvt.s32.f32 %v581_v11  ;;  %v541_v36 = vunpack.c.3.s8 %v473_v59  ;;  %v4228_v59 = vld [vmem:[#allocation8 + $0xc0] sm:$0xff]  ;;  %v608_v6 = vunpack.c.0.s8 %v5106_v61  ;;  %v612_v7 = vunpack.c.1.s8 %v5106_v61 }
  0x63   : > { %4243 = vmatpush.bf16.msra.mxu2 %v4205_v20  ;;  %1181 = vmatpush.bf16.msra.mxu0 %v4205_v20  ;;  %v640_v20 = vcvt.s32.f32 %v512_v12  ;;  %v668_v46 = vcvt.s32.f32 %v540_v34  ;;  %v665_v47 = vcvt.s32.f32 %v537_v35 }
  0x64   : > { %4251 = vmatpush.bf16.msra.mxu3 %v4213_v21  ;;  %1270 = vmatpush.bf16.msra.mxu1 %v4213_v21  ;;  %v644_v21 = vcvt.s32.f32 %v516_v13  ;;  %v5057_v25 = vpack.c.bf16 %v709_v19, %v705_v18  ;;  %v5089_v19 = vpack.c.bf16 %v661_v15, %v657_v14  ;;  %v669_v48 = vcvt.s32.f32 %v541_v36  ;;  %v4174_v36 = vld [vmem:[#allocation6 + $0x10] sm:$0xff] }
  0x66   : > { %v5059_v26 = vpack.c.bf16 %v644_v21, %v640_v20  ;;  %v4221_v20 = vld [vmem:[#allocation8 + $0x88] sm:$0xff] }
  0x67   : > { %4244 = vmatpush.bf16.msra.mxu2 %v4204_v30  ;;  %1182 = vmatpush.bf16.msra.mxu0 %v4204_v30  ;;  %v584_v30 = vunpack.c.2.s8 %v484_v4  ;;  %v4229_v21 = vld [vmem:[#allocation8 + $0xc8] sm:$0xff] }
  0x68   : > { %4252 = vmatpush.bf16.msra.mxu3 %v4212_v31  ;;  %1271 = vmatpush.bf16.msra.mxu1 %v4212_v31  ;;  %v588_v31 = vunpack.c.3.s8 %v484_v4  ;;  %v528_v4 = vunpack.c.0.s8 %v472_v58 }
  0x6a   : > { %1223 = vmatmul.bf16.vlgmr.msra.gmra.mxu2 %v5019_v38  ;;  %1183 = vmatmul.bf16.vlgmr.msra.gmra.mxu0 %v5023_v40  ;;  %v656_v12 = vcvt.s32.f32 %v528_v4  ;;  %v5114_v4 = vld [vmem:[%s4973_s12 + $0x60] sm:$0xff] }
  0x6b   : > { %1353 = vmatpush.bf16.msrb.mxu2 %v4227_v32  ;;  %1312 = vmatmul.bf16.vlgmr.msra.gmra.mxu3 %v5021_v39  ;;  %v585_v32 = vunpack.c.2.s8 %v485_v5 }
  0x6c   : > { %1442 = vmatpush.bf16.msrb.mxu3 %v4235_v33  ;;  %1272 = vmatmul.bf16.vlgmr.msra.gmra.mxu1 %v5025_v41  ;;  %v589_v33 = vunpack.c.3.s8 %v485_v5  ;;  %v532_v5 = vunpack.c.1.s8 %v472_v58 }
  0x6d   : > { %1723 = vmatpush.bf16.msrb.mxu0 %v4179_v22  ;;  %1812 = vmatpush.bf16.msrb.mxu1 %v4187_v23 }
  0x6e   : > { %v660_v13 = vcvt.s32.f32 %v532_v5  ;;  %v5117_v5 = vld [vmem:[%s4973_s12 + $0x68] sm:$0xff] }
  0x6f   : > { %1354 = vmatpush.bf16.msrb.mxu2 %v4226_v42  ;;  %v712_v42 = vcvt.s32.f32 %v584_v30  ;;  %v601_v30 = vunpack.c.2.s8 %v489_v57  ;;  %v545_v14 = vunpack.c.0.s8 %v5117_v5  ;;  %v549_v15 = vunpack.c.1.s8 %v5117_v5 }
  0x70   : > { %1443 = vmatpush.bf16.msrb.mxu3 %v4234_v43  ;;  %v716_v43 = vcvt.s32.f32 %v588_v31  ;;  %v5087_v18 = vpack.c.bf16 %v660_v13, %v656_v12  ;;  %v605_v31 = vunpack.c.3.s8 %v489_v57  ;;  %v544_v12 = vunpack.c.0.s8 %v5114_v4 }
  0x71   : > { %v548_v13 = vunpack.c.1.s8 %v5114_v4 }
  0x72   : > { %v5067_v50 = vpack.c.bf16 %v716_v43, %v712_v42  ;;  %v729_v43 = vcvt.s32.f32 %v601_v30  ;;  %v672_v30 = vcvt.s32.f32 %v544_v12 }
  0x73   : > { %1355 = vmatpush.bf16.msrb.mxu2 %v4225_v44  ;;  %v713_v44 = vcvt.s32.f32 %v585_v32  ;;  %v4178_v32 = vld [vmem:[#allocation6 + $0x30] sm:$0xff] }
  0x74   : > { %1444 = vmatpush.bf16.msrb.mxu3 %v4233_v45  ;;  %v717_v45 = vcvt.s32.f32 %v589_v33  ;;  %v536_v33 = vunpack.c.2.s8 %v472_v58  ;;  %1724 = vmatpush.bf16.msrb.mxu0 %v4178_v32  ;;  %v4220_v58 = vld [vmem:[#allocation8 + $0x80] sm:$0xff]  ;;  %v673_v32 = vcvt.s32.f32 %v545_v14 }
  0x76   : > { %v5069_v51 = vpack.c.bf16 %v717_v45, %v713_v44  ;;  %v733_v44 = vcvt.s32.f32 %v605_v31  ;;  %v664_v45 = vcvt.s32.f32 %v536_v33  ;;  %v676_v31 = vcvt.s32.f32 %v548_v13 }
  0x77   : > { %1356 = vmatpush.bf16.msrb.mxu2 %v4224_v2  ;;  %v593_v2 = vunpack.c.0.s8 %v489_v57  ;;  %v677_v33 = vcvt.s32.f32 %v549_v15 }
  0x78   : > { %1445 = vmatpush.bf16.msrb.mxu3 %v4232_v3  ;;  %v597_v3 = vunpack.c.1.s8 %v489_v57  ;;  %v4186_v57 = vld [vmem:[#allocation6 + $0x70] sm:$0xff]  ;;  %1725 = vmatpush.bf16.msrb.mxu0 %v4177_v60  ;;  %v4172_v60 = vld [vmem:[#allocation6] sm:$0xff] }
  0x79   : > { %v721_v10 = vcvt.s32.f32 %v593_v2  ;;  %v5109_v2 = vld [vmem:[%s4973_s12 + $0xe8] sm:$0xff]  ;;  %1813 = vmatpush.bf16.msrb.mxu1 %v4186_v57  ;;  %v620_v57 = vunpack.c.3.s8 %v5106_v61 }
  0x7a   : > { %1228 = vmatmul.bf16.gmra.mxu2 %v5039_v62  ;;  %1188 = vmatmul.bf16.gmra.mxu0 %v5043_v0  ;;  %v725_v11 = vcvt.s32.f32 %v597_v3  ;;  %v4185_v3 = vld [vmem:[#allocation6 + $0x68] sm:$0xff]  ;;  %v609_v8 = vunpack.c.0.s8 %v5109_v2  ;;  %v613_v9 = vunpack.c.1.s8 %v5109_v2 }
  0x7b   : > { %1317 = vmatmul.bf16.gmra.mxu3 %v5041_v63  ;;  %1357 = vmatpush.bf16.msrb.mxu2 %v4223_v28  ;;  %v600_v28 = vunpack.c.2.s8 %v488_v56 }
  0x7c   : > { %1277 = vmatmul.bf16.gmra.mxu1 %v5045_v1  ;;  %1446 = vmatpush.bf16.msrb.mxu3 %v4231_v29  ;;  %v5085_v17 = vpack.c.bf16 %v725_v11, %v721_v10  ;;  %v604_v29 = vunpack.c.3.s8 %v488_v56  ;;  %v5101_v56 = vpack.c.bf16 %v669_v48, %v665_v47  ;;  %v4176_v10 = vld [vmem:[#allocation6 + $0x20] sm:$0xff]  ;;  %v737_v22 = vcvt.s32.f32 %v609_v8  ;;  %v4181_v47 = vld [vmem:[#allocation6 + $0x48] sm:$0xff] }
  0x7d   : > { %v728_v37 = vcvt.s32.f32 %v600_v28  ;;  %1814 = vmatpush.bf16.msrb.mxu1 %v4185_v3  ;;  %v4184_v11 = vld [vmem:[#allocation6 + $0x60] sm:$0xff]  ;;  %v741_v23 = vcvt.s32.f32 %v613_v9  ;;  %1726 = vmatpush.bf16.msrb.mxu0 %v4176_v10  ;;  %v4175_v28 = vld [vmem:[#allocation6 + $0x18] sm:$0xff]  ;;  %v616_v48 = vunpack.c.2.s8 %v5106_v61  ;;  %v553_v8 = vunpack.c.2.s8 %v5117_v5 }
  0x7e   : > { %v732_v42 = vcvt.s32.f32 %v604_v29  ;;  %v4183_v29 = vld [vmem:[#allocation6 + $0x58] sm:$0xff]  ;;  %v4180_v3 = vld [vmem:[#allocation6 + $0x40] sm:$0xff]  ;;  %v557_v9 = vunpack.c.3.s8 %v5117_v5  ;;  %v466_v5 = vld [vmem:[%s4973_s12 + $0x10] sm:$0xff] }
  0x7f   : > { %1358 = vmatpush.bf16.msrb.mxu2 %v4222_v54  ;;  %v5097_v54 = vpack.c.bf16 %v733_v44, %v729_v43  ;;  %v5129_v35 = vpack.c.bf16 %v741_v23, %v737_v22  ;;  %v4182_v43 = vld [vmem:[#allocation6 + $0x50] sm:$0xff]  ;;  %v4195_v44 = vld [vmem:[#allocation6 + $0xb8] sm:$0xff]  ;;  %v744_v10 = vcvt.s32.f32 %v616_v48  ;;  %v681_v14 = vcvt.s32.f32 %v553_v8 }
  0x80   : > { %1447 = vmatpush.bf16.msrb.mxu3 %v4230_v55  ;;  %v5095_v49 = vpack.c.bf16 %v732_v42, %v728_v37  ;;  %v5099_v55 = vpack.c.bf16 %v668_v46, %v664_v45  ;;  %v5131_v37 = vpack.c.bf16 %v676_v31, %v672_v30  ;;  %v5133_v42 = vpack.c.bf16 %v677_v33, %v673_v32  ;;  %v4203_v45 = vld [vmem:[#allocation6 + $0xf8] sm:$0xff]  ;;  %v4173_v46 = vld [vmem:[#allocation6 + $0x8] sm:$0xff] }
  0x81   : > { %1815 = vmatpush.bf16.msrb.mxu1 %v4184_v11  ;;  %1727 = vmatpush.bf16.msrb.mxu0 %v4175_v28  ;;  %v748_v11 = vcvt.s32.f32 %v620_v57  ;;  %v685_v15 = vcvt.s32.f32 %v557_v9  ;;  %v467_v23 = vld [vmem:[%s4973_s12 + $0x18] sm:$0xff]  ;;  %v498_v28 = vunpack.c.0.s8 %v466_v5  ;;  %v4194_v57 = vld [vmem:[#allocation6 + $0xb0] sm:$0xff] }
  0x82   : > { %v499_v30 = vunpack.c.0.s8 %v467_v23  ;;  %v503_v31 = vunpack.c.1.s8 %v467_v23  ;;  %v507_v8 = vunpack.c.2.s8 %v467_v23  ;;  %v511_v9 = vunpack.c.3.s8 %v467_v23 }
  0x83   : > { %1359 = vmatpush.bf16.msrb.mxu2 %v4221_v20  ;;  %v736_v20 = vcvt.s32.f32 %v608_v6  ;;  %v552_v6 = vunpack.c.2.s8 %v5114_v4  ;;  %v5153_v22 = vpack.c.bf16 %v685_v15, %v681_v14  ;;  %v626_v32 = vcvt.s32.f32 %v498_v28 }
  0x84   : > { %1448 = vmatpush.bf16.msrb.mxu3 %v4229_v21  ;;  %v740_v21 = vcvt.s32.f32 %v612_v7  ;;  %v556_v7 = vunpack.c.3.s8 %v5114_v4 }
  0x85   : > { %1816 = vmatpush.bf16.msrb.mxu1 %v4183_v29  ;;  %1728 = vmatpush.bf16.msrb.mxu0 %v4174_v36  ;;  %v502_v29 = vunpack.c.1.s8 %v466_v5  ;;  %v627_v36 = vcvt.s32.f32 %v499_v30 }
  0x86   : > { %v5127_v34 = vpack.c.bf16 %v740_v21, %v736_v20  ;;  %v684_v13 = vcvt.s32.f32 %v556_v7  ;;  %v5147_v20 = vpack.c.bf16 %v748_v11, %v744_v10  ;;  %v510_v7 = vunpack.c.3.s8 %v466_v5 }
  0x87   : > { %1360 = vmatpush.bf16.msrb.mxu2 %v4220_v58  ;;  %v617_v58 = vunpack.c.2.s8 %v5109_v2  ;;  %v630_v33 = vcvt.s32.f32 %v502_v29 }
  0x88   : > { %1449 = vmatpush.bf16.msrb.mxu3 %v4228_v59  ;;  %v621_v59 = vunpack.c.3.s8 %v5109_v2  ;;  %v680_v2 = vcvt.s32.f32 %v552_v6 }
  0x89   : > { %1817 = vmatpush.bf16.msrb.mxu1 %v4182_v43  ;;  %1729 = vmatpush.bf16.msrb.mxu0 %v4173_v46  ;;  %v745_v61 = vcvt.s32.f32 %v617_v58  ;;  %v631_v43 = vcvt.s32.f32 %v503_v31  ;;  %v4202_v58 = vld [vmem:[#allocation6 + $0xf0] sm:$0xff] }
  0x8a   : > { %1233 = vmatmul.bf16.gmra.mxu2 %v5055_v24  ;;  %1193 = vmatmul.bf16.gmra.mxu0 %v5059_v26  ;;  %v749_v12 = vcvt.s32.f32 %v621_v59  ;;  %v5151_v4 = vpack.c.bf16 %v684_v13, %v680_v2  ;;  %v635_v2 = vcvt.s32.f32 %v507_v8  ;;  %v470_v31 = vld [vmem:[%s4973_s12 + $0x30] sm:$0xff] }
  0x8b   : > { %1322 = vmatmul.bf16.gmra.mxu3 %v5057_v25  ;;  %1901 = vmatpush.bf16.msra.mxu2 %v4195_v44  ;;  %v5161_v44 = vpack.c.bf16 %v630_v33, %v626_v32  ;;  %v471_v32 = vld [vmem:[%s4973_s12 + $0x38] sm:$0xff] }
  0x8c   : > { %1282 = vmatmul.bf16.gmra.mxu1 %v5061_v27  ;;  %1990 = vmatpush.bf16.msra.mxu3 %v4203_v45  ;;  %v5149_v21 = vpack.c.bf16 %v749_v12, %v745_v61  ;;  %v5163_v45 = vpack.c.bf16 %v631_v43, %v627_v36  ;;  %v638_v12 = vcvt.s32.f32 %v510_v7  ;;  %v514_v43 = vunpack.c.0.s8 %v470_v31 }
  0x8d   : > { %1818 = vmatpush.bf16.msrb.mxu1 %v4181_v47  ;;  %1730 = vmatpush.bf16.msrb.mxu0 %v4172_v60 }
  0x8f   : > { %1902 = vmatpush.bf16.msra.mxu2 %v4194_v57  ;;  %v515_v57 = vunpack.c.0.s8 %v471_v32 }
  0x90   : > { %1991 = vmatpush.bf16.msra.mxu3 %v4202_v58  ;;  %v519_v58 = vunpack.c.1.s8 %v471_v32 }
  0x91   : > { %1819 = vmatpush.bf16.msrb.mxu1 %v4180_v3  ;;  %v506_v3 = vunpack.c.2.s8 %v466_v5  ;;  %v643_v8 = vcvt.s32.f32 %v515_v57  ;;  %v523_v57 = vunpack.c.2.s8 %v471_v32 }
  0x93   : > { %v634_v11 = vcvt.s32.f32 %v506_v3 }
  0x95   : > { %v5177_v28 = vpack.c.bf16 %v638_v12, %v634_v11 }
  0x9a   : > { %1238 = vmatmul.bf16.gmra.mxu2 %v5067_v50  ;;  %1198 = vmatmul.bf16.gmra.mxu0 %v5071_v52 }
  0x9b   : > { %1327 = vmatmul.bf16.gmra.mxu3 %v5069_v51 }
  0x9c   : > { %1287 = vmatmul.bf16.gmra.mxu1 %v5073_v53 }
  0xaa   : > { %1243 = vmatmul.bf16.gmra.mxu2 %v5083_v16  ;;  %1203 = vmatmul.bf16.gmra.mxu0 %v5087_v18 }
  0xab   : > { %1332 = vmatmul.bf16.gmra.mxu3 %v5085_v17 }
  0xac   : > { %1292 = vmatmul.bf16.gmra.mxu1 %v5089_v19 }
  0xba   : > { %1248 = vmatmul.bf16.gmra.mxu2 %v5095_v49  ;;  %1208 = vmatmul.bf16.gmra.mxu0 %v5099_v55 }
  0xbb   : > { %1337 = vmatmul.bf16.gmra.mxu3 %v5097_v54 }
  0xbc   : > { %1297 = vmatmul.bf16.gmra.mxu1 %v5101_v56 }
  0xca   : > { %1253 = vmatmul.bf16.gmra.mxu2 %v5127_v34  ;;  %1213 = vmatmul.bf16.gmra.mxu0 %v5131_v37 }
  0xcb   : > { %1342 = vmatmul.bf16.gmra.mxu3 %v5129_v35 }
  0xcc   : > { %1302 = vmatmul.bf16.gmra.mxu1 %v5133_v42 }
  0xda   : > { %1258 = vmatmul.bf16.gmra.mxu2 %v5147_v20  ;;  %1218 = vmatmul.bf16.gmra.mxu0 %v5151_v4 }
  0xdb   : > { %1347 = vmatmul.bf16.gmra.mxu3 %v5149_v21 }
  0xdc   : > { %1307 = vmatmul.bf16.gmra.mxu1 %v5153_v22 }
  0xe7   : > { %v1184_v46 = vpop.f32.mrf.mxu0 }
  0xe9   : > { %v1273_v47 = vpop.f32.mrf.mxu1 }
  0xea   : > { %1361 = vmatmul.bf16.vlgmr.msrb.gmra.mxu2 %v5161_v44  ;;  %v5167_v48 = vadd.f32 %v1273_v47, %v1184_v46  ;;  %1731 = vmatmul.bf16.vlgmr.msrb.gmra.mxu0 %v5023_v40  ;;  %v639_v40 = vcvt.s32.f32 %v511_v9  ;;  %v518_v47 = vunpack.c.1.s8 %v470_v31  ;;  %v647_v9 = vcvt.s32.f32 %v519_v58 }
  0xeb   : > { %1450 = vmatmul.bf16.vlgmr.msrb.gmra.mxu3 %v5163_v45  ;;  %v527_v58 = vunpack.c.3.s8 %v471_v32 }
  0xec   : > { %1820 = vmatmul.bf16.vlgmr.msrb.gmra.mxu1 %v5025_v41  ;;  %v5179_v29 = vpack.c.bf16 %v639_v40, %v635_v2  ;;  %v646_v7 = vcvt.s32.f32 %v518_v47  ;;  %v5197_v12 = vpack.c.bf16 %v647_v9, %v643_v8  ;;  %v526_v47 = vunpack.c.3.s8 %v470_v31 }
  0xed   : > { %v1224_v59 = vpop.f32.mrf.mxu2  ;;  %v651_v8 = vcvt.s32.f32 %v523_v57 }
  0xee   : > { %v1313_v60 = vpop.f32.mrf.mxu3 }
  0xef   : > { %v5171_v6 = vadd.f32 %v1313_v60, %v1224_v59  ;;  %v1186_v10 = vpop.f32.mrf.mxu0  ;;  %v642_v60 = vcvt.s32.f32 %v514_v43 }
  0xf1   : > { %v1275_v61 = vpop.f32.mrf.mxu1 }
  0xf2   : > { %v5173_v13 = vadd.f32 %v1275_v61, %v1186_v10 }
  0xf5   : > { %v1226_v41 = vpop.f32.mrf.mxu2 }
  0xf6   : > { %v1315_v14 = vpop.f32.mrf.mxu3 }
  0xf7   : > { %v5175_v15 = vadd.f32 %v1315_v14, %v1226_v41  ;;  %v1189_v5 = vpop.f32.mrf.mxu0  ;;  %v4193_v14 = vld [vmem:[#allocation6 + $0xa8] sm:$0xff] }
  0xf8   : > { %1903 = vmatpush.bf16.msra.mxu2 %v4193_v14 }
  0xf9   : > { %v1278_v23 = vpop.f32.mrf.mxu1 }
  0xfa   : > { %1366 = vmatmul.bf16.gmra.mxu2 %v5177_v28  ;;  %v5183_v30 = vadd.f32 %v1278_v23, %v1189_v5  ;;  %1736 = vmatmul.bf16.gmra.mxu0 %v5043_v0  ;;  %v4201_v5 = vld [vmem:[#allocation6 + $0xe8] sm:$0xff] }
  0xfb   : > { %1455 = vmatmul.bf16.gmra.mxu3 %v5179_v29 }
  0xfc   : > { %1825 = vmatmul.bf16.gmra.mxu1 %v5045_v1  ;;  %v5195_v1 = vpack.c.bf16 %v646_v7, %v642_v60  ;;  %1992 = vmatpush.bf16.msra.mxu3 %v4201_v5  ;;  %v654_v7 = vcvt.s32.f32 %v526_v47  ;;  %v474_v5 = vld [vmem:[%s4973_s12 + $0x50] sm:$0xff] }
  0xfd   : > { %v1229_v33 = vpop.f32.mrf.mxu2  ;;  %v530_v47 = vunpack.c.0.s8 %v474_v5 }
  0xfe   : > { %v1318_v36 = vpop.f32.mrf.mxu3 }
  0xff   : > { %v5189_v46 = vadd.f32 %v1318_v36, %v1229_v33  ;;  %v1191_v59 = vpop.f32.mrf.mxu0  ;;  %v522_v36 = vunpack.c.2.s8 %v470_v31 }
 0x101   : > { %v1280_v3 = vpop.f32.mrf.mxu1  ;;  %v650_v60 = vcvt.s32.f32 %v522_v36 }
 0x102   : > { %v5191_v10 = vadd.f32 %v1280_v3, %v1191_v59 }
 0x105   : > { %v1231_v11 = vpop.f32.mrf.mxu2 }
 0x106   : > { %v1320_v0 = vpop.f32.mrf.mxu3 }
 0x107   : > { %v5193_v61 = vadd.f32 %v1320_v0, %v1231_v11  ;;  %v1194_v2 = vpop.f32.mrf.mxu0 }
 0x109   : > { %v1283_v40 = vpop.f32.mrf.mxu1 }
 0x10a   : > { %1371 = vmatmul.bf16.gmra.mxu2 %v5195_v1  ;;  %v5201_v41 = vadd.f32 %v1283_v40, %v1194_v2  ;;  %1741 = vmatmul.bf16.gmra.mxu0 %v5059_v26  ;;  %v655_v26 = vcvt.s32.f32 %v527_v58  ;;  %v5211_v2 = vpack.c.bf16 %v654_v7, %v650_v60  ;;  %v534_v58 = vunpack.c.1.s8 %v474_v5 }
 0x10b   : > { %1460 = vmatmul.bf16.gmra.mxu3 %v5197_v12  ;;  %v658_v7 = vcvt.s32.f32 %v530_v47 }
 0x10c   : > { %1830 = vmatmul.bf16.gmra.mxu1 %v5061_v27  ;;  %6286 = vst [vmem:[#allocation26_spill] sm:$0xff] %v5211_v2  ;;  %v5213_v40 = vpack.c.bf16 %v655_v26, %v651_v8  ;;  %v662_v26 = vcvt.s32.f32 %v534_v58  ;;  %v4192_v58 = vld [vmem:[#allocation6 + $0xa0] sm:$0xff] }
 0x10d   : > { %v1234_v23 = vpop.f32.mrf.mxu2  ;;  %1904 = vmatpush.bf16.msra.mxu2 %v4192_v58 }
 0x10e   : > { %v1323_v33 = vpop.f32.mrf.mxu3  ;;  %6287 = vst [vmem:[#allocation27_spill] sm:$0xff] %v5213_v40 }
 0x10f   : > { %v5205_v43 = vadd.f32 %v1323_v33, %v1234_v23  ;;  %v1196_v59 = vpop.f32.mrf.mxu0  ;;  %v475_v23 = vld [vmem:[%s4973_s12 + $0x58] sm:$0xff] }
 0x110   : > { %v535_v60 = vunpack.c.1.s8 %v475_v23 }
 0x111   : > { %v1285_v3 = vpop.f32.mrf.mxu1 }
 0x112   : > { %v5207_v9 = vadd.f32 %v1285_v3, %v1196_v59  ;;  %v531_v59 = vunpack.c.0.s8 %v475_v23 }
 0x115   : > { %v1236_v27 = vpop.f32.mrf.mxu2 }
 0x116   : > { %v1325_v11 = vpop.f32.mrf.mxu3 }
 0x117   : > { %v5209_v0 = vadd.f32 %v1325_v11, %v1236_v27  ;;  %v1199_v31 = vpop.f32.mrf.mxu0  ;;  %v659_v27 = vcvt.s32.f32 %v531_v59  ;;  %v663_v11 = vcvt.s32.f32 %v535_v60  ;;  %v4200_v59 = vld [vmem:[#allocation6 + $0xe0] sm:$0xff] }
 0x118   : > { %1993 = vmatpush.bf16.msra.mxu3 %v4200_v59 }
 0x119   : > { %6285 = vst [vmem:[#allocation25_spill] sm:$0xff] %v5209_v0  ;;  %v1288_v32 = vpop.f32.mrf.mxu1 }
 0x11a   : > { %1376 = vmatmul.bf16.gmra.mxu2 %v5211_v2  ;;  %v5217_v14 = vadd.f32 %v1288_v32, %v1199_v31  ;;  %1746 = vmatmul.bf16.gmra.mxu0 %v5071_v52  ;;  %v5231_v2 = vpack.c.bf16 %v663_v11, %v659_v27  ;;  %v539_v27 = vunpack.c.2.s8 %v475_v23  ;;  %v543_v11 = vunpack.c.3.s8 %v475_v23 }
 0x11b   : > { %1465 = vmatmul.bf16.gmra.mxu3 %v5213_v40 }
 0x11c   : > { %1835 = vmatmul.bf16.gmra.mxu1 %v5073_v53  ;;  %v5229_v53 = vpack.c.bf16 %v662_v26, %v658_v7  ;;  %6291 = vst [vmem:[#allocation31_spill] sm:$0xff] %v5231_v2  ;;  %v538_v7 = vunpack.c.2.s8 %v474_v5  ;;  %v542_v26 = vunpack.c.3.s8 %v474_v5 }
 0x11d   : > { %v1239_v33 = vpop.f32.mrf.mxu2 }
 0x11e   : > { %v1328_v36 = vpop.f32.mrf.mxu3  ;;  %6290 = vst [vmem:[#allocation30_spill] sm:$0xff] %v5229_v53 }
 0x11f   : > { %v5223_v57 = vadd.f32 %v1328_v36, %v1239_v33  ;;  %v1201_v3 = vpop.f32.mrf.mxu0 }
 0x121   : > { %6288 = vst [vmem:[#allocation28_spill] sm:$0xff] %v5223_v57  ;;  %v1290_v8 = vpop.f32.mrf.mxu1 }
 0x122   : > { %v5225_v31 = vadd.f32 %v1290_v8, %v1201_v3 }
 0x125   : > { %v1241_v32 = vpop.f32.mrf.mxu2 }
 0x126   : > { %v1330_v52 = vpop.f32.mrf.mxu3 }
 0x127   : > { %v5227_v40 = vadd.f32 %v1330_v52, %v1241_v32  ;;  %v1204_v33 = vpop.f32.mrf.mxu0  ;;  %v666_v52 = vcvt.s32.f32 %v538_v7  ;;  %v479_v7 = vld [vmem:[%s4973_s12 + $0x78] sm:$0xff] }
 0x129   : > { %6289 = vst [vmem:[#allocation29_spill] sm:$0xff] %v5227_v40  ;;  %v1293_v36 = vpop.f32.mrf.mxu1 }
 0x12a   : > { %1381 = vmatmul.bf16.gmra.mxu2 %v5229_v53  ;;  %v5235_v47 = vadd.f32 %v1293_v36, %v1204_v33  ;;  %1751 = vmatmul.bf16.gmra.mxu0 %v5087_v18  ;;  %v670_v36 = vcvt.s32.f32 %v542_v26  ;;  %v671_v18 = vcvt.s32.f32 %v543_v11 }
 0x12b   : > { %1470 = vmatmul.bf16.gmra.mxu3 %v5231_v2  ;;  %v667_v2 = vcvt.s32.f32 %v539_v27 }
 0x12c   : > { %1840 = vmatmul.bf16.gmra.mxu1 %v5089_v19  ;;  %v5245_v58 = vpack.c.bf16 %v670_v36, %v666_v52  ;;  %v551_v52 = vunpack.c.1.s8 %v479_v7 }
 0x12d   : > { %v1244_v60 = vpop.f32.mrf.mxu2  ;;  %v5247_v59 = vpack.c.bf16 %v671_v18, %v667_v2 }
 0x12e   : > { %v1333_v3 = vpop.f32.mrf.mxu3  ;;  %6294 = vst [vmem:[#allocation34_spill] sm:$0xff] %v5245_v58 }
 0x12f   : > { %v5239_v8 = vadd.f32 %v1333_v3, %v1244_v60  ;;  %v1206_v32 = vpop.f32.mrf.mxu0  ;;  %6295 = vst [vmem:[#allocation35_spill] sm:$0xff] %v5247_v59  ;;  %v478_v3 = vld [vmem:[%s4973_s12 + $0x70] sm:$0xff] }
 0x130   : > { %v546_v27 = vunpack.c.0.s8 %v478_v3  ;;  %v550_v2 = vunpack.c.1.s8 %v478_v3 }
 0x131   : > { %6292 = vst [vmem:[#allocation32_spill] sm:$0xff] %v5239_v8  ;;  %v1295_v33 = vpop.f32.mrf.mxu1 }
 0x132   : > { %v5241_v53 = vadd.f32 %v1295_v33, %v1206_v32  ;;  %v547_v32 = vunpack.c.0.s8 %v479_v7  ;;  %v674_v36 = vcvt.s32.f32 %v546_v27 }
 0x135   : > { %v1246_v19 = vpop.f32.mrf.mxu2 }
 0x136   : > { %v1335_v40 = vpop.f32.mrf.mxu3 }
 0x137   : > { %v5243_v57 = vadd.f32 %v1335_v40, %v1246_v19  ;;  %v1209_v5 = vpop.f32.mrf.mxu0  ;;  %v678_v19 = vcvt.s32.f32 %v550_v2  ;;  %v4191_v2 = vld [vmem:[#allocation6 + $0x98] sm:$0xff] }
 0x138   : > { %1905 = vmatpush.bf16.msra.mxu2 %v4191_v2 }
 0x139   : > { %6293 = vst [vmem:[#allocation33_spill] sm:$0xff] %v5243_v57  ;;  %v1298_v23 = vpop.f32.mrf.mxu1 }
 0x13a   : > { %1386 = vmatmul.bf16.gmra.mxu2 %v5245_v58  ;;  %v5251_v60 = vadd.f32 %v1298_v23, %v1209_v5  ;;  %1756 = vmatmul.bf16.gmra.mxu0 %v5099_v55  ;;  %v675_v5 = vcvt.s32.f32 %v547_v32  ;;  %v679_v23 = vcvt.s32.f32 %v551_v52  ;;  %v4199_v32 = vld [vmem:[#allocation6 + $0xd8] sm:$0xff] }
 0x13b   : > { %1475 = vmatmul.bf16.gmra.mxu3 %v5247_v59 }
 0x13c   : > { %1845 = vmatmul.bf16.gmra.mxu1 %v5101_v56  ;;  %v5263_v56 = vpack.c.bf16 %v678_v19, %v674_v36  ;;  %v5265_v8 = vpack.c.bf16 %v679_v23, %v675_v5  ;;  %1994 = vmatpush.bf16.msra.mxu3 %v4199_v32  ;;  %v555_v19 = vunpack.c.2.s8 %v479_v7  ;;  %v559_v5 = vunpack.c.3.s8 %v479_v7 }
 0x13d   : > { %v1249_v40 = vpop.f32.mrf.mxu2 }
 0x13e   : > { %v1338_v26 = vpop.f32.mrf.mxu3  ;;  %6298 = vst [vmem:[#allocation38_spill] sm:$0xff] %v5263_v56 }
 0x13f   : > { %v5257_v11 = vadd.f32 %v1338_v26, %v1249_v40  ;;  %v1211_v33 = vpop.f32.mrf.mxu0  ;;  %6299 = vst [vmem:[#allocation39_spill] sm:$0xff] %v5265_v8 }
 0x141   : > { %6296 = vst [vmem:[#allocation36_spill] sm:$0xff] %v5257_v11  ;;  %v1300_v18 = vpop.f32.mrf.mxu1 }
 0x142   : > { %v5259_v59 = vadd.f32 %v1300_v18, %v1211_v33  ;;  %v554_v33 = vunpack.c.2.s8 %v478_v3  ;;  %v558_v18 = vunpack.c.3.s8 %v478_v3 }
 0x145   : > { %v1251_v58 = vpop.f32.mrf.mxu2 }
 0x146   : > { %v1340_v55 = vpop.f32.mrf.mxu3 }
 0x147   : > { %v5261_v57 = vadd.f32 %v1340_v55, %v1251_v58  ;;  %v1214_v40 = vpop.f32.mrf.mxu0  ;;  %v682_v55 = vcvt.s32.f32 %v554_v33  ;;  %v483_v33 = vld [vmem:[%s4973_s12 + $0x98] sm:$0xff] }
 0x149   : > { %6297 = vst [vmem:[#allocation37_spill] sm:$0xff] %v5261_v57  ;;  %v1303_v26 = vpop.f32.mrf.mxu1 }
 0x14a   : > { %1391 = vmatmul.bf16.gmra.mxu2 %v5263_v56  ;;  %v5269_v27 = vadd.f32 %v1303_v26, %v1214_v40  ;;  %1761 = vmatmul.bf16.gmra.mxu0 %v5131_v37  ;;  %v686_v26 = vcvt.s32.f32 %v558_v18  ;;  %v687_v37 = vcvt.s32.f32 %v559_v5 }
 0x14b   : > { %1480 = vmatmul.bf16.gmra.mxu3 %v5265_v8  ;;  %v683_v8 = vcvt.s32.f32 %v555_v19 }
 0x14c   : > { %1850 = vmatmul.bf16.gmra.mxu1 %v5133_v42  ;;  %v5279_v2 = vpack.c.bf16 %v686_v26, %v682_v55  ;;  %v567_v55 = vunpack.c.1.s8 %v483_v33 }
 0x14d   : > { %v1254_v58 = vpop.f32.mrf.mxu2  ;;  %v5281_v32 = vpack.c.bf16 %v687_v37, %v683_v8 }
 0x14e   : > { %v1343_v52 = vpop.f32.mrf.mxu3  ;;  %6302 = vst [vmem:[#allocation42_spill] sm:$0xff] %v5279_v2 }
 0x14f   : > { %v5273_v36 = vadd.f32 %v1343_v52, %v1254_v58  ;;  %v1216_v23 = vpop.f32.mrf.mxu0  ;;  %6303 = vst [vmem:[#allocation43_spill] sm:$0xff] %v5281_v32  ;;  %v482_v52 = vld [vmem:[%s4973_s12 + $0x90] sm:$0xff] }
 0x150   : > { %v562_v19 = vunpack.c.0.s8 %v482_v52  ;;  %v566_v8 = vunpack.c.1.s8 %v482_v52 }
 0x151   : > { %6300 = vst [vmem:[#allocation40_spill] sm:$0xff] %v5273_v36  ;;  %v1305_v40 = vpop.f32.mrf.mxu1 }
 0x152   : > { %v5275_v56 = vadd.f32 %v1305_v40, %v1216_v23  ;;  %v563_v23 = vunpack.c.0.s8 %v483_v33  ;;  %v690_v26 = vcvt.s32.f32 %v562_v19  ;;  %v4190_v19 = vld [vmem:[#allocation6 + $0x90] sm:$0xff] }
 0x153   : > { %1906 = vmatpush.bf16.msra.mxu2 %v4190_v19 }
 0x155   : > { %v1256_v42 = vpop.f32.mrf.mxu2 }
 0x156   : > { %v1345_v57 = vpop.f32.mrf.mxu3 }
 0x157   : > { %v5277_v11 = vadd.f32 %v1345_v57, %v1256_v42  ;;  %v1219_v3 = vpop.f32.mrf.mxu0  ;;  %v694_v42 = vcvt.s32.f32 %v566_v8  ;;  %v4198_v8 = vld [vmem:[#allocation6 + $0xd0] sm:$0xff] }
 0x158   : > { %1995 = vmatpush.bf16.msra.mxu3 %v4198_v8 }
 0x159   : > { %6301 = vst [vmem:[#allocation41_spill] sm:$0xff] %v5277_v11  ;;  %v1308_v7 = vpop.f32.mrf.mxu1 }
 0x15a   : > { %1396 = vmatmul.bf16.gmra.mxu2 %v5279_v2  ;;  %v5285_v58 = vadd.f32 %v1308_v7, %v1219_v3  ;;  %1766 = vmatmul.bf16.gmra.mxu0 %v5151_v4  ;;  %v691_v3 = vcvt.s32.f32 %v563_v23  ;;  %v695_v7 = vcvt.s32.f32 %v567_v55 }
 0x15b   : > { %1485 = vmatmul.bf16.gmra.mxu3 %v5281_v32 }
 0x15c   : > { %1855 = vmatmul.bf16.gmra.mxu1 %v5153_v22  ;;  %v5297_v22 = vpack.c.bf16 %v694_v42, %v690_v26  ;;  %v5299_v36 = vpack.c.bf16 %v695_v7, %v691_v3  ;;  %v574_v26 = vunpack.c.3.s8 %v482_v52  ;;  %v575_v42 = vunpack.c.3.s8 %v483_v33 }
 0x15d   : > { %v1259_v57 = vpop.f32.mrf.mxu2 }
 0x15e   : > { %v1348_v18 = vpop.f32.mrf.mxu3  ;;  %6306 = vst [vmem:[#allocation46_spill] sm:$0xff] %v5297_v22 }
 0x15f   : > { %v5291_v5 = vadd.f32 %v1348_v18, %v1259_v57  ;;  %v1221_v40 = vpop.f32.mrf.mxu0  ;;  %6307 = vst [vmem:[#allocation47_spill] sm:$0xff] %v5299_v36 }
 0x161   : > { %6304 = vst [vmem:[#allocation44_spill] sm:$0xff] %v5291_v5  ;;  %v1310_v37 = vpop.f32.mrf.mxu1 }
 0x162   : > { %v5293_v32 = vadd.f32 %v1310_v37, %v1221_v40  ;;  %v571_v37 = vunpack.c.2.s8 %v483_v33 }
 0x165   : > { %v1261_v2 = vpop.f32.mrf.mxu2 }
 0x166   : > { %v1350_v4 = vpop.f32.mrf.mxu3 }
 0x167   : > { %v5295_v11 = vadd.f32 %v1350_v4, %v1261_v2  ;;  %v1732_v57 = vpop.f32.mrf.mxu0  ;;  %v570_v2 = vunpack.c.2.s8 %v482_v52 }
 0x169   : > { %6305 = vst [vmem:[#allocation45_spill] sm:$0xff] %v5295_v11  ;;  %v1821_v18 = vpop.f32.mrf.mxu1  ;;  %v698_v4 = vcvt.s32.f32 %v570_v2  ;;  %v703_v11 = vcvt.s32.f32 %v575_v42 }
 0x16a   : > { %1401 = vmatmul.bf16.gmra.mxu2 %v5297_v22  ;;  %1771 = vmatmul.bf16.gmra.mxu0 %v5019_v38  ;;  %v702_v38 = vcvt.s32.f32 %v574_v26 }
 0x16b   : > { %1490 = vmatmul.bf16.gmra.mxu3 %v5299_v36 }
 0x16c   : > { %1860 = vmatmul.bf16.gmra.mxu1 %v5021_v39  ;;  %v699_v39 = vcvt.s32.f32 %v571_v37  ;;  %v5309_v52 = vpack.c.bf16 %v702_v38, %v698_v4 }
 0x16d   : > { %v1362_v23 = vpop.f32.mrf.mxu2 }
 0x16e   : > { %v1451_v55 = vpop.f32.mrf.mxu3  ;;  %v1363_v40 = vadd.f32 %v1362_v23, %v5167_v48  ;;  %6308 = vst [vmem:[#allocation48_spill] sm:$0xff] %v5309_v52  ;;  %v5311_v33 = vpack.c.bf16 %v703_v11, %v699_v39 }
 0x16f   : > { %v1734_v7 = vpop.f32.mrf.mxu0 }
 0x170   : > { %v1452_v3 = vadd.f32 %v1451_v55, %v1363_v40  ;;  %6309 = vst [vmem:[#allocation49_spill] sm:$0xff] %v5311_v33  ;;  %v487_v40 = vld [vmem:[%s4973_s12 + $0xb8] sm:$0xff] }
 0x171   : > { %v1823_v36 = vpop.f32.mrf.mxu1  ;;  %v579_v37 = vunpack.c.0.s8 %v487_v40  ;;  %v583_v42 = vunpack.c.1.s8 %v487_v40 }
 0x172   : > { %v1733_v22 = vadd.f32 %v1732_v57, %v1452_v3  ;;  %v486_v57 = vld [vmem:[%s4973_s12 + $0xb0] sm:$0xff] }
 0x173   : > { %v578_v11 = vunpack.c.0.s8 %v486_v57  ;;  %v582_v26 = vunpack.c.1.s8 %v486_v57 }
 0x174   : > { %v5306_v5 = vadd.f32 %v1821_v18, %v1733_v22 }
 0x175   : > { %v1364_v0 = vpop.f32.mrf.mxu2  ;;  %v706_v4 = vcvt.s32.f32 %v578_v11  ;;  %v4189_v11 = vld [vmem:[#allocation6 + $0x88] sm:$0xff] }
 0x176   : > { %v1453_v19 = vpop.f32.mrf.mxu3  ;;  %v1365_v48 = vadd.f32 %v1364_v0, %v5173_v13  ;;  %1907 = vmatpush.bf16.msra.mxu2 %v4189_v11 }
 0x177   : > { %v1737_v23 = vpop.f32.mrf.mxu0 }
 0x178   : > { %v1454_v8 = vadd.f32 %v1453_v19, %v1365_v48  ;;  %v710_v19 = vcvt.s32.f32 %v582_v26  ;;  %v711_v48 = vcvt.s32.f32 %v583_v42 }
 0x179   : > { %v1826_v55 = vpop.f32.mrf.mxu1 }
 0x17a   : > { %v1735_v2 = vadd.f32 %v1734_v7, %v1454_v8  ;;  %1406 = vmatmul.bf16.gmra.mxu2 %v5309_v52  ;;  %1776 = vmatmul.bf16.gmra.mxu0 %v5039_v62 }
 0x17b   : > { %1495 = vmatmul.bf16.gmra.mxu3 %v5311_v33  ;;  %v5325_v33 = vpack.c.bf16 %v710_v19, %v706_v4  ;;  %v591_v4 = vunpack.c.3.s8 %v487_v40 }
 0x17c   : > { %v5317_v22 = vadd.f32 %v1823_v36, %v1735_v2  ;;  %1865 = vmatmul.bf16.gmra.mxu1 %v5041_v63  ;;  %v707_v36 = vcvt.s32.f32 %v579_v37  ;;  %v586_v37 = vunpack.c.2.s8 %v486_v57 }
 0x17d   : > { %v1367_v13 = vpop.f32.mrf.mxu2 }
 0x17e   : > { %v1456_v0 = vpop.f32.mrf.mxu3  ;;  %v1368_v18 = vadd.f32 %v1367_v13, %v5183_v30  ;;  %v5327_v30 = vpack.c.bf16 %v711_v48, %v707_v36  ;;  %v714_v19 = vcvt.s32.f32 %v586_v37 }
 0x17f   : > { %v1739_v7 = vpop.f32.mrf.mxu0 }
 0x180   : > { %v1457_v3 = vadd.f32 %v1456_v0, %v1368_v18 }
 0x181   : > { %v1828_v38 = vpop.f32.mrf.mxu1 }
 0x182   : > { %v1738_v39 = vadd.f32 %v1737_v23, %v1457_v3  ;;  %v590_v3 = vunpack.c.3.s8 %v486_v57 }
 0x184   : > { %v5322_v8 = vadd.f32 %v1826_v55, %v1738_v39 }
 0x185   : > { %v1369_v62 = vpop.f32.mrf.mxu2 }
 0x186   : > { %v1458_v63 = vpop.f32.mrf.mxu3  ;;  %v1370_v2 = vadd.f32 %v1369_v62, %v5191_v10  ;;  %v4197_v10 = vld [vmem:[#allocation6 + $0xc8] sm:$0xff] }
 0x187   : > { %v1742_v52 = vpop.f32.mrf.mxu0  ;;  %1996 = vmatpush.bf16.msra.mxu3 %v4197_v10  ;;  %v491_v10 = vld [vmem:[%s4973_s12 + $0xd8] sm:$0xff] }
 0x188   : > { %v1459_v13 = vadd.f32 %v1458_v63, %v1370_v2 }
 0x189   : > { %v1831_v23 = vpop.f32.mrf.mxu1 }
 0x18a   : > { %v1740_v0 = vadd.f32 %v1739_v7, %v1459_v13  ;;  %1411 = vmatmul.bf16.gmra.mxu2 %v5325_v33  ;;  %1781 = vmatmul.bf16.gmra.mxu0 %v5055_v24  ;;  %v587_v7 = vunpack.c.2.s8 %v487_v40  ;;  %v718_v24 = vcvt.s32.f32 %v590_v3 }
 0x18b   : > { %1500 = vmatmul.bf16.gmra.mxu3 %v5327_v30 }
 0x18c   : > { %v5331_v18 = vadd.f32 %v1828_v38, %v1740_v0  ;;  %1870 = vmatmul.bf16.gmra.mxu1 %v5057_v25  ;;  %v715_v48 = vcvt.s32.f32 %v587_v7  ;;  %v719_v25 = vcvt.s32.f32 %v591_v4  ;;  %v5339_v57 = vpack.c.bf16 %v718_v24, %v714_v19 }
 0x18d   : > { %v1372_v55 = vpop.f32.mrf.mxu2  ;;  %v595_v7 = vunpack.c.0.s8 %v491_v10  ;;  %v599_v4 = vunpack.c.1.s8 %v491_v10 }
 0x18e   : > { %v1461_v26 = vpop.f32.mrf.mxu3  ;;  %v1373_v42 = vadd.f32 %v1372_v55, %v5201_v41  ;;  %v5341_v40 = vpack.c.bf16 %v719_v25, %v715_v48 }
 0x18f   : > { %v1744_v38 = vpop.f32.mrf.mxu0  ;;  %v723_v48 = vcvt.s32.f32 %v595_v7  ;;  %v727_v25 = vcvt.s32.f32 %v599_v4 }
 0x190   : > { %v1462_v39 = vadd.f32 %v1461_v26, %v1373_v42 }
 0x191   : > { %v1833_v63 = vpop.f32.mrf.mxu1 }
 0x192   : > { %v1743_v36 = vadd.f32 %v1742_v52, %v1462_v39  ;;  %v490_v52 = vld [vmem:[%s4973_s12 + $0xd0] sm:$0xff] }
 0x193   : > { %v594_v37 = vunpack.c.0.s8 %v490_v52  ;;  %v598_v3 = vunpack.c.1.s8 %v490_v52  ;;  %v606_v4 = vunpack.c.3.s8 %v490_v52 }
 0x194   : > { %v5336_v62 = vadd.f32 %v1831_v23, %v1743_v36 }
 0x195   : > { %v1374_v2 = vpop.f32.mrf.mxu2  ;;  %v722_v36 = vcvt.s32.f32 %v594_v37  ;;  %v726_v24 = vcvt.s32.f32 %v598_v3  ;;  %v602_v3 = vunpack.c.2.s8 %v490_v52  ;;  %v494_v52 = vld [vmem:[%s4973_s12 + $0xf0] sm:$0xff] }
 0x196   : > { %v1463_v13 = vpop.f32.mrf.mxu3  ;;  %v1375_v41 = vadd.f32 %v1374_v2, %v5207_v9 }
 0x197   : > { %v1747_v23 = vpop.f32.mrf.mxu0 }
 0x198   : > { %v1464_v0 = vadd.f32 %v1463_v13, %v1375_v41  ;;  %v5355_v13 = vpack.c.bf16 %v726_v24, %v722_v36  ;;  %v5357_v41 = vpack.c.bf16 %v727_v25, %v723_v48  ;;  %v734_v24 = vcvt.s32.f32 %v606_v4 }
 0x199   : > { %v1836_v39 = vpop.f32.mrf.mxu1 }
 0x19a   : > { %v1745_v11 = vadd.f32 %v1744_v38, %v1464_v0  ;;  %1416 = vmatmul.bf16.gmra.mxu2 %v5339_v57  ;;  %1786 = vmatmul.bf16.gmra.mxu0 %v5067_v50 }
 0x19b   : > { %1505 = vmatmul.bf16.gmra.mxu3 %v5341_v40 }
 0x19c   : > { %v5347_v55 = vadd.f32 %v1833_v63, %v1745_v11  ;;  %1875 = vmatmul.bf16.gmra.mxu1 %v5069_v51 }
 0x19d   : > { %v1377_v9 = vpop.f32.mrf.mxu2 }
 0x19e   : > { %v1466_v26 = vpop.f32.mrf.mxu3  ;;  %v1378_v42 = vadd.f32 %v1377_v9, %v5217_v14 }
 0x19f   : > { %v1749_v14 = vpop.f32.mrf.mxu0 }
 0x1a0   : > { %v1467_v19 = vadd.f32 %v1466_v26, %v1378_v42 }
 0x1a1   : > { %v1838_v11 = vpop.f32.mrf.mxu1 }
 0x1a2   : > { %v1748_v38 = vadd.f32 %v1747_v23, %v1467_v19  ;;  %v4188_v23 = vld [vmem:[#allocation6 + $0x80] sm:$0xff]  ;;  %v607_v19 = vunpack.c.3.s8 %v491_v10 }
 0x1a3   : > { %1908 = vmatpush.bf16.msra.mxu2 %v4188_v23 }
 0x1a4   : > { %v5352_v63 = vadd.f32 %v1836_v39, %v1748_v38  ;;  %v603_v39 = vunpack.c.2.s8 %v491_v10  ;;  %v730_v38 = vcvt.s32.f32 %v602_v3  ;;  %v735_v48 = vcvt.s32.f32 %v607_v19  ;;  %v495_v10 = vld [vmem:[%s4973_s12 + $0xf8] sm:$0xff] }
 0x1a5   : > { %v1379_v50 = vpop.f32.mrf.mxu2  ;;  %v611_v23 = vunpack.c.0.s8 %v495_v10 }
 0x1a6   : > { %v1468_v2 = vpop.f32.mrf.mxu3  ;;  %v1380_v51 = vadd.f32 %v1379_v50, %v5225_v31  ;;  %v4196_v31 = vld [vmem:[#allocation6 + $0xc0] sm:$0xff] }
 0x1a7   : > { %1997 = vmatpush.bf16.msra.mxu3 %v4196_v31  ;;  %v615_v31 = vunpack.c.1.s8 %v495_v10 }
 0x1a8   : > { %v1469_v0 = vadd.f32 %v1468_v2, %v1380_v51  ;;  %v5369_v2 = vpack.c.bf16 %v734_v24, %v730_v38 }
 0x1a9   : > { %v743_v4 = vcvt.s32.f32 %v615_v31 }
 0x1aa   : > { %v1750_v9 = vadd.f32 %v1749_v14, %v1469_v0  ;;  %1421 = vmatmul.bf16.gmra.mxu2 %v5355_v13  ;;  %1791 = vmatmul.bf16.gmra.mxu0 %v5083_v16  ;;  %v731_v16 = vcvt.s32.f32 %v603_v39 }
 0x1ab   : > { %1510 = vmatmul.bf16.gmra.mxu3 %v5357_v41 }
 0x1ac   : > { %v5361_v26 = vadd.f32 %v1838_v11, %v1750_v9  ;;  %1880 = vmatmul.bf16.gmra.mxu1 %v5085_v17  ;;  %v5371_v51 = vpack.c.bf16 %v735_v48, %v731_v16  ;;  %v610_v11 = vunpack.c.0.s8 %v494_v52  ;;  %v614_v9 = vunpack.c.1.s8 %v494_v52 }
 0x1ad   : > { %v1382_v37 = vpop.f32.mrf.mxu2  ;;  %v618_v48 = vunpack.c.2.s8 %v494_v52 }
 0x1ae   : > { %v1471_v42 = vpop.f32.mrf.mxu3  ;;  %v1383_v7 = vadd.f32 %v1382_v37, %v5235_v47  ;;  %v742_v3 = vcvt.s32.f32 %v614_v9 }
 0x1b0   : > { %v5366_v36 = vadd.f32 %v1471_v42, %v1383_v7  ;;  %v738_v42 = vcvt.s32.f32 %v610_v11  ;;  %v739_v7 = vcvt.s32.f32 %v611_v23 }
 0x1b2   : > { %v5385_v38 = vpack.c.bf16 %v742_v3, %v738_v42 }
 0x1b5   : > { %v1384_v17 = vpop.f32.mrf.mxu2 }
 0x1b6   : > { %v1473_v25 = vpop.f32.mrf.mxu3  ;;  %v1385_v50 = vadd.f32 %v1384_v17, %v5241_v53 }
 0x1b8   : > { %v5373_v47 = vadd.f32 %v1473_v25, %v1385_v50  ;;  %v619_v25 = vunpack.c.2.s8 %v495_v10  ;;  %v623_v50 = vunpack.c.3.s8 %v495_v10 }
 0x1ba   : > { %1426 = vmatmul.bf16.gmra.mxu2 %v5369_v2  ;;  %1796 = vmatmul.bf16.gmra.mxu0 %v5095_v49  ;;  %v751_v9 = vcvt.s32.f32 %v623_v50 }
 0x1bb   : > { %1515 = vmatmul.bf16.gmra.mxu3 %v5371_v51 }
 0x1bc   : > { %1885 = vmatmul.bf16.gmra.mxu1 %v5097_v54  ;;  %v5387_v54 = vpack.c.bf16 %v743_v4, %v739_v7 }
 0x1bd   : > { %v1387_v14 = vpop.f32.mrf.mxu2 }
 0x1be   : > { %v1476_v0 = vpop.f32.mrf.mxu3  ;;  %v1388_v53 = vadd.f32 %v1387_v14, %v5251_v60 }
 0x1c0   : > { %v5382_v37 = vadd.f32 %v1476_v0, %v1388_v53  ;;  %v746_v0 = vcvt.s32.f32 %v618_v48  ;;  %v747_v53 = vcvt.s32.f32 %v619_v25 }
 0x1c5   : > { %v1389_v39 = vpop.f32.mrf.mxu2 }
 0x1c6   : > { %v1478_v19 = vpop.f32.mrf.mxu3  ;;  %v1390_v49 = vadd.f32 %v1389_v39, %v5259_v59  ;;  %v622_v59 = vunpack.c.3.s8 %v494_v52  ;;  %v2897_v52 = vld [vmem:[#allocation11 + $0x78] sm:$0xff] }
 0x1c7   : > { %3027 = vmatpush.msra.mxu1 %v2897_v52 }
 0x1c8   : > { %v5389_v24 = vadd.f32 %v1478_v19, %v1390_v49  ;;  %v750_v11 = vcvt.s32.f32 %v622_v59 }
 0x1ca   : > { %1431 = vmatmul.bf16.gmra.mxu2 %v5385_v38  ;;  %1801 = vmatmul.bf16.gmra.mxu0 %v5127_v34  ;;  %v5399_v42 = vpack.c.bf16 %v750_v11, %v746_v0 }
 0x1cb   : > { %1520 = vmatmul.bf16.gmra.mxu3 %v5387_v54 }
 0x1cc   : > { %1890 = vmatmul.bf16.gmra.mxu1 %v5129_v35  ;;  %v5401_v35 = vpack.c.bf16 %v751_v9, %v747_v53 }
 0x1cd   : > { %v1392_v60 = vpop.f32.mrf.mxu2 }
 0x1ce   : > { %v1481_v16 = vpop.f32.mrf.mxu3  ;;  %v1393_v17 = vadd.f32 %v1392_v60, %v5269_v27  ;;  %v2913_v27 = vld [vmem:[#allocation12 + $0x78] sm:$0xff] }
 0x1cf   : > { %2914 = vmatpush.msra.mxu0 %v2913_v27 }
 0x1d0   : > { %v5396_v14 = vadd.f32 %v1481_v16, %v1393_v17  ;;  %v2912_v16 = vld [vmem:[#allocation12 + $0x70] sm:$0xff] }
 0x1d1   : > { %2915 = vmatpush.msra.mxu0 %v2912_v16 }
 0x1d5   : > { %v1394_v23 = vpop.f32.mrf.mxu2 }
 0x1d6   : > { %v1483_v31 = vpop.f32.mrf.mxu3  ;;  %v1395_v34 = vadd.f32 %v1394_v23, %v5275_v56 }
 0x1d8   : > { %v5403_v3 = vadd.f32 %v1483_v31, %v1395_v34 }
 0x1da   : > { %1436 = vmatmul.bf16.gmra.mxu2 %v5399_v42  ;;  %1806 = vmatmul.bf16.gmra.mxu0 %v5147_v20  ;;  %v2896_v20 = vld [vmem:[#allocation11 + $0x70] sm:$0xff] }
 0x1db   : > { %1525 = vmatmul.bf16.gmra.mxu3 %v5401_v35  ;;  %3028 = vmatpush.msra.mxu1 %v2896_v20 }
 0x1dc   : > { %1895 = vmatmul.bf16.gmra.mxu1 %v5149_v21 }
 0x1dd   : > { %v1397_v10 = vpop.f32.mrf.mxu2 }
 0x1de   : > { %v1486_v56 = vpop.f32.mrf.mxu3  ;;  %v1398_v7 = vadd.f32 %v1397_v10, %v5285_v58 }
 0x1e0   : > { %v5410_v4 = vadd.f32 %v1486_v56, %v1398_v7  ;;  %v6310_v7 = vld [vmem:[#allocation25_spill] sm:$0xff] }
 0x1e5   : > { %v1399_v39 = vpop.f32.mrf.mxu2 }
 0x1e6   : > { %v1488_v19 = vpop.f32.mrf.mxu3  ;;  %v1400_v49 = vadd.f32 %v1399_v39, %v5293_v32 }
 0x1e8   : > { %v5413_v60 = vadd.f32 %v1488_v19, %v1400_v49  ;;  %v6311_v19 = vld [vmem:[#allocation26_spill] sm:$0xff]  ;;  %v2893_v49 = vld [vmem:[#allocation11 + $0x58] sm:$0xff] }
 0x1ea   : > { %1909 = vmatmul.bf16.vlgmr.msra.gmra.mxu2 %v5161_v44  ;;  %v2911_v44 = vld [vmem:[#allocation12 + $0x68] sm:$0xff] }
 0x1eb   : > { %1998 = vmatmul.bf16.vlgmr.msra.gmra.mxu3 %v5163_v45  ;;  %v2895_v45 = vld [vmem:[#allocation11 + $0x68] sm:$0xff]  ;;  %2916 = vmatpush.msra.mxu0 %v2911_v44 }
 0x1ec   : > { %3029 = vmatpush.msra.mxu1 %v2895_v45  ;;  %v6315_v45 = vld [vmem:[#allocation30_spill] sm:$0xff] }
 0x1ed   : > { %v1402_v21 = vpop.f32.mrf.mxu2 }
 0x1ee   : > { %v1491_v48 = vpop.f32.mrf.mxu3  ;;  %v1403_v58 = vadd.f32 %v1402_v21, %v5171_v6  ;;  %v6313_v21 = vld [vmem:[#allocation28_spill] sm:$0xff] }
 0x1f0   : > { %v5418_v17 = vadd.f32 %v1491_v48, %v1403_v58 }
 0x1f5   : > { %v1404_v59 = vpop.f32.mrf.mxu2 }
 0x1f6   : > { %v1493_v25 = vpop.f32.mrf.mxu3  ;;  %v1405_v32 = vadd.f32 %v1404_v59, %v5175_v15 }
 0x1f8   : > { %v5421_v50 = vadd.f32 %v1493_v25, %v1405_v32  ;;  %v6314_v25 = vld [vmem:[#allocation29_spill] sm:$0xff] }
 0x1fa   : > { %1914 = vmatmul.bf16.gmra.mxu2 %v5177_v28  ;;  %v2910_v28 = vld [vmem:[#allocation12 + $0x60] sm:$0xff] }
 0x1fb   : > { %2003 = vmatmul.bf16.gmra.mxu3 %v5179_v29  ;;  %v2894_v29 = vld [vmem:[#allocation11 + $0x60] sm:$0xff]  ;;  %2917 = vmatpush.msra.mxu0 %v2910_v28 }
 0x1fc   : > { %3030 = vmatpush.msra.mxu1 %v2894_v29 }
 0x1fd   : > { %v1407_v0 = vpop.f32.mrf.mxu2 }
 0x1fe   : > { %v1496_v11 = vpop.f32.mrf.mxu3  ;;  %v1408_v6 = vadd.f32 %v1407_v0, %v5189_v46  ;;  %3031 = vmatpush.msra.mxu1 %v2893_v49  ;;  %v6316_v0 = vld [vmem:[#allocation31_spill] sm:$0xff] }
 0x200   : > { %v5426_v53 = vadd.f32 %v1496_v11, %v1408_v6  ;;  %v2908_v11 = vld [vmem:[#allocation12 + $0x50] sm:$0xff] }
 0x201   : > { %v2892_v6 = vld [vmem:[#allocation11 + $0x50] sm:$0xff] }
 0x202   : > { %3032 = vmatpush.msra.mxu1 %v2892_v6  ;;  %v2890_v6 = vld [vmem:[#allocation11 + $0x40] sm:$0xff] }
 0x205   : > { %v1409_v9 = vpop.f32.mrf.mxu2 }
 0x206   : > { %v1498_v23 = vpop.f32.mrf.mxu3  ;;  %v1410_v15 = vadd.f32 %v1409_v9, %v5193_v61 }
 0x208   : > { %v5429_v31 = vadd.f32 %v1498_v23, %v1410_v15  ;;  %v6317_v15 = vld [vmem:[#allocation32_spill] sm:$0xff] }
 0x20a   : > { %1919 = vmatmul.bf16.gmra.mxu2 %v5195_v1  ;;  %v6312_v1 = vld [vmem:[#allocation27_spill] sm:$0xff] }
 0x20b   : > { %2008 = vmatmul.bf16.gmra.mxu3 %v5197_v12  ;;  %v2909_v12 = vld [vmem:[#allocation12 + $0x58] sm:$0xff] }
 0x20c   : > { %2918 = vmatpush.msra.mxu0 %v2909_v12 }
 0x20d   : > { %v1412_v34 = vpop.f32.mrf.mxu2 }
 0x20e   : > { %v1501_v27 = vpop.f32.mrf.mxu3  ;;  %v1413_v46 = vadd.f32 %v1412_v34, %v5205_v43  ;;  %2919 = vmatpush.msra.mxu0 %v2908_v11  ;;  %v2906_v11 = vld [vmem:[#allocation12 + $0x40] sm:$0xff] }
 0x210   : > { %v5434_v52 = vadd.f32 %v1501_v27, %v1413_v46  ;;  %v6318_v46 = vld [vmem:[#allocation33_spill] sm:$0xff] }
 0x215   : > { %v1414_v10 = vpop.f32.mrf.mxu2 }
 0x216   : > { %v1503_v56 = vpop.f32.mrf.mxu3  ;;  %v1415_v61 = vadd.f32 %v1414_v10, %v6310_v7  ;;  %v6319_v7 = vld [vmem:[#allocation34_spill] sm:$0xff] }
 0x218   : > { %v5437_v39 = vadd.f32 %v1503_v56, %v1415_v61  ;;  %v6320_v61 = vld [vmem:[#allocation35_spill] sm:$0xff] }
 0x21a   : > { %1924 = vmatmul.bf16.gmra.mxu2 %v6311_v19  ;;  %v2907_v19 = vld [vmem:[#allocation12 + $0x48] sm:$0xff] }
 0x21b   : > { %2013 = vmatmul.bf16.gmra.mxu3 %v6312_v1  ;;  %v2891_v1 = vld [vmem:[#allocation11 + $0x48] sm:$0xff]  ;;  %2920 = vmatpush.msra.mxu0 %v2907_v19 }
 0x21c   : > { %3033 = vmatpush.msra.mxu1 %v2891_v1  ;;  %v6331_v19 = vld [vmem:[#allocation42_spill] sm:$0xff]  ;;  %v6332_v1 = vld [vmem:[#allocation43_spill] sm:$0xff] }
 0x21d   : > { %v1417_v16 = vpop.f32.mrf.mxu2  ;;  %2921 = vmatpush.msra.mxu0 %v2906_v11  ;;  %v6335_v11 = vld [vmem:[#allocation45_spill] sm:$0xff] }
 0x21e   : > { %v1506_v20 = vpop.f32.mrf.mxu3  ;;  %v1418_v43 = vadd.f32 %v1417_v16, %v6313_v21  ;;  %v6321_v16 = vld [vmem:[#allocation36_spill] sm:$0xff]  ;;  %3034 = vmatpush.msra.mxu1 %v2890_v6 }
 0x220   : > { %v5442_v48 = vadd.f32 %v1506_v20, %v1418_v43 }
 0x225   : > { %v1419_v58 = vpop.f32.mrf.mxu2 }
 0x226   : > { %v1508_v59 = vpop.f32.mrf.mxu3  ;;  %v1420_v32 = vadd.f32 %v1419_v58, %v6314_v25 }
 0x228   : > { %v5445_v44 = vadd.f32 %v1508_v59, %v1420_v32  ;;  %v6323_v59 = vld [vmem:[#allocation37_spill] sm:$0xff] }
 0x22a   : > { %1929 = vmatmul.bf16.gmra.mxu2 %v6315_v45  ;;  %v6325_v45 = vld [vmem:[#allocation38_spill] sm:$0xff] }
 0x22b   : > { %2018 = vmatmul.bf16.gmra.mxu3 %v6316_v0  ;;  %v6326_v0 = vld [vmem:[#allocation39_spill] sm:$0xff] }
 0x22d   : > { %v1422_v9 = vpop.f32.mrf.mxu2 }
 0x22e   : > { %v1511_v23 = vpop.f32.mrf.mxu3  ;;  %v1423_v28 = vadd.f32 %v1422_v9, %v6317_v15  ;;  %v6327_v15 = vld [vmem:[#allocation40_spill] sm:$0xff] }
 0x230   : > { %v5450_v29 = vadd.f32 %v1511_v23, %v1423_v28 }
 0x235   : > { %v1424_v34 = vpop.f32.mrf.mxu2 }
 0x236   : > { %v1513_v27 = vpop.f32.mrf.mxu3  ;;  %v1425_v10 = vadd.f32 %v1424_v34, %v6318_v46 }
 0x238   : > { %v5453_v56 = vadd.f32 %v1513_v27, %v1425_v10  ;;  %v6329_v10 = vld [vmem:[#allocation41_spill] sm:$0xff] }
 0x23a   : > { %1934 = vmatmul.bf16.gmra.mxu2 %v6319_v7 }
 0x23b   : > { %2023 = vmatmul.bf16.gmra.mxu3 %v6320_v61 }
 0x23d   : > { %v1427_v12 = vpop.f32.mrf.mxu2 }
 0x23e   : > { %v1516_v49 = vpop.f32.mrf.mxu3  ;;  %v1428_v20 = vadd.f32 %v1427_v12, %v6321_v16  ;;  %v2905_v12 = vld [vmem:[#allocation12 + $0x38] sm:$0xff] }
 0x23f   : > { %2922 = vmatpush.msra.mxu0 %v2905_v12 }
 0x240   : > { %v5458_v21 = vadd.f32 %v1516_v49, %v1428_v20  ;;  %v2889_v49 = vld [vmem:[#allocation11 + $0x38] sm:$0xff] }
 0x241   : > { %3035 = vmatpush.msra.mxu1 %v2889_v49 }
 0x242   : > { %6322 = vst [vmem:[#allocation25_spill] sm:$0xff] %v5458_v21 }
 0x245   : > { %v1429_v43 = vpop.f32.mrf.mxu2 }
 0x246   : > { %v1518_v58 = vpop.f32.mrf.mxu3  ;;  %v1430_v25 = vadd.f32 %v1429_v43, %v6323_v59  ;;  %v6333_v43 = vld [vmem:[#allocation44_spill] sm:$0xff] }
 0x248   : > { %v5461_v32 = vadd.f32 %v1518_v58, %v1430_v25  ;;  %v4792_v25 = vmov 32  }
 0x249   : > { %4370 = vset.pattern.permute.xlu0 %v4792_v25  ;;  %4371 = vset.pattern.permute.xlu1 %v4792_v25 }
 0x24a   : > { %6324 = vst [vmem:[#allocation26_spill] sm:$0xff] %v5461_v32  ;;  %1939 = vmatmul.bf16.gmra.mxu2 %v6325_v45  ;;  %4372 = vset.pattern.permute.xlu2 %v4792_v25 }
 0x24b   : > { %2028 = vmatmul.bf16.gmra.mxu3 %v6326_v0 }
 0x24d   : > { %v1432_v9 = vpop.f32.mrf.mxu2 }
 0x24e   : > { %v1521_v23 = vpop.f32.mrf.mxu3  ;;  %v1433_v28 = vadd.f32 %v1432_v9, %v6327_v15  ;;  %v6337_v15 = vld [vmem:[#allocation46_spill] sm:$0xff] }
 0x250   : > { %v5466_v34 = vadd.f32 %v1521_v23, %v1433_v28  ;;  %v5479_v23 = vpop.f32.mrf.mxu1  ;;  %v6338_v28 = vld [vmem:[#allocation47_spill] sm:$0xff] }
 0x252   : > { %6328 = vst [vmem:[#allocation27_spill] sm:$0xff] %v5466_v34 }
 0x255   : > { %v1434_v27 = vpop.f32.mrf.mxu2 }
 0x256   : > { %v1523_v46 = vpop.f32.mrf.mxu3  ;;  %v1435_v7 = vadd.f32 %v1434_v27, %v6329_v10  ;;  %v2904_v27 = vld [vmem:[#allocation12 + $0x30] sm:$0xff] }
 0x257   : > { %2923 = vmatpush.msra.mxu0 %v2904_v27 }
 0x258   : > { %v5469_v61 = vadd.f32 %v1523_v46, %v1435_v7  ;;  %v2888_v46 = vld [vmem:[#allocation11 + $0x30] sm:$0xff]  ;;  %v5487_v49 = vpop.f32.mrf.mxu1 }
 0x259   : > { %3036 = vmatpush.msra.mxu1 %v2888_v46 }
 0x25a   : > { %6330 = vst [vmem:[#allocation28_spill] sm:$0xff] %v5469_v61  ;;  %1944 = vmatmul.bf16.gmra.mxu2 %v6331_v19 }
 0x25b   : > { %2033 = vmatmul.bf16.gmra.mxu3 %v6332_v1 }
 0x25d   : > { %v1437_v16 = vpop.f32.mrf.mxu2 }
 0x25e   : > { %v1526_v20 = vpop.f32.mrf.mxu3  ;;  %v1438_v58 = vadd.f32 %v1437_v16, %v6333_v43  ;;  %v5489_v43 = vpop.f32.mrf.mxu0 }
 0x260   : > { %v5474_v59 = vadd.f32 %v1526_v20, %v1438_v58 }
 0x262   : > { %6334 = vst [vmem:[#allocation29_spill] sm:$0xff] %v5474_v59 }
 0x265   : > { %v1439_v45 = vpop.f32.mrf.mxu2 }
 0x266   : > { %v1528_v0 = vpop.f32.mrf.mxu3  ;;  %v1440_v6 = vadd.f32 %v1439_v45, %v6335_v11  ;;  %v6339_v11 = vld [vmem:[#allocation48_spill] sm:$0xff] }
 0x268   : > { %v5477_v9 = vadd.f32 %v1528_v0, %v1440_v6 }
 0x26a   : > { %6336 = vst [vmem:[#allocation30_spill] sm:$0xff] %v5477_v9  ;;  %1949 = vmatmul.bf16.gmra.mxu2 %v6337_v15  ;;  %v2903_v15 = vld [vmem:[#allocation12 + $0x28] sm:$0xff] }
 0x26b   : > { %2038 = vmatmul.bf16.gmra.mxu3 %v6338_v28  ;;  %v2887_v28 = vld [vmem:[#allocation11 + $0x28] sm:$0xff]  ;;  %2924 = vmatpush.msra.mxu0 %v2903_v15 }
 0x26c   : > { %3037 = vmatpush.msra.mxu1 %v2887_v28 }
 0x26d   : > { %v1910_v10 = vpop.f32.mrf.mxu2 }
 0x26e   : > { %v1999_v7 = vpop.f32.mrf.mxu3  ;;  %v1911_v19 = vadd.f32 %v1910_v10, %v5306_v5  ;;  %v6340_v5 = vld [vmem:[#allocation49_spill] sm:$0xff] }
 0x270   : > { %v5484_v1 = vadd.f32 %v1999_v7, %v1911_v19  ;;  %v5497_v7 = vpop.f32.mrf.mxu1 }
 0x272   : > { %v2178_v12 = vmax.f32 %v5484_v1, 1.0 }
 0x274   : > { %4374 = vrcp.f32 %v2178_v12  ;;  %v2221_v19 = vand.u32 2147483648, %v2178_v12  ;;  %vm2215_vm1 = vweird.f32 %v2178_v12 }
 0x275   : > { %v1912_v16 = vpop.f32.mrf.mxu2 }
 0x276   : > { %v2001_v20 = vpop.f32.mrf.mxu3  ;;  %v1913_v58 = vadd.f32 %v1912_v16, %v5317_v22 }
 0x278   : > { %v5492_v25 = vadd.f32 %v2001_v20, %v1913_v58  ;;  %v2219_v20 = vand.u32 2147483647, %v2178_v12  ;;  %v5500_v58 = vpop.f32.mrf.mxu0 }
 0x27a   : > { %v4375_v45 = vpop.eup %4374  ;;  %v2179_v0 = vmax.f32 %v5492_v25, 1.0  ;;  %1954 = vmatmul.bf16.gmra.mxu2 %v6339_v11  ;;  %vm2220_vm3 = vcmp.eq.f32.partialorder %v2219_v20, 8.507059e+37 }
 0x27b   : > { %2043 = vmatmul.bf16.gmra.mxu3 %v6340_v5  ;;  %v2211_v6 = vmul.f32 %v4375_v45, %v2178_v12  ;;  %vm2216_vm0 = vweird.f32 %v4375_v45 }
 0x27c   : > { %4376 = vrcp.f32 %v2179_v0  ;;  %vm2217_vm2 = vmor %vm2215_vm1, %vm2216_vm0  ;;  %v2233_v12 = vand.u32 2147483647, %v2179_v0  ;;  %vm2229_vm5 = vweird.f32 %v2179_v0 }
 0x27d   : > { %v1915_v27 = vpop.f32.mrf.mxu2  ;;  %v2212_v10 = vsub.f32 1.0, %v2211_v6  ;;  %v2222_v6 = vor.u32 1.1754944e-38, %v2221_v19 }
 0x27e   : > { %v2004_v46 = vpop.f32.mrf.mxu3  ;;  %v1916_v22 = vadd.f32 %v1915_v27, %v5322_v8  ;;  %vm2234_vm7 = vcmp.eq.f32.partialorder %v2233_v12, 8.507059e+37 }
 0x27f   : > { %v2213_v16 = vmul.f32 %v4375_v45, %v2212_v10 }
 0x280   : > { %v5502_v11 = vadd.f32 %v2004_v46, %v1916_v22  ;;  %v2235_v46 = vand.u32 2147483648, %v2179_v0  ;;  %v5510_v20 = vpop.f32.mrf.mxu0 }
 0x281   : > { %v2214_v5 = vadd.f32 %v4375_v45, %v2213_v16  ;;  %v5506_v16 = vpop.f32.mrf.mxu1 }
 0x282   : > { %v4377_v9 = vpop.eup %4376  ;;  %v2180_v59 = vmax.f32 %v5502_v11, 1.0 }
 0x283   : > { %v2218_v15 = vsel %vm2217_vm2, %v4375_v45, %v2214_v5  ;;  %v2225_v28 = vmul.f32 %v4377_v9, %v2179_v0  ;;  %vm2230_vm4 = vweird.f32 %v4377_v9 }
 0x284   : > { %4378 = vrcp.f32 %v2180_v59  ;;  %v2223_v8 = vsel %vm2220_vm3, %v2222_v6, %v2218_v15  ;;  %vm2231_vm6 = vmor %vm2229_vm5, %vm2230_vm4  ;;  %vm2243_vm9 = vweird.f32 %v2180_v59 }
 0x285   : > { %v1917_v27 = vpop.f32.mrf.mxu2  ;;  %2660 = vperm.xlu0 %4370, %v2223_v8   ;;  %v2226_v61 = vsub.f32 1.0, %v2225_v28  ;;  %v2886_v28 = vld [vmem:[#allocation11 + $0x20] sm:$0xff] }
 0x286   : > { %v2006_v10 = vpop.f32.mrf.mxu3  ;;  %v1918_v34 = vadd.f32 %v1917_v27, %v5331_v18  ;;  %v2236_v18 = vor.u32 1.1754944e-38, %v2235_v46  ;;  %3038 = vmatpush.msra.mxu1 %v2886_v28 }
 0x287   : > { %v2227_v22 = vmul.f32 %v4377_v9, %v2226_v61 }
 0x288   : > { %v5508_v32 = vadd.f32 %v2006_v10, %v1918_v34  ;;  %v2902_v34 = vld [vmem:[#allocation12 + $0x20] sm:$0xff] }
 0x289   : > { %v2228_v19 = vadd.f32 %v4377_v9, %v2227_v22  ;;  %2925 = vmatpush.msra.mxu0 %v2902_v34  ;;  %v2249_v22 = vand.u32 2147483648, %v2180_v59 }
 0x28a   : > { %v4379_v45 = vpop.eup %4378  ;;  %v2181_v5 = vmax.f32 %v5508_v32, 1.0  ;;  %1959 = vmatmul.bf16.gmra.mxu2 %v5325_v33 }
 0x28b   : > { %2048 = vmatmul.bf16.gmra.mxu3 %v5327_v30  ;;  %v2232_v61 = vsel %vm2231_vm6, %v4377_v9, %v2228_v19  ;;  %v2239_v6 = vmul.f32 %v4379_v45, %v2180_v59  ;;  %vm2244_vm8 = vweird.f32 %v4379_v45  ;;  %v2247_v30 = vand.u32 2147483647, %v2180_v59  ;;  %v5518_v19 = vpop.f32.mrf.mxu1 }
 0x28c   : > { %4380 = vrcp.f32 %v2181_v5  ;;  %v2237_v15 = vsel %vm2234_vm7, %v2236_v18, %v2232_v61  ;;  %vm2245_vm10 = vmor %vm2243_vm9, %vm2244_vm8  ;;  %v2250_v61 = vor.u32 1.1754944e-38, %v2249_v22  ;;  %vm2257_vm13 = vweird.f32 %v2181_v5 }
 0x28d   : > { %v1920_v8 = vpop.f32.mrf.mxu2  ;;  %2665 = vperm.xlu0 %4370, %v2237_v15   ;;  %v2240_v27 = vsub.f32 1.0, %v2239_v6  ;;  %vm2248_vm11 = vcmp.eq.f32.partialorder %v2247_v30, 8.507059e+37 }
 0x28e   : > { %v2009_v0 = vpop.f32.mrf.mxu3  ;;  %v1921_v10 = vadd.f32 %v1920_v8, %v5336_v62  ;;  %v5521_v62 = vpop.f32.mrf.mxu0 }
 0x28f   : > { %v2241_v33 = vmul.f32 %v4379_v45, %v2240_v27  ;;  %v2263_v27 = vand.u32 2147483648, %v2181_v5 }
 0x290   : > { %v5516_v46 = vadd.f32 %v2009_v0, %v1921_v10 }
 0x291   : > { %v2242_v9 = vadd.f32 %v4379_v45, %v2241_v33  ;;  %v2261_v33 = vand.u32 2147483647, %v2181_v5 }
 0x292   : > { %v4381_v12 = vpop.eup %4380  ;;  %v2182_v18 = vmax.f32 %v5516_v46, 1.0 }
 0x293   : > { %v2246_v6 = vsel %vm2245_vm10, %v4379_v45, %v2242_v9  ;;  %v2253_v15 = vmul.f32 %v4381_v12, %v2181_v5  ;;  %vm2258_vm12 = vweird.f32 %v4381_v12  ;;  %v2264_v9 = vor.u32 1.1754944e-38, %v2263_v27 }
 0x294   : > { %4382 = vrcp.f32 %v2182_v18  ;;  %v2251_v34 = vsel %vm2248_vm11, %v2250_v61, %v2246_v6  ;;  %vm2259_vm14 = vmor %vm2257_vm13, %vm2258_vm12  ;;  %vm2262_vm15 = vcmp.eq.f32.partialorder %v2261_v33, 8.507059e+37  ;;  %v5529_v6 = vpop.f32.mrf.mxu1  ;;  %v2275_v27 = vand.u32 2147483647, %v2182_v18 }
 0x295   : > { %v1922_v28 = vpop.f32.mrf.mxu2  ;;  %2670 = vperm.xlu1 %4371, %v2251_v34   ;;  %v2254_v0 = vsub.f32 1.0, %v2253_v15  ;;  %v2901_v34 = vld [vmem:[#allocation12 + $0x18] sm:$0xff]  ;;  %vm2271_vm1 = vweird.f32 %v2182_v18 }
 0x296   : > { %v2011_v8 = vpop.f32.mrf.mxu3  ;;  %v1923_v59 = vadd.f32 %v1922_v28, %v5347_v55  ;;  %v2885_v28 = vld [vmem:[#allocation11 + $0x18] sm:$0xff]  ;;  %2926 = vmatpush.msra.mxu0 %v2901_v34  ;;  %vm2276_vm3 = vcmp.eq.f32.partialorder %v2275_v27, 8.507059e+37 }
 0x297   : > { %v2255_v10 = vmul.f32 %v4381_v12, %v2254_v0  ;;  %3039 = vmatpush.msra.mxu1 %v2885_v28 }
 0x298   : > { %v5524_v21 = vadd.f32 %v2011_v8, %v1923_v59  ;;  %v5531_v59 = vpop.f32.mrf.mxu0 }
 0x299   : > { %v2256_v22 = vadd.f32 %v4381_v12, %v2255_v10 }
 0x29a   : > { %v4383_v45 = vpop.eup %4382  ;;  %v2183_v30 = vmax.f32 %v5524_v21, 1.0  ;;  %1964 = vmatmul.bf16.gmra.mxu2 %v5339_v57 }
 0x29b   : > { %2053 = vmatmul.bf16.gmra.mxu3 %v5341_v40  ;;  %v2260_v61 = vsel %vm2259_vm14, %v4381_v12, %v2256_v22  ;;  %v2267_v55 = vmul.f32 %v4383_v45, %v2182_v18  ;;  %v2277_v40 = vand.u32 2147483648, %v2182_v18  ;;  %vm2272_vm0 = vweird.f32 %v4383_v45 }
 0x29c   : > { %4384 = vrcp.f32 %v2183_v30  ;;  %v2265_v15 = vsel %vm2262_vm15, %v2264_v9, %v2260_v61  ;;  %vm2273_vm2 = vmor %vm2271_vm1, %vm2272_vm0  ;;  %vm2285_vm5 = vweird.f32 %v2183_v30 }
 0x29d   : > { %v1925_v8 = vpop.f32.mrf.mxu2  ;;  %2675 = vperm.xlu1 %4371, %v2265_v15   ;;  %v2268_v0 = vsub.f32 1.0, %v2267_v55  ;;  %v2278_v61 = vor.u32 1.1754944e-38, %v2277_v40  ;;  %v1753_v40 = vadd.f32 %v5489_v43, %v5366_v36 }
 0x29e   : > { %v2014_v5 = vpop.f32.mrf.mxu3  ;;  %v1926_v57 = vadd.f32 %v1925_v8, %v5352_v63 }
 0x29f   : > { %v2269_v12 = vmul.f32 %v4383_v45, %v2268_v0  ;;  %v5537_v0 = vpop.f32.mrf.mxu1  ;;  %v1842_v36 = vadd.f32 %v5479_v23, %v1753_v40 }
 0x2a0   : > { %v5534_v10 = vadd.f32 %v2014_v5, %v1926_v57  ;;  %v2291_v57 = vand.u32 2147483648, %v2183_v30 }
 0x2a1   : > { %v2270_v33 = vadd.f32 %v4383_v45, %v2269_v12  ;;  %v2289_v12 = vand.u32 2147483647, %v2183_v30 }
 0x2a2   : > { %v4385_v22 = vpop.eup %4384  ;;  %v2184_v9 = vmax.f32 %v5534_v10, 1.0 }
 0x2a3   : > { %v2274_v55 = vsel %vm2273_vm2, %v4383_v45, %v2270_v33  ;;  %v2281_v15 = vmul.f32 %v4385_v22, %v2183_v30  ;;  %vm2286_vm4 = vweird.f32 %v4385_v22  ;;  %v5542_v45 = vpop.f32.mrf.mxu0  ;;  %vm2290_vm7 = vcmp.eq.f32.partialorder %v2289_v12, 8.507059e+37 }
 0x2a4   : > { %4386 = vrcp.f32 %v2184_v9  ;;  %v2279_v34 = vsel %vm2276_vm3, %v2278_v61, %v2274_v55  ;;  %vm2287_vm6 = vmor %vm2285_vm5, %vm2286_vm4  ;;  %vm2299_vm9 = vweird.f32 %v2184_v9 }
 0x2a5   : > { %v1927_v63 = vpop.f32.mrf.mxu2  ;;  %2680 = vperm.xlu2 %4372, %v2279_v34   ;;  %v2282_v28 = vsub.f32 1.0, %v2281_v15 }
 0x2a6   : > { %v2016_v8 = vpop.f32.mrf.mxu3  ;;  %v1928_v5 = vadd.f32 %v1927_v63, %v5361_v26  ;;  %v2292_v26 = vor.u32 1.1754944e-38, %v2291_v57  ;;  %v2900_v63 = vld [vmem:[#allocation12 + $0x10] sm:$0xff]  ;;  %v2303_v57 = vand.u32 2147483647, %v2184_v9 }
 0x2a7   : > { %v2283_v18 = vmul.f32 %v4385_v22, %v2282_v28  ;;  %2927 = vmatpush.msra.mxu0 %v2900_v63  ;;  %v5552_v12 = vpop.f32.mrf.mxu1 }
 0x2a8   : > { %v5544_v27 = vadd.f32 %v2016_v8, %v1928_v5  ;;  %v2884_v8 = vld [vmem:[#allocation11 + $0x10] sm:$0xff]  ;;  %vm2304_vm11 = vcmp.eq.f32.partialorder %v2303_v57, 8.507059e+37 }
 0x2a9   : > { %v2284_v33 = vadd.f32 %v4385_v22, %v2283_v18  ;;  %3040 = vmatpush.msra.mxu1 %v2884_v8 }
 0x2aa   : > { %v4387_v61 = vpop.eup %4386  ;;  %v2185_v55 = vmax.f32 %v5544_v27, 1.0  ;;  %1969 = vmatmul.bf16.gmra.mxu2 %v5355_v13  ;;  %v2305_v13 = vand.u32 2147483648, %v2184_v9 }
 0x2ab   : > { %2058 = vmatmul.bf16.gmra.mxu3 %v5357_v41  ;;  %v2288_v15 = vsel %vm2287_vm6, %v4385_v22, %v2284_v33  ;;  %v2295_v34 = vmul.f32 %v4387_v61, %v2184_v9  ;;  %vm2300_vm8 = vweird.f32 %v4387_v61  ;;  %v1755_v22 = vadd.f32 %v5500_v58, %v5373_v47 }
 0x2ac   : > { %4388 = vrcp.f32 %v2185_v55  ;;  %v2293_v43 = vsel %vm2290_vm7, %v2292_v26, %v2288_v15  ;;  %v5556_v26 = vpop.f32.mrf.mxu0  ;;  %vm2301_vm10 = vmor %vm2299_vm9, %vm2300_vm8  ;;  %v2319_v9 = vand.u32 2147483648, %v2185_v55  ;;  %vm2313_vm13 = vweird.f32 %v2185_v55 }
 0x2ad   : > { %v1930_v28 = vpop.f32.mrf.mxu2  ;;  %2685 = vperm.xlu2 %4372, %v2293_v43   ;;  %v2296_v5 = vsub.f32 1.0, %v2295_v34  ;;  %v2306_v34 = vor.u32 1.1754944e-38, %v2305_v13  ;;  %v1844_v63 = vadd.f32 %v5487_v49, %v1755_v22 }
 0x2ae   : > { %v2019_v30 = vpop.f32.mrf.mxu3  ;;  %v1931_v18 = vadd.f32 %v1930_v28, %v1842_v36 }
 0x2af   : > { %v2297_v41 = vmul.f32 %v4387_v61, %v2296_v5  ;;  %v5564_v49 = vpop.f32.mrf.mxu1 }
 0x2b0   : > { %v5554_v23 = vadd.f32 %v2019_v30, %v1931_v18  ;;  %v2317_v18 = vand.u32 2147483647, %v2185_v55 }
 0x2b1   : > { %v2298_v40 = vadd.f32 %v4387_v61, %v2297_v41  ;;  %v1758_v41 = vadd.f32 %v5510_v20, %v5382_v37 }
 0x2b2   : > { %v4389_v33 = vpop.eup %4388  ;;  %v2186_v15 = vmax.f32 %v5554_v23, 1.0  ;;  %vm2318_vm15 = vcmp.eq.f32.partialorder %v2317_v18, 8.507059e+37 }
 0x2b3   : > { %v2302_v36 = vsel %vm2301_vm10, %v4387_v61, %v2298_v40  ;;  %v2309_v43 = vmul.f32 %v4389_v33, %v2185_v55  ;;  %vm2314_vm12 = vweird.f32 %v4389_v33  ;;  %v2320_v40 = vor.u32 1.1754944e-38, %v2319_v9 }
 0x2b4   : > { %4390 = vrcp.f32 %v2186_v15  ;;  %v2307_v47 = vsel %vm2304_vm11, %v2306_v34, %v2302_v36  ;;  %vm2315_vm14 = vmor %vm2313_vm13, %vm2314_vm12  ;;  %v1847_v37 = vadd.f32 %v5497_v7, %v1758_v41  ;;  %v5570_v20 = vpop.f32.mrf.mxu0  ;;  %v1760_v7 = vadd.f32 %v5521_v62, %v5389_v24 }
 0x2b5   : > { %v1932_v58 = vpop.f32.mrf.mxu2  ;;  %2690 = vperm.xlu0 %4370, %v2307_v47   ;;  %v2310_v28 = vsub.f32 1.0, %v2309_v43  ;;  %v2899_v43 = vld [vmem:[#allocation12 + $0x8] sm:$0xff]  ;;  %vm2327_vm1 = vweird.f32 %v2186_v15 }
 0x2b6   : > { %v2021_v8 = vpop.f32.mrf.mxu3  ;;  %v1933_v30 = vadd.f32 %v1932_v58, %v1844_v63  ;;  %v2883_v63 = vld [vmem:[#allocation11 + $0x8] sm:$0xff]  ;;  %2928 = vmatpush.msra.mxu0 %v2899_v43 }
 0x2b7   : > { %v2311_v5 = vmul.f32 %v4389_v33, %v2310_v28  ;;  %3041 = vmatpush.msra.mxu1 %v2883_v63 }
 0x2b8   : > { %v5562_v13 = vadd.f32 %v2021_v8, %v1933_v30 }
 0x2b9   : > { %v2312_v61 = vadd.f32 %v4389_v33, %v2311_v5 }
 0x2ba   : > { %v4391_v57 = vpop.eup %4390  ;;  %v2187_v22 = vmax.f32 %v5562_v13, 1.0  ;;  %1974 = vmatmul.bf16.gmra.mxu2 %v5369_v2 }
 0x2bb   : > { %2063 = vmatmul.bf16.gmra.mxu3 %v5371_v51  ;;  %v2316_v34 = vsel %vm2315_vm14, %v4389_v33, %v2312_v61  ;;  %v2323_v36 = vmul.f32 %v4391_v57, %v2186_v15  ;;  %v2333_v51 = vand.u32 2147483648, %v2186_v15  ;;  %vm2328_vm0 = vweird.f32 %v4391_v57 }
 0x2bc   : > { %4392 = vrcp.f32 %v2187_v22  ;;  %v2321_v55 = vsel %vm2318_vm15, %v2320_v40, %v2316_v34  ;;  %v2331_v33 = vand.u32 2147483647, %v2186_v15  ;;  %vm2329_vm2 = vmor %vm2327_vm1, %vm2328_vm0  ;;  %v1849_v34 = vadd.f32 %v5506_v16, %v1760_v7  ;;  %v5580_v43 = vpop.f32.mrf.mxu0 }
 0x2bd   : > { %v1935_v47 = vpop.f32.mrf.mxu2  ;;  %2695 = vperm.xlu1 %4371, %v2321_v55   ;;  %v2324_v8 = vsub.f32 1.0, %v2323_v36  ;;  %v2334_v41 = vor.u32 1.1754944e-38, %v2333_v51  ;;  %v5578_v36 = vpop.f32.mrf.mxu1  ;;  %v2347_v63 = vand.u32 2147483648, %v2187_v22  ;;  %vm2341_vm5 = vweird.f32 %v2187_v22 }
 0x2be   : > { %v2024_v58 = vpop.f32.mrf.mxu3  ;;  %v1936_v2 = vadd.f32 %v1935_v47, %v1847_v37  ;;  %vm2332_vm3 = vcmp.eq.f32.partialorder %v2331_v33, 8.507059e+37 }
 0x2bf   : > { %v2325_v28 = vmul.f32 %v4391_v57, %v2324_v8 }
 0x2c0   : > { %v5574_v30 = vadd.f32 %v2024_v58, %v1936_v2  ;;  %v2345_v58 = vand.u32 2147483647, %v2187_v22 }
 0x2c1   : > { %v2326_v9 = vadd.f32 %v4391_v57, %v2325_v28  ;;  %v2348_v28 = vor.u32 1.1754944e-38, %v2347_v63 }
 0x2c2   : > { %v4393_v5 = vpop.eup %4392  ;;  %v2188_v18 = vmax.f32 %v5574_v30, 1.0  ;;  %vm2346_vm7 = vcmp.eq.f32.partialorder %v2345_v58, 8.507059e+37 }
 0x2c3   : > { %v2330_v61 = vsel %vm2329_vm2, %v4391_v57, %v2326_v9  ;;  %v2337_v40 = vmul.f32 %v4393_v5, %v2187_v22  ;;  %vm2342_vm4 = vweird.f32 %v4393_v5  ;;  %v1763_v57 = vadd.f32 %v5531_v59, %v5396_v14  ;;  %v2898_v59 = vld [vmem:[#allocation12] sm:$0xff] }
 0x2c4   : > { %4394 = vrcp.f32 %v2188_v18  ;;  %v2335_v37 = vsel %vm2332_vm3, %v2334_v41, %v2330_v61  ;;  %vm2343_vm6 = vmor %vm2341_vm5, %vm2342_vm4  ;;  %v2882_v22 = vld [vmem:[#allocation11] sm:$0xff]  ;;  %2929 = vmatpush.msra.mxu0 %v2898_v59  ;;  %vm2355_vm9 = vweird.f32 %v2188_v18 }
 0x2c5   : > { %v1937_v55 = vpop.f32.mrf.mxu2  ;;  %2700 = vperm.xlu2 %4372, %v2335_v37   ;;  %v2338_v62 = vsub.f32 1.0, %v2337_v40  ;;  %v1852_v9 = vadd.f32 %v5518_v19, %v1763_v57  ;;  %3042 = vmatpush.msra.mxu1 %v2882_v22  ;;  %v2359_v37 = vand.u32 2147483647, %v2188_v18  ;;  %v1765_v19 = vadd.f32 %v5542_v45, %v5403_v3 }
 0x2c6   : > { %v2026_v24 = vpop.f32.mrf.mxu3  ;;  %v1938_v15 = vadd.f32 %v1937_v55, %v1849_v34  ;;  %v2361_v34 = vand.u32 2147483648, %v2188_v18  ;;  %v5597_v55 = vpop.f32.mrf.mxu0 }
 0x2c7   : > { %v2339_v47 = vmul.f32 %v4393_v5, %v2338_v62  ;;  %vm2360_vm11 = vcmp.eq.f32.partialorder %v2359_v37, 8.507059e+37 }
 0x2c8   : > { %v5584_v8 = vadd.f32 %v2026_v24, %v1938_v15 }
 0x2c9   : > { %v2340_v16 = vadd.f32 %v4393_v5, %v2339_v47  ;;  %v2362_v47 = vor.u32 1.1754944e-38, %v2361_v34  ;;  %v2850_v34 = vld [vmem:[%s4985_s14] sm:$0xff] }
 0x2ca   : > { %v4395_v2 = vpop.eup %4394  ;;  %v5587_v51 = vmax.f32 %v5584_v8, 1.0  ;;  %1979 = vmatmul.bf16.gmra.mxu2 %v5385_v38  ;;  %v5593_v38 = vpop.f32.mrf.mxu1  ;;  %3043 = vmatmul.f32.vlgmr.msra.gmra.mxu1 %v2850_v34 }
 0x2cb   : > { %2068 = vmatmul.bf16.gmra.mxu3 %v5387_v54  ;;  %v2344_v33 = vsel %vm2343_vm6, %v4393_v5, %v2340_v16  ;;  %v2351_v7 = vmul.f32 %v4395_v2, %v2188_v18  ;;  %vm2356_vm8 = vweird.f32 %v4395_v2  ;;  %v1854_v16 = vadd.f32 %v5529_v6, %v1765_v19 }
 0x2cc   : > { %4396 = vrcp.f32 %v5587_v51  ;;  %v2349_v14 = vsel %vm2346_vm7, %v2348_v28, %v2344_v33  ;;  %vm2357_vm10 = vmor %vm2355_vm9, %vm2356_vm8  ;;  %v2375_v18 = vand.u32 2147483648, %v5587_v51  ;;  %vm2369_vm13 = vweird.f32 %v5587_v51 }
 0x2cd   : > { %v1940_v41 = vpop.f32.mrf.mxu2  ;;  %2705 = vperm.xlu0 %4370, %v2349_v14   ;;  %v2352_v40 = vsub.f32 1.0, %v2351_v7  ;;  %v2373_v14 = vand.u32 2147483647, %v5587_v51 }
 0x2ce   : > { %v2029_v61 = vpop.f32.mrf.mxu3  ;;  %v1941_v54 = vadd.f32 %v1940_v41, %v1852_v9 }
 0x2cf   : > { %v2353_v5 = vmul.f32 %v4395_v2, %v2352_v40  ;;  %vm2374_vm15 = vcmp.eq.f32.partialorder %v2373_v14, 8.507059e+37 }
 0x2d0   : > { %v5599_v24 = vadd.f32 %v2029_v61, %v1941_v54  ;;  %v5613_v61 = vpop.f32.mrf.mxu0  ;;  %v2376_v54 = vor.u32 1.1754944e-38, %v2375_v18 }
 0x2d1   : > { %v2354_v62 = vadd.f32 %v4395_v2, %v2353_v5 }
 0x2d2   : > { %v4397_v15 = vpop.eup %4396  ;;  %v2190_v63 = vmax.f32 %v5599_v24, 1.0  ;;  %v5608_v59 = vpop.f32.mrf.mxu1 }
 0x2d3   : > { %v2358_v58 = vsel %vm2357_vm10, %v4395_v2, %v2354_v62  ;;  %v2365_v57 = vmul.f32 %v4397_v15, %v5587_v51  ;;  %vm2370_vm12 = vweird.f32 %v4397_v15  ;;  %v1768_v2 = vadd.f32 %v5556_v26, %v5410_v4 }
 0x2d4   : > { %4398 = vrcp.f32 %v2190_v63  ;;  %v2363_v28 = vsel %vm2360_vm11, %v2362_v47, %v2358_v58  ;;  %vm2371_vm14 = vmor %vm2369_vm13, %vm2370_vm12  ;;  %vm2383_vm1 = vweird.f32 %v2190_v63 }
 0x2d5   : > { %v1942_v3 = vpop.f32.mrf.mxu2  ;;  %2710 = vperm.xlu1 %4371, %v2363_v28   ;;  %v2366_v33 = vsub.f32 1.0, %v2365_v57  ;;  %v1857_v5 = vadd.f32 %v5537_v0, %v1768_v2 }
 0x2d6   : > { %v2031_v45 = vpop.f32.mrf.mxu3  ;;  %v1943_v7 = vadd.f32 %v1942_v3, %v1854_v16 }
 0x2d7   : > { %v2367_v9 = vmul.f32 %v4397_v15, %v2366_v33  ;;  %v2851_v33 = vld [vmem:[%s4985_s14 + $0x8] sm:$0xff] }
 0x2d8   : > { %v5610_v6 = vadd.f32 %v2031_v45, %v1943_v7  ;;  %3046 = vmatmul.f32.gmra.mxu1 %v2851_v33  ;;  %v5629_v14 = vpop.f32.mrf.mxu0 }
 0x2d9   : > { %v2368_v22 = vadd.f32 %v4397_v15, %v2367_v9 }
 0x2da   : > { %v4399_v41 = vpop.eup %4398  ;;  %v2191_v40 = vmax.f32 %v5610_v6, 1.0  ;;  %1984 = vmatmul.bf16.gmra.mxu2 %v5399_v42  ;;  %v2389_v42 = vand.u32 2147483648, %v2190_v63  ;;  %v5624_v28 = vpop.f32.mrf.mxu1 }
 0x2db   : > { %2073 = vmatmul.bf16.gmra.mxu3 %v5401_v35  ;;  %v2372_v4 = vsel %vm2371_vm14, %v4397_v15, %v2368_v22  ;;  %v2379_v26 = vmul.f32 %v4399_v41, %v2190_v63  ;;  %vm2384_vm0 = vweird.f32 %v4399_v41  ;;  %v2387_v35 = vand.u32 2147483647, %v2190_v63 }
 0x2dc   : > { %4400 = vrcp.f32 %v2191_v40  ;;  %v2377_v51 = vsel %vm2374_vm15, %v2376_v54, %v2372_v4  ;;  %v1770_v15 = vadd.f32 %v5570_v20, %v5413_v60  ;;  %vm2385_vm2 = vmor %vm2383_vm1, %vm2384_vm0  ;;  %v2390_v45 = vor.u32 1.1754944e-38, %v2389_v42 }
 0x2dd   : > { %v1945_v37 = vpop.f32.mrf.mxu2  ;;  %2715 = vperm.xlu2 %4372, %v2377_v51   ;;  %v2380_v62 = vsub.f32 1.0, %v2379_v26  ;;  %vm2388_vm3 = vcmp.eq.f32.partialorder %v2387_v35, 8.507059e+37  ;;  %v2403_v54 = vand.u32 2147483648, %v2191_v40  ;;  %v2401_v4 = vand.u32 2147483647, %v2191_v40 }
 0x2de   : > { %v2034_v19 = vpop.f32.mrf.mxu3  ;;  %v1946_v47 = vadd.f32 %v1945_v37, %v1857_v5  ;;  %v1859_v9 = vadd.f32 %v5552_v12, %v1770_v15  ;;  %vm2397_vm5 = vweird.f32 %v2191_v40 }
 0x2df   : > { %v2381_v58 = vmul.f32 %v4399_v41, %v2380_v62  ;;  %v2404_v37 = vor.u32 1.1754944e-38, %v2403_v54  ;;  %vm2402_vm7 = vcmp.eq.f32.partialorder %v2401_v4, 8.507059e+37 }
 0x2e0   : > { %v5622_v57 = vadd.f32 %v2034_v19, %v1946_v47  ;;  %v2852_v19 = vld [vmem:[%s4985_s14 + $0x10] sm:$0xff]  ;;  %v5643_v15 = vpop.f32.mrf.mxu0 }
 0x2e1   : > { %v2382_v16 = vadd.f32 %v4399_v41, %v2381_v58  ;;  %3049 = vmatmul.f32.gmra.mxu1 %v2852_v19 }
 0x2e2   : > { %v4401_v0 = vpop.eup %4400  ;;  %v2192_v3 = vmax.f32 %v5622_v57, 1.0  ;;  %v5640_v58 = vpop.f32.mrf.mxu1 }
 0x2e3   : > { %v2386_v7 = vsel %vm2385_vm2, %v4399_v41, %v2382_v16  ;;  %v2393_v18 = vmul.f32 %v4401_v0, %v2191_v40  ;;  %vm2398_vm4 = vweird.f32 %v4401_v0  ;;  %v1773_v41 = vadd.f32 %v5580_v43, %v5418_v17 }
 0x2e4   : > { %4402 = vrcp.f32 %v2192_v3  ;;  %v2391_v60 = vsel %vm2388_vm3, %v2390_v45, %v2386_v7  ;;  %vm2399_vm6 = vmor %vm2397_vm5, %vm2398_vm4  ;;  %v2417_v45 = vand.u32 2147483648, %v2192_v3  ;;  %v2415_v33 = vand.u32 2147483647, %v2192_v3 }
 0x2e5   : > { %v1947_v20 = vpop.f32.mrf.mxu2  ;;  %2720 = vperm.xlu0 %4370, %v2391_v60   ;;  %v2394_v2 = vsub.f32 1.0, %v2393_v18  ;;  %v1862_v42 = vadd.f32 %v5564_v49, %v1773_v41  ;;  %v1775_v49 = vadd.f32 %v5597_v55, %v5421_v50  ;;  %vm2411_vm9 = vweird.f32 %v2192_v3 }
 0x2e6   : > { %v2036_v63 = vpop.f32.mrf.mxu3  ;;  %v1948_v22 = vadd.f32 %v1947_v20, %v1859_v9  ;;  %v2418_v20 = vor.u32 1.1754944e-38, %v2417_v45  ;;  %vm2416_vm11 = vcmp.eq.f32.partialorder %v2415_v33, 8.507059e+37 }
 0x2e7   : > { %v2395_v34 = vmul.f32 %v4401_v0, %v2394_v2  ;;  %v1864_v54 = vadd.f32 %v5578_v36, %v1775_v49  ;;  %v1778_v36 = vadd.f32 %v5613_v61, %v5426_v53 }
 0x2e8   : > { %v5633_v26 = vadd.f32 %v2036_v63, %v1948_v22  ;;  %v2853_v63 = vld [vmem:[%s4985_s14 + $0x18] sm:$0xff] }
 0x2e9   : > { %v2396_v12 = vadd.f32 %v4401_v0, %v2395_v34  ;;  %3052 = vmatmul.f32.gmra.mxu1 %v2853_v63  ;;  %v1867_v61 = vadd.f32 %v5593_v38, %v1778_v36 }
 0x2ea   : > { %v4403_v5 = vpop.eup %4402  ;;  %v5636_v51 = vmax.f32 %v5633_v26, 1.0  ;;  %v5656_v4 = vpop.f32.mrf.mxu1 }
 0x2eb   : > { %v2400_v62 = vsel %vm2399_vm6, %v4401_v0, %v2396_v12  ;;  %v2407_v47 = vmul.f32 %v4403_v5, %v2192_v3  ;;  %vm2412_vm8 = vweird.f32 %v4403_v5 }
 0x2ec   : > { %4404 = vrcp.f32 %v5636_v51  ;;  %v2405_v17 = vsel %vm2402_vm7, %v2404_v37, %v2400_v62  ;;  %vm2413_vm10 = vmor %vm2411_vm9, %vm2412_vm8  ;;  %v2431_v12 = vand.u32 2147483648, %v5636_v51  ;;  %v2429_v19 = vand.u32 2147483647, %v5636_v51  ;;  %v5662_v62 = vpop.f32.mrf.mxu0 }
 0x2ed   : > { %v1950_v43 = vpop.f32.mrf.mxu2  ;;  %2725 = vperm.xlu1 %4371, %v2405_v17   ;;  %v2408_v35 = vsub.f32 1.0, %v2407_v47  ;;  %vm2425_vm13 = vweird.f32 %v5636_v51 }
 0x2ee   : > { %v2039_v40 = vpop.f32.mrf.mxu3  ;;  %v1951_v16 = vadd.f32 %v1950_v43, %v1862_v42  ;;  %vm2430_vm15 = vcmp.eq.f32.partialorder %v2429_v19, 8.507059e+37 }
 0x2ef   : > { %v2409_v0 = vmul.f32 %v4403_v5, %v2408_v35  ;;  %v2432_v35 = vor.u32 1.1754944e-38, %v2431_v12  ;;  %v2855_v12 = vld [vmem:[%s4985_s14 + $0x28] sm:$0xff] }
 0x2f0   : > { %v5647_v7 = vadd.f32 %v2039_v40, %v1951_v16  ;;  %v2854_v16 = vld [vmem:[%s4985_s14 + $0x20] sm:$0xff] }
 0x2f1   : > { %v2410_v18 = vadd.f32 %v4403_v5, %v2409_v0  ;;  %3055 = vmatmul.f32.gmra.mxu1 %v2854_v16  ;;  %v1783_v16 = vadd.f32 %v5643_v15, %v5434_v52 }
 0x2f2   : > { %v4405_v9 = vpop.eup %4404  ;;  %v5650_v60 = vmax.f32 %v5647_v7, 1.0  ;;  %v5679_v38 = vpop.f32.mrf.mxu1 }
 0x2f3   : > { %v2414_v2 = vsel %vm2413_vm10, %v4403_v5, %v2410_v18  ;;  %v2421_v22 = vmul.f32 %v4405_v9, %v5636_v51  ;;  %vm2426_vm12 = vweird.f32 %v4405_v9 }
 0x2f4   : > { %4406 = vrcp.f32 %v5650_v60  ;;  %v2419_v50 = vsel %vm2416_vm11, %v2418_v20, %v2414_v2  ;;  %vm2427_vm14 = vmor %vm2425_vm13, %vm2426_vm12  ;;  %v2445_v18 = vand.u32 2147483648, %v5650_v60  ;;  %v1780_v2 = vadd.f32 %v5629_v14, %v5429_v31 }
 0x2f5   : > { %v1952_v55 = vpop.f32.mrf.mxu2  ;;  %2730 = vperm.xlu2 %4372, %v2419_v50   ;;  %v2422_v3 = vsub.f32 1.0, %v2421_v22  ;;  %vm2439_vm1 = vweird.f32 %v5650_v60 }
 0x2f6   : > { %v2041_v34 = vpop.f32.mrf.mxu3  ;;  %v1953_v41 = vadd.f32 %v1952_v55, %v1864_v54 }
 0x2f7   : > { %v2661_v5 = vpop.permute.xlu0 %2660  ;;  %v2423_v37 = vmul.f32 %v4405_v9, %v2422_v3 }
 0x2f8   : > { %v5664_v47 = vadd.f32 %v2041_v34, %v1953_v41  ;;  %v2818_v42 = vmul.f32 %v2661_v5, %v5484_v1  ;;  %v5685_v34 = vpop.f32.mrf.mxu0  ;;  %v2446_v41 = vor.u32 1.1754944e-38, %v2445_v18 }
 0x2f9   : > { %v2424_v17 = vadd.f32 %v4405_v9, %v2423_v37  ;;  %3058 = vmatmul.f32.gmra.mxu1 %v2855_v12 }
 0x2fa   : > { %v4407_v43 = vpop.eup %4406  ;;  %v5669_v40 = vmax.f32 %v5664_v47, 1.0  ;;  %2930 = vmatmul.f32.vlgmr.msra.gmra.mxu0 %v2818_v42 }
 0x2fb   : > { %v2428_v45 = vsel %vm2427_vm14, %v4405_v9, %v2424_v17  ;;  %v2435_v53 = vmul.f32 %v4407_v43, %v5650_v60  ;;  %vm2440_vm0 = vweird.f32 %v4407_v43  ;;  %v2443_v9 = vand.u32 2147483647, %v5650_v60 }
 0x2fc   : > { %4408 = vrcp.f32 %v5669_v40  ;;  %v2433_v1 = vsel %vm2430_vm15, %v2432_v35, %v2428_v45  ;;  %vm2441_vm2 = vmor %vm2439_vm1, %vm2440_vm0  ;;  %v2459_v42 = vand.u32 2147483648, %v5669_v40  ;;  %vm2453_vm5 = vweird.f32 %v5669_v40 }
 0x2fd   : > { %v1955_v0 = vpop.f32.mrf.mxu2  ;;  %2735 = vperm.xlu0 %4370, %v2433_v1   ;;  %v2436_v33 = vsub.f32 1.0, %v2435_v53  ;;  %vm2444_vm3 = vcmp.eq.f32.partialorder %v2443_v9, 8.507059e+37  ;;  %v5702_v1 = vpop.f32.mrf.mxu1 }
 0x2fe   : > { %v2044_v51 = vpop.f32.mrf.mxu3  ;;  %v1956_v49 = vadd.f32 %v1955_v0, %v1867_v61 }
 0x2ff   : > { %v2666_v20 = vpop.permute.xlu0 %2665  ;;  %v2437_v63 = vmul.f32 %v4407_v43, %v2436_v33  ;;  %v2856_v33 = vld [vmem:[%s4985_s14 + $0x30] sm:$0xff] }
 0x300   : > { %v5681_v22 = vadd.f32 %v2044_v51, %v1956_v49  ;;  %v2819_v54 = vmul.f32 %v2666_v20, %v5492_v25  ;;  %v1869_v25 = vadd.f32 %v5608_v59, %v1780_v2  ;;  %v2460_v51 = vor.u32 1.1754944e-38, %v2459_v42  ;;  %v5710_v15 = vpop.f32.mrf.mxu0 }
 0x301   : > { %v2438_v50 = vadd.f32 %v4407_v43, %v2437_v63  ;;  %3061 = vmatmul.f32.gmra.mxu1 %v2856_v33 }
 0x302   : > { %v4409_v55 = vpop.eup %4408  ;;  %v5688_v3 = vmax.f32 %v5681_v22, 1.0  ;;  %2933 = vmatmul.f32.gmra.mxu0 %v2819_v54 }
 0x303   : > { %v2442_v31 = vsel %vm2441_vm2, %v4407_v43, %v2438_v50  ;;  %v2449_v14 = vmul.f32 %v4409_v55, %v5669_v40  ;;  %vm2454_vm4 = vweird.f32 %v4409_v55  ;;  %v2457_v43 = vand.u32 2147483647, %v5669_v40 }
 0x304   : > { %4410 = vrcp.f32 %v5688_v3  ;;  %v2447_v60 = vsel %vm2444_vm3, %v2446_v41, %v2442_v31  ;;  %vm2455_vm6 = vmor %vm2453_vm5, %vm2454_vm4  ;;  %v2473_v2 = vand.u32 2147483648, %v5688_v3  ;;  %vm2467_vm9 = vweird.f32 %v5688_v3 }
 0x305   : > { %v1957_v5 = vpop.f32.mrf.mxu2  ;;  %2740 = vperm.xlu1 %4371, %v2447_v60   ;;  %v2450_v19 = vsub.f32 1.0, %v2449_v14  ;;  %vm2458_vm7 = vcmp.eq.f32.partialorder %v2457_v43, 8.507059e+37 }
 0x306   : > { %v2046_v37 = vpop.f32.mrf.mxu3  ;;  %v1958_v36 = vadd.f32 %v1957_v5, %v1869_v25  ;;  %v2681_v25 = vpop.permute.xlu2 %2680  ;;  %v2474_v5 = vor.u32 1.1754944e-38, %v2473_v2 }
 0x307   : > { %v2671_v17 = vpop.permute.xlu1 %2670  ;;  %v2451_v35 = vmul.f32 %v4409_v55, %v2450_v19 }
 0x308   : > { %v5698_v59 = vadd.f32 %v2046_v37, %v1958_v36  ;;  %v2820_v45 = vmul.f32 %v2671_v17, %v5502_v11  ;;  %v1872_v11 = vadd.f32 %v5624_v28, %v1783_v16  ;;  %v1785_v28 = vadd.f32 %v5662_v62, %v5437_v39  ;;  %v2857_v37 = vld [vmem:[%s4985_s14 + $0x38] sm:$0xff] }
 0x309   : > { %v2452_v53 = vadd.f32 %v4409_v55, %v2451_v35  ;;  %3064 = vmatmul.f32.gmra.mxu1 %v2857_v37  ;;  %v5730_v35 = vpop.f32.mrf.mxu0 }
 0x30a   : > { %v4411_v61 = vpop.eup %4410  ;;  %v5705_v0 = vmax.f32 %v5698_v59, 1.0  ;;  %2936 = vmatmul.f32.gmra.mxu0 %v2820_v45  ;;  %v1874_v62 = vadd.f32 %v5640_v58, %v1785_v28  ;;  %v1788_v58 = vadd.f32 %v5685_v34, %v5442_v48 }
 0x30b   : > { %v2456_v49 = vsel %vm2455_vm6, %v4409_v55, %v2452_v53  ;;  %v2463_v52 = vmul.f32 %v4411_v61, %v5688_v3  ;;  %vm2468_vm8 = vweird.f32 %v4411_v61  ;;  %v2471_v55 = vand.u32 2147483647, %v5688_v3 }
 0x30c   : > { %4412 = vrcp.f32 %v5705_v0  ;;  %v2461_v40 = vsel %vm2458_vm7, %v2460_v51, %v2456_v49  ;;  %vm2469_vm10 = vmor %vm2467_vm9, %vm2468_vm8  ;;  %v2487_v16 = vand.u32 2147483648, %v5705_v0  ;;  %v2485_v53 = vand.u32 2147483647, %v5705_v0 }
 0x30d   : > { %v1960_v18 = vpop.f32.mrf.mxu2  ;;  %2745 = vperm.xlu2 %4372, %v2461_v40   ;;  %v2464_v63 = vsub.f32 1.0, %v2463_v52  ;;  %vm2472_vm11 = vcmp.eq.f32.partialorder %v2471_v55, 8.507059e+37  ;;  %vm2481_vm13 = vweird.f32 %v5705_v0  ;;  %v2858_v40 = vld [vmem:[%s4985_s14 + $0x40] sm:$0xff]  ;;  %v1877_v48 = vadd.f32 %v5656_v4, %v1788_v58 }
 0x30e   : > { %v2049_v20 = vpop.f32.mrf.mxu3  ;;  %v1961_v9 = vadd.f32 %v1960_v18, %v1872_v11  ;;  %v2488_v11 = vor.u32 1.1754944e-38, %v2487_v16  ;;  %vm2486_vm15 = vcmp.eq.f32.partialorder %v2485_v53, 8.507059e+37  ;;  %v1790_v4 = vadd.f32 %v5710_v15, %v5445_v44 }
 0x30f   : > { %v2676_v54 = vpop.permute.xlu1 %2675  ;;  %v2465_v50 = vmul.f32 %v4411_v61, %v2464_v63  ;;  %v1793_v53 = vadd.f32 %v5730_v35, %v5450_v29 }
 0x310   : > { %v5717_v41 = vadd.f32 %v2049_v20, %v1961_v9  ;;  %v2821_v12 = vmul.f32 %v2676_v54, %v5508_v32  ;;  %v5727_v32 = vpop.f32.mrf.mxu1 }
 0x311   : > { %v2466_v31 = vadd.f32 %v4411_v61, %v2465_v50  ;;  %3067 = vmatmul.f32.gmra.mxu1 %v2858_v40  ;;  %v1882_v35 = vadd.f32 %v5702_v1, %v1793_v53 }
 0x312   : > { %v4413_v14 = vpop.eup %4412  ;;  %v5722_v60 = vmax.f32 %v5717_v41, 1.0  ;;  %2939 = vmatmul.f32.gmra.mxu0 %v2821_v12  ;;  %v1794_v12 = vpop.f32.mrf.mxu0 }
 0x313   : > { %v2470_v19 = vsel %vm2469_vm10, %v4411_v61, %v2466_v31  ;;  %v2477_v39 = vmul.f32 %v4413_v14, %v5705_v0  ;;  %vm2482_vm12 = vweird.f32 %v4413_v14  ;;  %v2822_v61 = vmul.f32 %v2681_v25, %v5516_v46  ;;  %v2686_v46 = vpop.permute.xlu2 %2685 }
 0x314   : > { %4414 = vrcp.f32 %v5722_v60  ;;  %v2475_v3 = vsel %vm2472_vm11, %v2474_v5, %v2470_v19  ;;  %vm2483_vm14 = vmor %vm2481_vm13, %vm2482_vm12  ;;  %v2501_v50 = vand.u32 2147483648, %v5722_v60  ;;  %v2499_v28 = vand.u32 2147483647, %v5722_v60 }
 0x315   : > { %v1962_v36 = vpop.f32.mrf.mxu2  ;;  %2750 = vperm.xlu0 %4370, %v2475_v3   ;;  %v2478_v17 = vsub.f32 1.0, %v2477_v39  ;;  %v2823_v31 = vmul.f32 %v2686_v46, %v5524_v21  ;;  %vm2495_vm1 = vweird.f32 %v5722_v60  ;;  %v2859_v39 = vld [vmem:[%s4985_s14 + $0x48] sm:$0xff]  ;;  %v1879_v21 = vadd.f32 %v5679_v38, %v1790_v4 }
 0x316   : > { %v2051_v42 = vpop.f32.mrf.mxu3  ;;  %v1963_v43 = vadd.f32 %v1962_v36, %v1874_v62  ;;  %v2502_v19 = vor.u32 1.1754944e-38, %v2501_v50  ;;  %vm2500_vm3 = vcmp.eq.f32.partialorder %v2499_v28, 8.507059e+37 }
 0x317   : > { %v2479_v45 = vmul.f32 %v4413_v14, %v2478_v17 }
 0x318   : > { %v5737_v51 = vadd.f32 %v2051_v42, %v1963_v43  ;;  %v5747_v2 = vpop.f32.mrf.mxu1 }
 0x319   : > { %v2480_v33 = vadd.f32 %v4413_v14, %v2479_v45  ;;  %3070 = vmatmul.f32.gmra.mxu1 %v2859_v39  ;;  %v2861_v39 = vld [vmem:[%s4985_s14 + $0x58] sm:$0xff] }
 0x31a   : > { %v4415_v49 = vpop.eup %4414  ;;  %v5741_v52 = vmax.f32 %v5737_v51, 1.0  ;;  %2942 = vmatmul.f32.gmra.mxu0 %v2822_v61 }
 0x31b   : > { %v2484_v18 = vsel %vm2483_vm14, %v4413_v14, %v2480_v33  ;;  %v2491_v20 = vmul.f32 %v4415_v49, %v5722_v60  ;;  %vm2496_vm0 = vweird.f32 %v4415_v49 }
 0x31c   : > { %4416 = vrcp.f32 %v5741_v52  ;;  %v2489_v34 = vsel %vm2486_vm15, %v2488_v11, %v2484_v18  ;;  %vm2497_vm2 = vmor %vm2495_vm1, %vm2496_vm0  ;;  %v2515_v17 = vand.u32 2147483648, %v5741_v52  ;;  %v2513_v45 = vand.u32 2147483647, %v5741_v52  ;;  %v1797_v11 = vpop.f32.mrf.mxu0 }
 0x31d   : > { %v1965_v0 = vpop.f32.mrf.mxu2  ;;  %2755 = vperm.xlu1 %4371, %v2489_v34   ;;  %v2492_v9 = vsub.f32 1.0, %v2491_v20  ;;  %vm2509_vm5 = vweird.f32 %v5741_v52  ;;  %v2860_v20 = vld [vmem:[%s4985_s14 + $0x50] sm:$0xff] }
 0x31e   : > { %v2054_v63 = vpop.f32.mrf.mxu3  ;;  %v1966_v54 = vadd.f32 %v1965_v0, %v1877_v48  ;;  %v2516_v18 = vor.u32 1.1754944e-38, %v2515_v17  ;;  %vm2514_vm7 = vcmp.eq.f32.partialorder %v2513_v45, 8.507059e+37 }
 0x31f   : > { %v2493_v55 = vmul.f32 %v4415_v49, %v2492_v9 }
 0x320   : > { %v5754_v14 = vadd.f32 %v2054_v63, %v1966_v54  ;;  %v5768_v38 = vpop.f32.mrf.mxu1 }
 0x321   : > { %v2494_v25 = vadd.f32 %v4415_v49, %v2493_v55  ;;  %3073 = vmatmul.f32.gmra.mxu1 %v2860_v20  ;;  %v1795_v55 = vadd.f32 %v1794_v12, %v5453_v56 }
 0x322   : > { %v4417_v5 = vpop.eup %4416  ;;  %v5758_v37 = vmax.f32 %v5754_v14, 1.0  ;;  %2945 = vmatmul.f32.gmra.mxu0 %v2823_v31 }
 0x323   : > { %v2498_v62 = vsel %vm2497_vm2, %v4415_v49, %v2494_v25  ;;  %v2505_v44 = vmul.f32 %v4417_v5, %v5741_v52  ;;  %vm2510_vm4 = vweird.f32 %v4417_v5 }
 0x324   : > { %4418 = vrcp.f32 %v5758_v37  ;;  %v2503_v15 = vsel %vm2500_vm3, %v2502_v19, %v2498_v62  ;;  %vm2511_vm6 = vmor %vm2509_vm5, %vm2510_vm4  ;;  %v2529_v63 = vand.u32 2147483648, %v5758_v37  ;;  %v2527_v50 = vand.u32 2147483647, %v5758_v37  ;;  %v1799_v12 = vpop.f32.mrf.mxu0 }
 0x325   : > { %v1967_v3 = vpop.f32.mrf.mxu2  ;;  %2760 = vperm.xlu2 %4372, %v2503_v15   ;;  %v2506_v36 = vsub.f32 1.0, %v2505_v44  ;;  %vm2523_vm9 = vweird.f32 %v5758_v37  ;;  %v2701_v44 = vpop.permute.xlu2 %2700 }
 0x326   : > { %v2056_v60 = vpop.f32.mrf.mxu3  ;;  %v1968_v42 = vadd.f32 %v1967_v3, %v1879_v21  ;;  %v2530_v19 = vor.u32 1.1754944e-38, %v2529_v63  ;;  %vm2528_vm11 = vcmp.eq.f32.partialorder %v2527_v50, 8.507059e+37 }
 0x327   : > { %v2691_v43 = vpop.permute.xlu0 %2690  ;;  %v2507_v16 = vmul.f32 %v4417_v5, %v2506_v36 }
 0x328   : > { %v5770_v58 = vadd.f32 %v2056_v60, %v1968_v42  ;;  %v2824_v61 = vmul.f32 %v2691_v43, %v5534_v10  ;;  %v5788_v25 = vpop.f32.mrf.mxu1  ;;  %v6341_v43 = vld [vmem:[#allocation25_spill] sm:$0xff] }
 0x329   : > { %v2508_v33 = vadd.f32 %v4417_v5, %v2507_v16  ;;  %3076 = vmatmul.f32.gmra.mxu1 %v2861_v39  ;;  %v1798_v16 = vadd.f32 %v1797_v11, %v6341_v43  ;;  %v2863_v39 = vld [vmem:[%s4985_s14 + $0x68] sm:$0xff] }
 0x32a   : > { %v4419_v49 = vpop.eup %4418  ;;  %v5775_v40 = vmax.f32 %v5770_v58, 1.0  ;;  %2948 = vmatmul.f32.gmra.mxu0 %v2824_v61 }
 0x32b   : > { %v2512_v48 = vsel %vm2511_vm6, %v4417_v5, %v2508_v33  ;;  %v2519_v29 = vmul.f32 %v4419_v49, %v5758_v37  ;;  %vm2524_vm8 = vweird.f32 %v4419_v49 }
 0x32c   : > { %4420 = vrcp.f32 %v5775_v40  ;;  %v2517_v10 = vsel %vm2514_vm7, %v2516_v18, %v2512_v48  ;;  %vm2525_vm10 = vmor %vm2523_vm9, %vm2524_vm8  ;;  %v2543_v36 = vand.u32 2147483648, %v5775_v40  ;;  %v2541_v17 = vand.u32 2147483647, %v5775_v40  ;;  %v2862_v18 = vld [vmem:[%s4985_s14 + $0x60] sm:$0xff] }
 0x32d   : > { %v1970_v52 = vpop.f32.mrf.mxu2  ;;  %2765 = vperm.xlu0 %4370, %v2517_v10   ;;  %v2520_v34 = vsub.f32 1.0, %v2519_v29  ;;  %vm2537_vm13 = vweird.f32 %v5775_v40 }
 0x32e   : > { %v2059_v46 = vpop.f32.mrf.mxu3  ;;  %v1971_v0 = vadd.f32 %v1970_v52, %v1882_v35  ;;  %vm2542_vm15 = vcmp.eq.f32.partialorder %v2541_v17, 8.507059e+37  ;;  %v1802_v52 = vpop.f32.mrf.mxu0 }
 0x32f   : > { %v2696_v9 = vpop.permute.xlu1 %2695  ;;  %v2521_v54 = vmul.f32 %v4419_v49, %v2520_v34 }
 0x330   : > { %v5784_v28 = vadd.f32 %v2059_v46, %v1971_v0  ;;  %v2825_v1 = vmul.f32 %v2696_v9, %v5544_v27  ;;  %v1884_v27 = vadd.f32 %v5727_v32, %v1795_v55  ;;  %v2826_v32 = vmul.f32 %v2701_v44, %v5554_v23  ;;  %v5810_v11 = vpop.f32.mrf.mxu1 }
 0x331   : > { %v2522_v4 = vadd.f32 %v4419_v49, %v2521_v54  ;;  %3079 = vmatmul.f32.gmra.mxu1 %v2862_v18  ;;  %v1887_v23 = vadd.f32 %v5747_v2, %v1798_v16  ;;  %v6342_v2 = vld [vmem:[#allocation26_spill] sm:$0xff]  ;;  %v2864_v18 = vld [vmem:[%s4985_s14 + $0x70] sm:$0xff] }
 0x332   : > { %v4421_v31 = vpop.eup %4420  ;;  %v5791_v5 = vmax.f32 %v5784_v28, 1.0  ;;  %2951 = vmatmul.f32.gmra.mxu0 %v2825_v1  ;;  %v1800_v54 = vadd.f32 %v1799_v12, %v6342_v2 }
 0x333   : > { %v2526_v62 = vsel %vm2525_vm10, %v4419_v49, %v2522_v4  ;;  %v2533_v56 = vmul.f32 %v4421_v31, %v5775_v40  ;;  %vm2538_vm12 = vweird.f32 %v4421_v31  ;;  %v2544_v49 = vor.u32 1.1754944e-38, %v2543_v36 }
 0x334   : > { %4422 = vrcp.f32 %v5791_v5  ;;  %v2531_v37 = vsel %vm2528_vm11, %v2530_v19, %v2526_v62  ;;  %vm2539_vm14 = vmor %vm2537_vm13, %vm2538_vm12  ;;  %v2557_v34 = vand.u32 2147483648, %v5791_v5  ;;  %v2555_v9 = vand.u32 2147483647, %v5791_v5 }
 0x335   : > { %v1972_v21 = vpop.f32.mrf.mxu2  ;;  %2770 = vperm.xlu1 %4371, %v2531_v37   ;;  %v2534_v3 = vsub.f32 1.0, %v2533_v56  ;;  %vm2551_vm1 = vweird.f32 %v5791_v5 }
 0x336   : > { %v2061_v15 = vpop.f32.mrf.mxu3  ;;  %v1973_v60 = vadd.f32 %v1972_v21, %v1884_v27  ;;  %v2558_v19 = vor.u32 1.1754944e-38, %v2557_v34  ;;  %vm2556_vm3 = vcmp.eq.f32.partialorder %v2555_v9, 8.507059e+37  ;;  %v1889_v27 = vadd.f32 %v5768_v38, %v1800_v54  ;;  %v1804_v17 = vpop.f32.mrf.mxu0 }
 0x337   : > { %v2535_v42 = vmul.f32 %v4421_v31, %v2534_v3 }
 0x338   : > { %v5801_v45 = vadd.f32 %v2061_v15, %v1973_v60  ;;  %v5827_v37 = vpop.f32.mrf.mxu1 }
 0x339   : > { %v2536_v53 = vadd.f32 %v4421_v31, %v2535_v42  ;;  %3082 = vmatmul.f32.gmra.mxu1 %v2863_v39  ;;  %v6343_v42 = vld [vmem:[#allocation27_spill] sm:$0xff]  ;;  %v2865_v39 = vld [vmem:[%s4985_s14 + $0x78] sm:$0xff] }
 0x33a   : > { %v4423_v61 = vpop.eup %4422  ;;  %v5805_v33 = vmax.f32 %v5801_v45, 1.0  ;;  %2954 = vmatmul.f32.gmra.mxu0 %v2826_v32  ;;  %v1803_v38 = vadd.f32 %v1802_v52, %v6343_v42 }
 0x33b   : > { %v2540_v20 = vsel %vm2539_vm14, %v4421_v31, %v2536_v53  ;;  %v2547_v48 = vmul.f32 %v4423_v61, %v5791_v5  ;;  %vm2552_vm0 = vweird.f32 %v4423_v61 }
 0x33c   : > { %4424 = vrcp.f32 %v5805_v33  ;;  %v2545_v40 = vsel %vm2542_vm15, %v2544_v49, %v2540_v20  ;;  %vm2553_vm2 = vmor %vm2551_vm1, %vm2552_vm0  ;;  %v2571_v15 = vand.u32 2147483648, %v5805_v33  ;;  %v2569_v36 = vand.u32 2147483647, %v5805_v33 }
 0x33d   : > { %v1975_v29 = vpop.f32.mrf.mxu2  ;;  %2775 = vperm.xlu2 %4372, %v2545_v40   ;;  %v2548_v10 = vsub.f32 1.0, %v2547_v48  ;;  %vm2565_vm5 = vweird.f32 %v5805_v33  ;;  %v2716_v40 = vpop.permute.xlu2 %2715 }
 0x33e   : > { %v2064_v35 = vpop.f32.mrf.mxu3  ;;  %v1976_v46 = vadd.f32 %v1975_v29, %v1887_v23  ;;  %v2572_v49 = vor.u32 1.1754944e-38, %v2571_v15  ;;  %vm2570_vm7 = vcmp.eq.f32.partialorder %v2569_v36, 8.507059e+37  ;;  %v1892_v23 = vadd.f32 %v5788_v25, %v1803_v38 }
 0x33f   : > { %v2706_v0 = vpop.permute.xlu0 %2705  ;;  %v2549_v63 = vmul.f32 %v4423_v61, %v2548_v10  ;;  %v2829_v25 = vmul.f32 %v2716_v40, %v5584_v8 }
 0x340   : > { %v5816_v50 = vadd.f32 %v2064_v35, %v1976_v46  ;;  %v2827_v55 = vmul.f32 %v2706_v0, %v5562_v13  ;;  %v6344_v0 = vld [vmem:[#allocation28_spill] sm:$0xff]  ;;  %v5846_v9 = vpop.f32.mrf.mxu1 }
 0x341   : > { %v2550_v1 = vadd.f32 %v4423_v61, %v2549_v63  ;;  %3085 = vmatmul.f32.gmra.mxu1 %v2864_v18  ;;  %v1805_v63 = vadd.f32 %v1804_v17, %v6344_v0 }
 0x342   : > { %v4425_v4 = vpop.eup %4424  ;;  %v5821_v31 = vmax.f32 %v5816_v50, 1.0  ;;  %2957 = vmatmul.f32.gmra.mxu0 %v2827_v55 }
 0x343   : > { %v2554_v62 = vsel %vm2553_vm2, %v4423_v61, %v2550_v1  ;;  %v2561_v56 = vmul.f32 %v4425_v4, %v5805_v33  ;;  %vm2566_vm4 = vweird.f32 %v4425_v4  ;;  %v1807_v1 = vpop.f32.mrf.mxu0  ;;  %v1894_v8 = vadd.f32 %v5810_v11, %v1805_v63 }
 0x344   : > { %4426 = vrcp.f32 %v5821_v31  ;;  %v2559_v13 = vsel %vm2556_vm3, %v2558_v19, %v2554_v62  ;;  %vm2567_vm6 = vmor %vm2565_vm5, %vm2566_vm4  ;;  %v2585_v52 = vand.u32 2147483648, %v5821_v31  ;;  %v2583_v34 = vand.u32 2147483647, %v5821_v31 }
 0x345   : > { %v1977_v12 = vpop.f32.mrf.mxu2  ;;  %2780 = vperm.xlu0 %4370, %v2559_v13   ;;  %v2562_v44 = vsub.f32 1.0, %v2561_v56  ;;  %vm2579_vm9 = vweird.f32 %v5821_v31 }
 0x346   : > { %v2066_v5 = vpop.f32.mrf.mxu3  ;;  %v1978_v21 = vadd.f32 %v1977_v12, %v1889_v27  ;;  %v2586_v19 = vor.u32 1.1754944e-38, %v2585_v52  ;;  %vm2584_vm11 = vcmp.eq.f32.partialorder %v2583_v34, 8.507059e+37 }
 0x347   : > { %v2711_v3 = vpop.permute.xlu1 %2710  ;;  %v2563_v60 = vmul.f32 %v4425_v4, %v2562_v44 }
 0x348   : > { %v5832_v43 = vadd.f32 %v2066_v5, %v1978_v21  ;;  %v2828_v16 = vmul.f32 %v2711_v3, %v5574_v30  ;;  %v5865_v38 = vpop.f32.mrf.mxu1 }
 0x349   : > { %v2564_v32 = vadd.f32 %v4425_v4, %v2563_v60  ;;  %3088 = vmatmul.f32.gmra.mxu1 %v2865_v39  ;;  %v6345_v60 = vld [vmem:[#allocation29_spill] sm:$0xff] }
 0x34a   : > { %v4427_v53 = vpop.eup %4426  ;;  %v5837_v61 = vmax.f32 %v5832_v43, 1.0  ;;  %2960 = vmatmul.f32.gmra.mxu0 %v2828_v16  ;;  %v1808_v36 = vadd.f32 %v1807_v1, %v6345_v60 }
 0x34b   : > { %v2568_v20 = vsel %vm2567_vm6, %v4425_v4, %v2564_v32  ;;  %v2575_v48 = vmul.f32 %v4427_v53, %v5821_v31  ;;  %vm2580_vm8 = vweird.f32 %v4427_v53 }
 0x34c   : > { %4428 = vrcp.f32 %v5837_v61  ;;  %v2573_v30 = vsel %vm2570_vm7, %v2572_v49, %v2568_v20  ;;  %vm2581_vm10 = vmor %vm2579_vm9, %vm2580_vm8  ;;  %v2599_v44 = vand.u32 2147483648, %v5837_v61  ;;  %v2597_v3 = vand.u32 2147483647, %v5837_v61  ;;  %v2866_v49 = vld [vmem:[%s4985_s14 + $0x80] sm:$0xff] }
 0x34d   : > { %v1980_v33 = vpop.f32.mrf.mxu2  ;;  %2785 = vperm.xlu1 %4371, %v2573_v30   ;;  %v2576_v35 = vsub.f32 1.0, %v2575_v48  ;;  %vm2593_vm13 = vweird.f32 %v5837_v61  ;;  %v1809_v48 = vpop.f32.mrf.mxu0 }
 0x34e   : > { %v2069_v29 = vpop.f32.mrf.mxu3  ;;  %v1981_v10 = vadd.f32 %v1980_v33, %v1892_v23  ;;  %vm2598_vm15 = vcmp.eq.f32.partialorder %v2597_v3, 8.507059e+37 }
 0x34f   : > { %v2577_v46 = vmul.f32 %v4427_v53, %v2576_v35 }
 0x350   : > { %v5849_v2 = vadd.f32 %v2069_v29, %v1981_v10 }
 0x351   : > { %v2578_v54 = vadd.f32 %v4427_v53, %v2577_v46  ;;  %3091 = vmatmul.f32.gmra.mxu1 %v2866_v49  ;;  %v6346_v46 = vld [vmem:[#allocation30_spill] sm:$0xff] }
 0x352   : > { %v4429_v55 = vpop.eup %4428  ;;  %v5853_v4 = vmax.f32 %v5849_v2, 1.0  ;;  %2963 = vmatmul.f32.gmra.mxu0 %v2829_v25  ;;  %v1810_v34 = vadd.f32 %v1809_v48, %v6346_v46 }
 0x353   : > { %v2582_v62 = vsel %vm2581_vm10, %v4427_v53, %v2578_v54  ;;  %v2589_v56 = vmul.f32 %v4429_v55, %v5837_v61  ;;  %vm2594_vm12 = vweird.f32 %v4429_v55  ;;  %v2600_v53 = vor.u32 1.1754944e-38, %v2599_v44 }
 0x354   : > { %4430 = vrcp.f32 %v5853_v4  ;;  %v2587_v27 = vsel %vm2584_vm11, %v2586_v19, %v2582_v62  ;;  %vm2595_vm14 = vmor %vm2593_vm13, %vm2594_vm12  ;;  %v2613_v29 = vand.u32 2147483648, %v5853_v4  ;;  %v2611_v52 = vand.u32 2147483647, %v5853_v4  ;;  %v2867_v19 = vld [vmem:[%s4985_s14 + $0x88] sm:$0xff] }
 0x355   : > { %v1982_v31 = vpop.f32.mrf.mxu2  ;;  %2790 = vperm.xlu2 %4372, %v2587_v27   ;;  %v2590_v12 = vsub.f32 1.0, %v2589_v56  ;;  %v5881_v63 = vpop.f32.mrf.mxu1  ;;  %vm2607_vm1 = vweird.f32 %v5853_v4  ;;  %v1899_v56 = vadd.f32 %v5846_v9, %v1810_v34 }
 0x356   : > { %v2071_v13 = vpop.f32.mrf.mxu3  ;;  %v1983_v5 = vadd.f32 %v1982_v31, %v1894_v8  ;;  %v2614_v1 = vor.u32 1.1754944e-38, %v2613_v29  ;;  %vm2612_vm3 = vcmp.eq.f32.partialorder %v2611_v52, 8.507059e+37  ;;  %v2731_v8 = vpop.permute.xlu2 %2730 }
 0x357   : > { %v2721_v21 = vpop.permute.xlu0 %2720  ;;  %v2591_v15 = vmul.f32 %v4429_v55, %v2590_v12 }
 0x358   : > { %v5862_v42 = vadd.f32 %v2071_v13, %v1983_v5  ;;  %v2830_v11 = vmul.f32 %v2721_v21, %v5599_v24  ;;  %v1897_v24 = vadd.f32 %v5827_v37, %v1808_v36  ;;  %v2832_v21 = vmul.f32 %v2731_v8, %v5622_v57 }
 0x359   : > { %v2592_v17 = vadd.f32 %v4429_v55, %v2591_v15  ;;  %3094 = vmatmul.f32.gmra.mxu1 %v2867_v19 }
 0x35a   : > { %v4431_v16 = vpop.eup %4430  ;;  %v5869_v32 = vmax.f32 %v5862_v42, 1.0  ;;  %2966 = vmatmul.f32.gmra.mxu0 %v2830_v11 }
 0x35b   : > { %v2596_v18 = vsel %vm2595_vm14, %v4429_v55, %v2592_v17  ;;  %v2603_v20 = vmul.f32 %v4431_v16, %v5853_v4  ;;  %vm2608_vm0 = vweird.f32 %v4431_v16  ;;  %v2868_v17 = vld [vmem:[%s4985_s14 + $0x90] sm:$0xff] }
 0x35c   : > { %4432 = vrcp.f32 %v5869_v32  ;;  %v2601_v23 = vsel %vm2598_vm15, %v2600_v53, %v2596_v18  ;;  %vm2609_vm2 = vmor %vm2607_vm1, %vm2608_vm0  ;;  %v2627_v13 = vand.u32 2147483648, %v5869_v32  ;;  %v2625_v44 = vand.u32 2147483647, %v5869_v32 }
 0x35d   : > { %v1985_v61 = vpop.f32.mrf.mxu2  ;;  %2795 = vperm.xlu0 %4370, %v2601_v23   ;;  %v2604_v30 = vsub.f32 1.0, %v2603_v20  ;;  %vm2621_vm5 = vweird.f32 %v5869_v32 }
 0x35e   : > { %v2074_v40 = vpop.f32.mrf.mxu3  ;;  %v1986_v33 = vadd.f32 %v1985_v61, %v1897_v24  ;;  %v5893_v9 = vpop.f32.mrf.mxu1  ;;  %v2628_v11 = vor.u32 1.1754944e-38, %v2627_v13  ;;  %vm2626_vm7 = vcmp.eq.f32.partialorder %v2625_v44, 8.507059e+37  ;;  %v2872_v44 = vld [vmem:[%s4985_s14 + $0xb0] sm:$0xff] }
 0x35f   : > { %v2726_v35 = vpop.permute.xlu1 %2725  ;;  %v2605_v10 = vmul.f32 %v4431_v16, %v2604_v30 }
 0x360   : > { %v5878_v37 = vadd.f32 %v2074_v40, %v1986_v33  ;;  %v2831_v0 = vmul.f32 %v2726_v35, %v5610_v6  ;;  %v2869_v33 = vld [vmem:[%s4985_s14 + $0x98] sm:$0xff] }
 0x361   : > { %v2606_v25 = vadd.f32 %v4431_v16, %v2605_v10  ;;  %3097 = vmatmul.f32.gmra.mxu1 %v2868_v17  ;;  %v2873_v17 = vld [vmem:[%s4985_s14 + $0xb8] sm:$0xff] }
 0x362   : > { %v4433_v54 = vpop.eup %4432  ;;  %v2208_v55 = vmax.f32 %v5878_v37, 1.0  ;;  %2969 = vmatmul.f32.gmra.mxu0 %v2831_v0 }
 0x363   : > { %v2610_v39 = vsel %vm2609_vm2, %v4431_v16, %v2606_v25  ;;  %v2617_v62 = vmul.f32 %v4433_v54, %v5869_v32  ;;  %vm2622_vm4 = vweird.f32 %v4433_v54 }
 0x364   : > { %4434 = vrcp.f32 %v2208_v55  ;;  %v2615_v6 = vsel %vm2612_vm3, %v2614_v1, %v2610_v39  ;;  %vm2623_vm6 = vmor %vm2621_vm5, %vm2622_vm4  ;;  %v2641_v18 = vand.u32 2147483648, %v2208_v55  ;;  %v2639_v32 = vand.u32 2147483647, %v2208_v55  ;;  %v2870_v39 = vld [vmem:[%s4985_s14 + $0xa0] sm:$0xff] }
 0x365   : > { %v1987_v27 = vpop.f32.mrf.mxu2  ;;  %2800 = vperm.xlu1 %4371, %v2615_v6   ;;  %v2618_v4 = vsub.f32 1.0, %v2617_v62  ;;  %vm2635_vm9 = vweird.f32 %v2208_v55 }
 0x366   : > { %v1988_v31 = vadd.f32 %v1987_v27, %v1899_v56  ;;  %v2076_v12 = vpop.f32.mrf.mxu3  ;;  %v3053_v23 = vpop.f32.mrf.mxu1  ;;  %v2642_v30 = vor.u32 1.1754944e-38, %v2641_v18  ;;  %vm2640_vm11 = vcmp.eq.f32.partialorder %v2639_v32, 8.507059e+37  ;;  %v2874_v32 = vld [vmem:[%s4985_s14 + $0xc0] sm:$0xff] }
 0x367   : > { %v2619_v5 = vmul.f32 %v4433_v54, %v2618_v4  ;;  %v2746_v6 = vpop.permute.xlu2 %2745 }
 0x368   : > { %v5891_v15 = vadd.f32 %v2076_v12, %v1988_v31  ;;  %v2835_v27 = vmul.f32 %v2746_v6, %v5664_v47 }
 0x369   : > { %v2620_v3 = vadd.f32 %v4433_v54, %v2619_v5  ;;  %3100 = vmatmul.f32.gmra.mxu1 %v2869_v33 }
 0x36a   : > { %v4435_v60 = vpop.eup %4434  ;;  %v2209_v36 = vmax.f32 %v5891_v15, 1.0  ;;  %2972 = vmatmul.f32.gmra.mxu0 %v2832_v21 }
 0x36b   : > { %v2624_v16 = vsel %vm2623_vm6, %v4433_v54, %v2620_v3  ;;  %v2631_v53 = vmul.f32 %v4435_v60, %v2208_v55  ;;  %vm2636_vm8 = vweird.f32 %v4435_v60  ;;  %v5910_v3 = vld [vmem:[%s6242_s6] ss:$0 sm:$0xff] }
 0x36c   : > { %4436 = vrcp.f32 %v2209_v36  ;;  %v2629_v57 = vsel %vm2626_vm7, %v2628_v11, %v2624_v16  ;;  %vm2637_vm10 = vmor %vm2635_vm9, %vm2636_vm8  ;;  %v2655_v46 = vand.u32 2147483648, %v2209_v36  ;;  %v2653_v25 = vand.u32 2147483647, %v2209_v36 }
 0x36d   : > { %2805 = vperm.xlu2 %4372, %v2629_v57   ;;  %v2632_v49 = vsub.f32 1.0, %v2631_v53  ;;  %vm2649_vm13 = vweird.f32 %v2209_v36 }
 0x36e   : > { %v3056_v55 = vpop.f32.mrf.mxu1  ;;  %v2656_v19 = vor.u32 1.1754944e-38, %v2655_v46  ;;  %vm2654_vm15 = vcmp.eq.f32.partialorder %v2653_v25, 8.507059e+37 }
 0x36f   : > { %v2736_v20 = vpop.permute.xlu0 %2735  ;;  %v2633_v24 = vmul.f32 %v4435_v60, %v2632_v49 }
 0x370   : > { %v2833_v48 = vmul.f32 %v2736_v20, %v5633_v26 }
 0x371   : > { %v2634_v61 = vadd.f32 %v4435_v60, %v2633_v24  ;;  %3103 = vmatmul.f32.gmra.mxu1 %v2870_v39 }
 0x372   : > { %v4437_v40 = vpop.eup %4436  ;;  %2975 = vmatmul.f32.gmra.mxu0 %v2833_v48 }
 0x373   : > { %v2638_v29 = vsel %vm2637_vm10, %v4435_v60, %v2634_v61  ;;  %v2645_v35 = vmul.f32 %v4437_v40, %v2209_v36  ;;  %vm2650_vm12 = vweird.f32 %v4437_v40 }
 0x374   : > { %v2643_v10 = vsel %vm2640_vm11, %v2642_v30, %v2638_v29  ;;  %vm2651_vm14 = vmor %vm2649_vm13, %vm2650_vm12 }
 0x375   : > { %2810 = vperm.xlu0 %4370, %v2643_v10   ;;  %v2646_v52 = vsub.f32 1.0, %v2645_v35 }
 0x376   : > { %v3059_v4 = vpop.f32.mrf.mxu1 }
 0x377   : > { %v2741_v34 = vpop.permute.xlu1 %2740  ;;  %v2931_v0 = vpop.f32.mrf.mxu0  ;;  %v2647_v26 = vmul.f32 %v4437_v40, %v2646_v52  ;;  %v2875_v52 = vld [vmem:[%s4985_s14 + $0xc8] sm:$0xff] }
 0x378   : > { %v2834_v54 = vmul.f32 %v2741_v34, %v5647_v7  ;;  %v2871_v7 = vld [vmem:[%s4985_s14 + $0xa8] sm:$0xff]  ;;  %v3045_v21 = vadd.f32 %v5865_v38, %v2931_v0 }
 0x379   : > { %v2648_v1 = vadd.f32 %v4437_v40, %v2647_v26  ;;  %3106 = vmatmul.f32.gmra.mxu1 %v2871_v7 }
 0x37a   : > { %2978 = vmatmul.f32.gmra.mxu0 %v2834_v54  ;;  %v5914_v11 = vadd.f32 %v5910_v3, %v3045_v21  ;;  %v2878_v21 = vld [vmem:[%s4985_s14 + $0xe0] sm:$0xff] }
 0x37b   : > { %v2652_v62 = vsel %vm2651_vm14, %v4437_v40, %v2648_v1 }
 0x37c   : > { %v2657_v56 = vsel %vm2654_vm15, %v2656_v19, %v2652_v62  ;;  %v3176_v38 = vmul.f32 %v5914_v11, %v5914_v11  ;;  %v2876_v19 = vld [vmem:[%s4985_s14 + $0xd0] sm:$0xff] }
 0x37d   : > { %2815 = vperm.xlu1 %4371, %v2657_v56  }
 0x37e   : > { %v3062_v5 = vpop.f32.mrf.mxu1 }
 0x37f   : > { %v2934_v8 = vpop.f32.mrf.mxu0  ;;  %v2761_v53 = vpop.permute.xlu2 %2760 }
 0x380   : > { %v3048_v57 = vadd.f32 %v5881_v63, %v2934_v8  ;;  %v2838_v18 = vmul.f32 %v2761_v53, %v5717_v41 }
 0x381   : > { %3109 = vmatmul.f32.gmra.mxu1 %v2872_v44 }
 0x382   : > { %2981 = vmatmul.f32.gmra.mxu0 %v2835_v27  ;;  %v5925_v24 = vadd.f32 %v5910_v3, %v3048_v57 }
 0x384   : > { %v3177_v41 = vmul.f32 %v5925_v24, %v5925_v24 }
 0x387   : > { %v2937_v31 = vpop.f32.mrf.mxu0  ;;  %v2751_v13 = vpop.permute.xlu0 %2750 }
 0x388   : > { %v2836_v12 = vmul.f32 %v2751_v13, %v5681_v22  ;;  %v3065_v22 = vpop.f32.mrf.mxu1  ;;  %v3051_v63 = vadd.f32 %v5893_v9, %v2937_v31 }
 0x389   : > { %3112 = vmatmul.f32.gmra.mxu1 %v2873_v17 }
 0x38a   : > { %2984 = vmatmul.f32.gmra.mxu0 %v2836_v12  ;;  %v5938_v10 = vadd.f32 %v5910_v3, %v3051_v63 }
 0x38c   : > { %v3178_v34 = vmul.f32 %v5938_v10, %v5938_v10 }
 0x38f   : > { %v2756_v47 = vpop.permute.xlu1 %2755  ;;  %v2940_v60 = vpop.f32.mrf.mxu0 }
 0x390   : > { %v2837_v36 = vmul.f32 %v2756_v47, %v5698_v59  ;;  %v3054_v16 = vadd.f32 %v3053_v23, %v2940_v60  ;;  %v3068_v20 = vpop.f32.mrf.mxu1 }
 0x391   : > { %3115 = vmatmul.f32.gmra.mxu1 %v2874_v32 }
 0x392   : > { %2987 = vmatmul.f32.gmra.mxu0 %v2837_v36  ;;  %v5922_v59 = vadd.f32 %v5910_v3, %v3054_v16 }
 0x394   : > { %v3179_v23 = vmul.f32 %v5922_v59, %v5922_v59 }
 0x396   : > { %3208 = vadd.xlane.f32.xlu2 %v3176_v38  ;;  %v2879_v38 = vld [vmem:[%s4985_s14 + $0xe8] sm:$0xff] }
 0x397   : > { %v2943_v49 = vpop.f32.mrf.mxu0  ;;  %v2776_v62 = vpop.permute.xlu2 %2775 }
 0x398   : > { %v3057_v48 = vadd.f32 %v3056_v55, %v2943_v49  ;;  %v3071_v35 = vpop.f32.mrf.mxu1  ;;  %v2841_v6 = vmul.f32 %v2776_v62, %v5770_v58 }
 0x399   : > { %3118 = vmatmul.f32.gmra.mxu1 %v2875_v52 }
 0x39a   : > { %2990 = vmatmul.f32.gmra.mxu0 %v2838_v18  ;;  %v5935_v29 = vadd.f32 %v5910_v3, %v3057_v48  ;;  %v2880_v48 = vld [vmem:[%s4985_s14 + $0xf0] sm:$0xff] }
 0x39c   : > { %v3180_v46 = vmul.f32 %v5935_v29, %v5935_v29 }
 0x39e   : > { %3214 = vadd.xlane.f32.xlu2 %v3179_v23 }
 0x39f   : > { %v2946_v61 = vpop.f32.mrf.mxu0  ;;  %3210 = vadd.xlane.f32.xlu0 %v3177_v41  ;;  %v2766_v40 = vpop.permute.xlu0 %2765 }
 0x3a0   : > { %v3060_v30 = vadd.f32 %v3059_v4, %v2946_v61  ;;  %v2839_v33 = vmul.f32 %v2766_v40, %v5737_v51  ;;  %v3074_v55 = vpop.f32.mrf.mxu1  ;;  %v2877_v4 = vld [vmem:[%s4985_s14 + $0xd8] sm:$0xff] }
 0x3a1   : > { %3121 = vmatmul.f32.gmra.mxu1 %v2876_v19 }
 0x3a2   : > { %2993 = vmatmul.f32.gmra.mxu0 %v2839_v33  ;;  %v5941_v9 = vadd.f32 %v5910_v3, %v3060_v30  ;;  %v2881_v33 = vld [vmem:[%s4985_s14 + $0xf8] sm:$0xff] }
 0x3a4   : > { %v3181_v51 = vmul.f32 %v5941_v9, %v5941_v9 }
 0x3a6   : > { %3216 = vadd.xlane.f32.xlu2 %v3180_v46 }
 0x3a7   : > { %v2771_v0 = vpop.permute.xlu1 %2770  ;;  %3212 = vadd.xlane.f32.xlu1 %v3178_v34  ;;  %v2949_v26 = vpop.f32.mrf.mxu0  ;;  %3218 = vadd.xlane.f32.xlu0 %v3181_v51 }
 0x3a8   : > { %v2840_v25 = vmul.f32 %v2771_v0, %v5754_v14  ;;  %v3063_v54 = vadd.f32 %v3062_v5, %v2949_v26  ;;  %v3077_v14 = vpop.f32.mrf.mxu1 }
 0x3a9   : > { %3124 = vmatmul.f32.gmra.mxu1 %v2877_v4 }
 0x3aa   : > { %2996 = vmatmul.f32.gmra.mxu0 %v2840_v25  ;;  %v5952_v1 = vadd.f32 %v5910_v3, %v3063_v54 }
 0x3ac   : > { %v3182_v39 = vmul.f32 %v5952_v1, %v5952_v1 }
 0x3af   : > { %3220 = vadd.xlane.f32.xlu1 %v3182_v39  ;;  %v2952_v56 = vpop.f32.mrf.mxu0  ;;  %v2791_v57 = vpop.permute.xlu2 %2790 }
 0x3b0   : > { %v3066_v8 = vadd.f32 %v3065_v22, %v2952_v56  ;;  %v3080_v58 = vpop.f32.mrf.mxu1  ;;  %v2844_v18 = vmul.f32 %v2791_v57, %v5816_v50 }
 0x3b1   : > { %3127 = vmatmul.f32.gmra.mxu1 %v2878_v21 }
 0x3b2   : > { %2999 = vmatmul.f32.gmra.mxu0 %v2841_v6  ;;  %v5959_v27 = vadd.f32 %v5910_v3, %v3066_v8 }
 0x3b4   : > { %v3183_v7 = vmul.f32 %v5959_v27, %v5959_v27 }
 0x3b6   : > { %3222 = vadd.xlane.f32.xlu2 %v3183_v7 }
 0x3b7   : > { %v2955_v31 = vpop.f32.mrf.mxu0  ;;  %v2781_v13 = vpop.permute.xlu0 %2780 }
 0x3b8   : > { %v3069_v12 = vadd.f32 %v3068_v20, %v2955_v31  ;;  %v2842_v5 = vmul.f32 %v2781_v13, %v5784_v28  ;;  %v3083_v16 = vpop.f32.mrf.mxu1 }
 0x3b9   : > { %3130 = vmatmul.f32.gmra.mxu1 %v2879_v38 }
 0x3ba   : > { %v5966_v44 = vadd.f32 %v5910_v3, %v3069_v12  ;;  %3002 = vmatmul.f32.gmra.mxu0 %v2842_v5 }
 0x3bc   : > { %v3184_v47 = vmul.f32 %v5966_v44, %v5966_v44 }
 0x3be   : > { %3224 = vadd.xlane.f32.xlu0 %v3184_v47 }
 0x3bf   : > { %v2786_v60 = vpop.permute.xlu1 %2785  ;;  %v2958_v36 = vpop.f32.mrf.mxu0 }
 0x3c0   : > { %v2843_v22 = vmul.f32 %v2786_v60, %v5801_v45  ;;  %v3072_v17 = vadd.f32 %v3071_v35, %v2958_v36  ;;  %v3086_v45 = vpop.f32.mrf.mxu1 }
 0x3c1   : > { %3133 = vmatmul.f32.gmra.mxu1 %v2880_v48 }
 0x3c2   : > { %v5973_v28 = vadd.f32 %v5910_v3, %v3072_v17  ;;  %3005 = vmatmul.f32.gmra.mxu0 %v2843_v22 }
 0x3c4   : > { %v3185_v53 = vmul.f32 %v5973_v28, %v5973_v28 }
 0x3c6   : > { %3226 = vadd.xlane.f32.xlu1 %v3185_v53 }
 0x3c7   : > { %v2961_v49 = vpop.f32.mrf.mxu0  ;;  %v2806_v25 = vpop.permute.xlu2 %2805 }
 0x3c8   : > { %v3075_v20 = vadd.f32 %v3074_v55, %v2961_v49  ;;  %v3089_v30 = vpop.f32.mrf.mxu1  ;;  %v2847_v55 = vmul.f32 %v2806_v25, %v5862_v42 }
 0x3c9   : > { %3136 = vmatmul.f32.gmra.mxu1 %v2881_v33 }
 0x3ca   : > { %v5980_v32 = vadd.f32 %v5910_v3, %v3075_v20  ;;  %3008 = vmatmul.f32.gmra.mxu0 %v2844_v18 }
 0x3cc   : > { %v3186_v23 = vmul.f32 %v5980_v32, %v5980_v32 }
 0x3ce   : > { %3228 = vadd.xlane.f32.xlu2 %v3186_v23 }
 0x3cf   : > { %v2964_v63 = vpop.f32.mrf.mxu0  ;;  %v2796_v41 = vpop.permute.xlu0 %2795 }
 0x3d0   : > { %v3078_v61 = vadd.f32 %v3077_v14, %v2964_v63  ;;  %v2845_v40 = vmul.f32 %v2796_v41, %v5832_v43  ;;  %v3092_v0 = vpop.f32.mrf.mxu1 }
 0x3d2   : > { %v5987_v50 = vadd.f32 %v5910_v3, %v3078_v61  ;;  %3011 = vmatmul.f32.gmra.mxu0 %v2845_v40 }
 0x3d4   : > { %v3187_v35 = vmul.f32 %v5987_v50, %v5987_v50 }
 0x3d6   : > { %3230 = vadd.xlane.f32.xlu0 %v3187_v35 }
 0x3d7   : > { %v2801_v52 = vpop.permute.xlu1 %2800  ;;  %v2967_v46 = vpop.f32.mrf.mxu0 }
 0x3d8   : > { %v2846_v51 = vmul.f32 %v2801_v52, %v5849_v2  ;;  %v3081_v34 = vadd.f32 %v3080_v58, %v2967_v46  ;;  %v3095_v39 = vpop.f32.mrf.mxu1 }
 0x3da   : > { %v5994_v26 = vadd.f32 %v5910_v3, %v3081_v34  ;;  %3014 = vmatmul.f32.gmra.mxu0 %v2846_v51 }
 0x3dc   : > { %v3188_v43 = vmul.f32 %v5994_v26, %v5994_v26 }
 0x3de   : > { %3232 = vadd.xlane.f32.xlu1 %v3188_v43 }
 0x3df   : > { %v2970_v54 = vpop.f32.mrf.mxu0 }
 0x3e0   : > { %v3084_v19 = vadd.f32 %v3083_v16, %v2970_v54  ;;  %v3098_v42 = vpop.f32.mrf.mxu1 }
 0x3e2   : > { %v6000_v62 = vadd.f32 %v5910_v3, %v3084_v19  ;;  %3017 = vmatmul.f32.gmra.mxu0 %v2847_v55 }
 0x3e4   : > { %v3189_v2 = vmul.f32 %v6000_v62, %v6000_v62 }
 0x3e6   : > { %3234 = vadd.xlane.f32.xlu2 %v3189_v2 }
 0x3e7   : > { %v2973_v56 = vpop.f32.mrf.mxu0  ;;  %v2811_v6 = vpop.permute.xlu0 %2810 }
 0x3e8   : > { %v3087_v8 = vadd.f32 %v3086_v45, %v2973_v56  ;;  %v2848_v14 = vmul.f32 %v2811_v6, %v5878_v37  ;;  %v3101_v21 = vpop.f32.mrf.mxu1 }
 0x3ea   : > { %v6006_v4 = vadd.f32 %v5910_v3, %v3087_v8  ;;  %3020 = vmatmul.f32.gmra.mxu0 %v2848_v14 }
 0x3ec   : > { %v3190_v7 = vmul.f32 %v6006_v4, %v6006_v4 }
 0x3ee   : > { %3236 = vadd.xlane.f32.xlu0 %v3190_v7 }
 0x3ef   : > { %v2816_v31 = vpop.permute.xlu1 %2815  ;;  %v2976_v13 = vpop.f32.mrf.mxu0 }
 0x3f0   : > { %v2849_v12 = vmul.f32 %v2816_v31, %v5891_v15  ;;  %v3090_v5 = vadd.f32 %v3089_v30, %v2976_v13  ;;  %v3104_v17 = vpop.f32.mrf.mxu1 }
 0x3f2   : > { %v6012_v58 = vadd.f32 %v5910_v3, %v3090_v5  ;;  %3023 = vmatmul.f32.gmra.mxu0 %v2849_v12 }
 0x3f4   : > { %v3191_v37 = vmul.f32 %v6012_v58, %v6012_v58 }
 0x3f6   : > { %3238 = vadd.xlane.f32.xlu1 %v3191_v37 }
 0x3f7   : > { %v2979_v47 = vpop.f32.mrf.mxu0 }
 0x3f8   : > { %v3093_v60 = vadd.f32 %v3092_v0, %v2979_v47  ;;  %v3107_v20 = vpop.f32.mrf.mxu1 }
 0x3fa   : > { %v6017_v36 = vadd.f32 %v5910_v3, %v3093_v60 }
 0x3fc   : > { %v3192_v22 = vmul.f32 %v6017_v36, %v6017_v36 }
 0x3fe   : > { %3240 = vadd.xlane.f32.xlu2 %v3192_v22 }
 0x3ff   : > { %v2982_v15 = vpop.f32.mrf.mxu0 }
 0x400   : > { %v3096_v16 = vadd.f32 %v3095_v39, %v2982_v15  ;;  %v6034_v51 = vpop.f32.mrf.mxu1 }
 0x402   : > { %v6022_v38 = vadd.f32 %v5910_v3, %v3096_v16 }
 0x404   : > { %v3193_v53 = vmul.f32 %v6022_v38, %v6022_v38 }
 0x406   : > { %3242 = vadd.xlane.f32.xlu0 %v3193_v53 }
 0x407   : > { %v2985_v57 = vpop.f32.mrf.mxu0 }
 0x408   : > { %v3099_v49 = vadd.f32 %v3098_v42, %v2985_v57  ;;  %v6047_v37 = vpop.f32.mrf.mxu1 }
 0x409   : > { %v3209_v18 = vpop.xlane.xlu2 %3208 }
 0x40a   : > { %v6027_v45 = vadd.f32 %v5910_v3, %v3099_v49  ;;  %v3272_v48 = vmax.f32 %v3209_v18, 1e-24 }
 0x40c   : > { %4438 = vrsqrt.f32 %v3272_v48  ;;  %v3194_v23 = vmul.f32 %v6027_v45, %v6027_v45  ;;  %vm3310_vm1 = vweird.f32 %v3272_v48 }
 0x40e   : > { %3244 = vadd.xlane.f32.xlu1 %v3194_v23 }
 0x40f   : > { %v2988_v63 = vpop.f32.mrf.mxu0 }
 0x410   : > { %v3102_v41 = vadd.f32 %v3101_v21, %v2988_v63 }
 0x411   : > { %v3215_v61 = vpop.xlane.xlu2 %3214 }
 0x412   : > { %v4439_v40 = vpop.eup %4438  ;;  %v6032_v30 = vadd.f32 %v5910_v3, %v3102_v41  ;;  %v3275_v33 = vmax.f32 %v3215_v61, 1e-24  ;;  %v3211_v35 = vpop.xlane.xlu0 %3210 }
 0x413   : > { %v3305_v52 = vmul.f32 %v4439_v40, %v3272_v48  ;;  %v3273_v46 = vmax.f32 %v3211_v35, 1e-24  ;;  %vm3311_vm0 = vweird.f32 %v4439_v40 }
 0x414   : > { %4440 = vrsqrt.f32 %v3275_v33  ;;  %v3195_v34 = vmul.f32 %v6032_v30, %v6032_v30  ;;  %vm3312_vm2 = vmor %vm3310_vm1, %vm3311_vm0  ;;  %vm3340_vm5 = vweird.f32 %v3275_v33 }
 0x415   : > { %v3306_v0 = vmul.f32 %v4439_v40, %v3305_v52  ;;  %4442 = vrsqrt.f32 %v3273_v46  ;;  %vm3320_vm7 = vweird.f32 %v3273_v46 }
 0x416   : > { %3246 = vadd.xlane.f32.xlu2 %v3195_v34 }
 0x417   : > { %v3307_v43 = vmul.f32 0.5, %v3306_v0  ;;  %v2991_v25 = vpop.f32.mrf.mxu0 }
 0x418   : > { %v3105_v54 = vadd.f32 %v3104_v17, %v2991_v25 }
 0x419   : > { %v3308_v55 = vsub.f32 1.5, %v3307_v43  ;;  %v3217_v19 = vpop.xlane.xlu2 %3216 }
 0x41a   : > { %v4441_v39 = vpop.eup %4440  ;;  %v6039_v2 = vadd.f32 %v5910_v3, %v3105_v54  ;;  %v6041_v56 = vmax.f32 %v3217_v19, 1e-24  ;;  %v3213_v6 = vpop.xlane.xlu1 %3212 }
 0x41b   : > { %v4443_v8 = vpop.eup %4442  ;;  %v3309_v14 = vmul.f32 %v4439_v40, %v3308_v55  ;;  %v3335_v42 = vmul.f32 %v4441_v39, %v3275_v33  ;;  %v6043_v7 = vmax.f32 %v3213_v6, 1e-24  ;;  %v3219_v31 = vpop.xlane.xlu0 %3218  ;;  %vm3341_vm3 = vweird.f32 %v4441_v39 }
 0x41c   : > { %v3315_v13 = vmul.f32 %v4443_v8, %v3273_v46  ;;  %4444 = vrsqrt.f32 %v6041_v56  ;;  %v6050_v60 = vmax.f32 %v3219_v31, 1e-24  ;;  %v3196_v22 = vmul.f32 %v6039_v2, %v6039_v2  ;;  %vm3342_vm6 = vmor %vm3340_vm5, %vm3341_vm3  ;;  %v6072_v6 = vpop.f32.mrf.mxu1 }
 0x41d   : > { %v3313_v12 = vsel %vm3312_vm2, %v4439_v40, %v3309_v14  ;;  %v3336_v5 = vmul.f32 %v4441_v39, %v3335_v42  ;;  %4446 = vrsqrt.f32 %v6043_v7  ;;  %vm3321_vm4 = vweird.f32 %v4443_v8 }
 0x41e   : > { %v3624_v21 = vmul.f32 %v3313_v12, %v5914_v11  ;;  %v3316_v47 = vmul.f32 %v4443_v8, %v3315_v13  ;;  %4448 = vrsqrt.f32 %v6050_v60  ;;  %3248 = vadd.xlane.f32.xlu0 %v3196_v22  ;;  %vm3322_vm8 = vmor %vm3320_vm7, %vm3321_vm4  ;;  %vm3350_vm11 = vweird.f32 %v6041_v56 }
 0x41f   : > { %v3337_v15 = vmul.f32 0.5, %v3336_v5  ;;  %v2994_v17 = vpop.f32.mrf.mxu0  ;;  %vm3330_vm13 = vweird.f32 %v6043_v7  ;;  %vm3360_vm0 = vweird.f32 %v6050_v60 }
 0x420   : > { %v3656_v16 = vmax.f32 %v3624_v21, 0.0  ;;  %v3317_v53 = vmul.f32 0.5, %v3316_v47  ;;  %v3108_v49 = vadd.f32 %v3107_v20, %v2994_v17 }
 0x421   : > { %v3338_v57 = vsub.f32 1.5, %v3337_v15 }
 0x422   : > { %v4445_v18 = vpop.eup %4444  ;;  %3688 = vst [vmem:[%s6056_s15] sm:$0xff] %v3656_v16  ;;  %v3318_v11 = vsub.f32 1.5, %v3317_v53  ;;  %v3221_v48 = vpop.xlane.xlu1 %3220  ;;  %v6061_v61 = vadd.f32 %v5910_v3, %v3108_v49 }
 0x423   : > { %v4447_v23 = vpop.eup %4446  ;;  %v3339_v63 = vmul.f32 %v4441_v39, %v3338_v57  ;;  %v3345_v41 = vmul.f32 %v4445_v18, %v6041_v56  ;;  %v6064_v35 = vmax.f32 %v3221_v48, 1e-24  ;;  %vm3351_vm9 = vweird.f32 %v4445_v18 }
 0x424   : > { %v3319_v40 = vmul.f32 %v4443_v8, %v3318_v11  ;;  %v3325_v20 = vmul.f32 %v4447_v23, %v6043_v7  ;;  %v3197_v0 = vmul.f32 %v6061_v61, %v6061_v61  ;;  %v4449_v43 = vpop.eup %4448  ;;  %vm3331_vm10 = vweird.f32 %v4447_v23  ;;  %vm3352_vm12 = vmor %vm3350_vm11, %vm3351_vm9 }
 0x425   : > { %v3343_v52 = vsel %vm3342_vm6, %v4441_v39, %v3339_v63  ;;  %v3346_v34 = vmul.f32 %v4445_v18, %v3345_v41  ;;  %4450 = vrsqrt.f32 %v6064_v35  ;;  %v3355_v19 = vmul.f32 %v4449_v43, %v6050_v60  ;;  %vm3332_vm14 = vmor %vm3330_vm13, %vm3331_vm10 }
 0x426   : > { %v3627_v33 = vmul.f32 %v3343_v52, %v5922_v59  ;;  %v3323_v25 = vsel %vm3322_vm8, %v4443_v8, %v3319_v40  ;;  %v3326_v54 = vmul.f32 %v4447_v23, %v3325_v20  ;;  %3250 = vadd.xlane.f32.xlu1 %v3197_v0  ;;  %vm3361_vm15 = vweird.f32 %v4449_v43 }
 0x427   : > { %v3625_v46 = vmul.f32 %v3323_v25, %v5925_v24  ;;  %v3347_v55 = vmul.f32 0.5, %v3346_v34  ;;  %v2997_v39 = vpop.f32.mrf.mxu0  ;;  %v3356_v13 = vmul.f32 %v4449_v43, %v3355_v19  ;;  %vm3362_vm1 = vmor %vm3360_vm0, %vm3361_vm15  ;;  %vm3370_vm3 = vweird.f32 %v6064_v35 }
 0x428   : > { %v3659_v14 = vmax.f32 %v3627_v33, 0.0  ;;  %v3327_v42 = vmul.f32 0.5, %v3326_v54  ;;  %v3111_v31 = vadd.f32 %v6034_v51, %v2997_v39 }
 0x429   : > { %v3657_v59 = vmax.f32 %v3625_v46, 0.0  ;;  %v3348_v8 = vsub.f32 1.5, %v3347_v55  ;;  %v3223_v12 = vpop.xlane.xlu2 %3222  ;;  %v3357_v22 = vmul.f32 0.5, %v3356_v13 }
 0x42a   : > { %3691 = vst [vmem:[%s6056_s15 + $0x18] sm:$0xff] %v3659_v14  ;;  %v3328_v5 = vsub.f32 1.5, %v3327_v42  ;;  %v6077_v24 = vadd.f32 %v5910_v3, %v3111_v31  ;;  %v6079_v21 = vmax.f32 %v3223_v12, 1e-24 }
 0x42b   : > { %3689 = vst [vmem:[%s6056_s15 + $0x8] sm:$0xff] %v3657_v59  ;;  %v3349_v47 = vmul.f32 %v4445_v18, %v3348_v8  ;;  %v4451_v15 = vpop.eup %4450  ;;  %v3358_v53 = vsub.f32 1.5, %v3357_v22 }
 0x42c   : > { %v3329_v51 = vmul.f32 %v4447_v23, %v3328_v5  ;;  %4452 = vrsqrt.f32 %v6079_v21  ;;  %v3198_v17 = vmul.f32 %v6077_v24, %v6077_v24  ;;  %v3365_v57 = vmul.f32 %v4451_v15, %v6064_v35 }
 0x42d   : > { %v3353_v16 = vsel %vm3352_vm12, %v4445_v18, %v3349_v47  ;;  %v3359_v48 = vmul.f32 %v4449_v43, %v3358_v53  ;;  %vm3371_vm2 = vweird.f32 %v4451_v15  ;;  %vm3380_vm6 = vweird.f32 %v6079_v21 }
 0x42e   : > { %v3628_v49 = vmul.f32 %v3353_v16, %v5935_v29  ;;  %v3333_v56 = vsel %vm3332_vm14, %v4447_v23, %v3329_v51  ;;  %3252 = vadd.xlane.f32.xlu2 %v3198_v17  ;;  %v3366_v7 = vmul.f32 %v4451_v15, %v3365_v57  ;;  %v3119_v29 = vpop.f32.mrf.mxu1  ;;  %vm3372_vm4 = vmor %vm3370_vm3, %vm3371_vm2 }
 0x42f   : > { %v3626_v11 = vmul.f32 %v3333_v56, %v5938_v10  ;;  %v3000_v63 = vpop.f32.mrf.mxu0  ;;  %v3363_v20 = vsel %vm3362_vm1, %v4449_v43, %v3359_v48 }
 0x430   : > { %v3660_v41 = vmax.f32 %v3628_v49, 0.0  ;;  %v3114_v18 = vadd.f32 %v6047_v37, %v3000_v63  ;;  %v3367_v52 = vmul.f32 0.5, %v3366_v7  ;;  %v3629_v10 = vmul.f32 %v3363_v20, %v5941_v9 }
 0x431   : > { %v3658_v40 = vmax.f32 %v3626_v11, 0.0  ;;  %v3225_v34 = vpop.xlane.xlu0 %3224 }
 0x432   : > { %v4453_v23 = vpop.eup %4452  ;;  %3692 = vst [vmem:[%s6056_s15 + $0x20] sm:$0xff] %v3660_v41  ;;  %v6095_v0 = vadd.f32 %v5910_v3, %v3114_v18  ;;  %v3280_v60 = vmax.f32 %v3225_v34, 1e-24  ;;  %v3368_v33 = vsub.f32 1.5, %v3367_v52  ;;  %v3661_v37 = vmax.f32 %v3629_v10, 0.0 }
 0x433   : > { %3690 = vst [vmem:[%s6056_s15 + $0x10] sm:$0xff] %v3658_v40  ;;  %v3375_v25 = vmul.f32 %v4453_v23, %v6079_v21  ;;  %vm3381_vm5 = vweird.f32 %v4453_v23 }
 0x434   : > { %4454 = vrsqrt.f32 %v3280_v60  ;;  %v3199_v43 = vmul.f32 %v6095_v0, %v6095_v0  ;;  %v3369_v54 = vmul.f32 %v4451_v15, %v3368_v33  ;;  %3693 = vst [vmem:[%s6056_s15 + $0x28] sm:$0xff] %v3661_v37  ;;  %vm3382_vm7 = vmor %vm3380_vm6, %vm3381_vm5  ;;  %vm3390_vm9 = vweird.f32 %v3280_v60 }
 0x435   : > { %v3376_v46 = vmul.f32 %v4453_v23, %v3375_v25 }
 0x436   : > { %3254 = vadd.xlane.f32.xlu0 %v3199_v43  ;;  %v3373_v9 = vsel %vm3372_vm4, %v4451_v15, %v3369_v54  ;;  %v3122_v47 = vpop.f32.mrf.mxu1 }
 0x437   : > { %v3377_v55 = vmul.f32 0.5, %v3376_v46  ;;  %v3003_v19 = vpop.f32.mrf.mxu0  ;;  %v3630_v39 = vmul.f32 %v3373_v9, %v5952_v1 }
 0x438   : > { %v3117_v14 = vadd.f32 %v6072_v6, %v3003_v19 }
 0x439   : > { %v3378_v42 = vsub.f32 1.5, %v3377_v55  ;;  %v3227_v31 = vpop.xlane.xlu1 %3226  ;;  %v3662_v8 = vmax.f32 %v3630_v39, 0.0 }
 0x43a   : > { %v4455_v59 = vpop.eup %4454  ;;  %v6106_v13 = vadd.f32 %v5910_v3, %v3117_v14  ;;  %v3281_v35 = vmax.f32 %v3227_v31, 1e-24 }
 0x43b   : > { %v3379_v12 = vmul.f32 %v4453_v23, %v3378_v42  ;;  %v3385_v5 = vmul.f32 %v4455_v59, %v3280_v60  ;;  %3694 = vst [vmem:[%s6056_s15 + $0x30] sm:$0xff] %v3662_v8  ;;  %vm3391_vm8 = vweird.f32 %v4455_v59 }
 0x43c   : > { %4456 = vrsqrt.f32 %v3281_v35  ;;  %v3200_v1 = vmul.f32 %v6106_v13, %v6106_v13  ;;  %vm3392_vm10 = vmor %vm3390_vm9, %vm3391_vm8  ;;  %vm3400_vm12 = vweird.f32 %v3281_v35 }
 0x43d   : > { %v3383_v6 = vsel %vm3382_vm7, %v4453_v23, %v3379_v12  ;;  %v3386_v22 = vmul.f32 %v4455_v59, %v3385_v5 }
 0x43e   : > { %v3631_v15 = vmul.f32 %v3383_v6, %v5959_v27  ;;  %3256 = vadd.xlane.f32.xlu1 %v3200_v1  ;;  %v3125_v18 = vpop.f32.mrf.mxu1 }
 0x43f   : > { %v3387_v51 = vmul.f32 0.5, %v3386_v22  ;;  %v3006_v17 = vpop.f32.mrf.mxu0 }
 0x440   : > { %v3663_v16 = vmax.f32 %v3631_v15, 0.0  ;;  %v3120_v53 = vadd.f32 %v3119_v29, %v3006_v17 }
 0x441   : > { %v3388_v57 = vsub.f32 1.5, %v3387_v51  ;;  %v3229_v21 = vpop.xlane.xlu2 %3228 }
 0x442   : > { %v4457_v49 = vpop.eup %4456  ;;  %3695 = vst [vmem:[%s6056_s15 + $0x38] sm:$0xff] %v3663_v16  ;;  %v6115_v56 = vadd.f32 %v5910_v3, %v3120_v53  ;;  %v3282_v11 = vmax.f32 %v3229_v21, 1e-24 }
 0x443   : > { %v3389_v48 = vmul.f32 %v4455_v59, %v3388_v57  ;;  %v3395_v7 = vmul.f32 %v4457_v49, %v3281_v35  ;;  %vm3401_vm11 = vweird.f32 %v4457_v49 }
 0x444   : > { %4458 = vrsqrt.f32 %v3282_v11  ;;  %v3201_v27 = vmul.f32 %v6115_v56, %v6115_v56  ;;  %vm3402_vm13 = vmor %vm3400_vm12, %vm3401_vm11  ;;  %vm3410_vm15 = vweird.f32 %v3282_v11 }
 0x445   : > { %v3393_v63 = vsel %vm3392_vm10, %v4455_v59, %v3389_v48  ;;  %v3396_v41 = vmul.f32 %v4457_v49, %v3395_v7 }
 0x446   : > { %v3632_v40 = vmul.f32 %v3393_v63, %v5966_v44  ;;  %3258 = vadd.xlane.f32.xlu2 %v3201_v27  ;;  %v3128_v39 = vpop.f32.mrf.mxu1 }
 0x447   : > { %v3397_v20 = vmul.f32 0.5, %v3396_v41  ;;  %v3009_v52 = vpop.f32.mrf.mxu0 }
 0x448   : > { %v3664_v34 = vmax.f32 %v3632_v40, 0.0  ;;  %v3123_v29 = vadd.f32 %v3122_v47, %v3009_v52 }
 0x449   : > { %v3398_v23 = vsub.f32 1.5, %v3397_v20  ;;  %v3231_v10 = vpop.xlane.xlu0 %3230 }
 0x44a   : > { %v4459_v60 = vpop.eup %4458  ;;  %3696 = vst [vmem:[%s6056_s15 + $0x40] sm:$0xff] %v3664_v34  ;;  %v6122_v33 = vadd.f32 %v5910_v3, %v3123_v29  ;;  %v3283_v25 = vmax.f32 %v3231_v10, 1e-24 }
 0x44b   : > { %v3399_v37 = vmul.f32 %v4457_v49, %v3398_v23  ;;  %v3405_v43 = vmul.f32 %v4459_v60, %v3282_v11  ;;  %vm3411_vm14 = vweird.f32 %v4459_v60 }
 0x44c   : > { %4460 = vrsqrt.f32 %v3283_v25  ;;  %v3202_v44 = vmul.f32 %v6122_v33, %v6122_v33  ;;  %vm3412_vm0 = vmor %vm3410_vm15, %vm3411_vm14  ;;  %vm3420_vm2 = vweird.f32 %v3283_v25 }
 0x44d   : > { %v3403_v54 = vsel %vm3402_vm13, %v4457_v49, %v3399_v37  ;;  %v3406_v46 = vmul.f32 %v4459_v60, %v3405_v43 }
 0x44e   : > { %v3633_v9 = vmul.f32 %v3403_v54, %v5973_v28  ;;  %3260 = vadd.xlane.f32.xlu0 %v3202_v44  ;;  %v3131_v21 = vpop.f32.mrf.mxu1 }
 0x44f   : > { %v3407_v55 = vmul.f32 0.5, %v3406_v46  ;;  %v3012_v19 = vpop.f32.mrf.mxu0 }
 0x450   : > { %v3665_v14 = vmax.f32 %v3633_v9, 0.0  ;;  %v3126_v42 = vadd.f32 %v3125_v18, %v3012_v19 }
 0x451   : > { %v3408_v31 = vsub.f32 1.5, %v3407_v55  ;;  %v3233_v59 = vpop.xlane.xlu1 %3232 }
 0x452   : > { %v4461_v8 = vpop.eup %4460  ;;  %3697 = vst [vmem:[%s6056_s15 + $0x48] sm:$0xff] %v3665_v14  ;;  %v6129_v35 = vadd.f32 %v5910_v3, %v3126_v42  ;;  %v3284_v12 = vmax.f32 %v3233_v59, 1e-24 }
 0x453   : > { %v3409_v5 = vmul.f32 %v4459_v60, %v3408_v31  ;;  %v3415_v47 = vmul.f32 %v4461_v8, %v3283_v25  ;;  %vm3421_vm1 = vweird.f32 %v4461_v8 }
 0x454   : > { %4462 = vrsqrt.f32 %v3284_v12  ;;  %v3203_v28 = vmul.f32 %v6129_v35, %v6129_v35  ;;  %vm3422_vm3 = vmor %vm3420_vm2, %vm3421_vm1  ;;  %vm3430_vm5 = vweird.f32 %v3284_v12 }
 0x455   : > { %v3413_v1 = vsel %vm3412_vm0, %v4459_v60, %v3409_v5  ;;  %v3416_v6 = vmul.f32 %v4461_v8, %v3415_v47 }
 0x456   : > { %v3634_v22 = vmul.f32 %v3413_v1, %v5980_v32  ;;  %3262 = vadd.xlane.f32.xlu1 %v3203_v28  ;;  %v3134_v44 = vpop.f32.mrf.mxu1 }
 0x457   : > { %v3417_v15 = vmul.f32 0.5, %v3416_v6  ;;  %v3015_v51 = vpop.f32.mrf.mxu0 }
 0x458   : > { %v3666_v17 = vmax.f32 %v3634_v22, 0.0  ;;  %v3129_v16 = vadd.f32 %v3128_v39, %v3015_v51 }
 0x459   : > { %v3418_v53 = vsub.f32 1.5, %v3417_v15  ;;  %v3235_v57 = vpop.xlane.xlu2 %3234 }
 0x45a   : > { %v4463_v49 = vpop.eup %4462  ;;  %3698 = vst [vmem:[%s6056_s15 + $0x50] sm:$0xff] %v3666_v17  ;;  %v6136_v11 = vadd.f32 %v5910_v3, %v3129_v16  ;;  %v3285_v48 = vmax.f32 %v3235_v57, 1e-24 }
 0x45b   : > { %v3419_v7 = vmul.f32 %v4461_v8, %v3418_v53  ;;  %v3425_v27 = vmul.f32 %v4463_v49, %v3284_v12  ;;  %vm3431_vm4 = vweird.f32 %v4463_v49 }
 0x45c   : > { %4464 = vrsqrt.f32 %v3285_v48  ;;  %v3204_v32 = vmul.f32 %v6136_v11, %v6136_v11  ;;  %vm3432_vm6 = vmor %vm3430_vm5, %vm3431_vm4  ;;  %vm3440_vm8 = vweird.f32 %v3285_v48 }
 0x45d   : > { %v3423_v63 = vsel %vm3422_vm3, %v4461_v8, %v3419_v7  ;;  %v3426_v41 = vmul.f32 %v4463_v49, %v3425_v27 }
 0x45e   : > { %v3635_v18 = vmul.f32 %v3423_v63, %v5987_v50  ;;  %3264 = vadd.xlane.f32.xlu2 %v3204_v32  ;;  %v3137_v6 = vpop.f32.mrf.mxu1 }
 0x45f   : > { %v3427_v40 = vmul.f32 0.5, %v3426_v41  ;;  %v3018_v20 = vpop.f32.mrf.mxu0 }
 0x460   : > { %v3667_v52 = vmax.f32 %v3635_v18, 0.0  ;;  %v3132_v34 = vadd.f32 %v3131_v21, %v3018_v20 }
 0x461   : > { %v3428_v29 = vsub.f32 1.5, %v3427_v40  ;;  %v3237_v23 = vpop.xlane.xlu0 %3236 }
 0x462   : > { %v4465_v10 = vpop.eup %4464  ;;  %3699 = vst [vmem:[%s6056_s15 + $0x58] sm:$0xff] %v3667_v52  ;;  %v6143_v60 = vadd.f32 %v5910_v3, %v3132_v34  ;;  %v3286_v25 = vmax.f32 %v3237_v23, 1e-24 }
 0x463   : > { %v3429_v37 = vmul.f32 %v4463_v49, %v3428_v29  ;;  %v3435_v43 = vmul.f32 %v4465_v10, %v3285_v48  ;;  %vm3441_vm7 = vweird.f32 %v4465_v10 }
 0x464   : > { %4466 = vrsqrt.f32 %v3286_v25  ;;  %v3205_v50 = vmul.f32 %v6143_v60, %v6143_v60  ;;  %vm3442_vm9 = vmor %vm3440_vm8, %vm3441_vm7  ;;  %vm3450_vm11 = vweird.f32 %v3286_v25 }
 0x465   : > { %v3433_v54 = vsel %vm3432_vm6, %v4463_v49, %v3429_v37  ;;  %v3436_v46 = vmul.f32 %v4465_v10, %v3435_v43 }
 0x466   : > { %v3636_v9 = vmul.f32 %v3433_v54, %v5994_v26  ;;  %3266 = vadd.xlane.f32.xlu0 %v3205_v50 }
 0x467   : > { %v3437_v55 = vmul.f32 0.5, %v3436_v46  ;;  %v3021_v19 = vpop.f32.mrf.mxu0 }
 0x468   : > { %v3668_v39 = vmax.f32 %v3636_v9, 0.0  ;;  %v3135_v14 = vadd.f32 %v3134_v44, %v3021_v19 }
 0x469   : > { %v3438_v42 = vsub.f32 1.5, %v3437_v55  ;;  %v3239_v31 = vpop.xlane.xlu1 %3238 }
 0x46a   : > { %v4467_v59 = vpop.eup %4466  ;;  %3700 = vst [vmem:[%s6056_s15 + $0x60] sm:$0xff] %v3668_v39  ;;  %v6150_v8 = vadd.f32 %v5910_v3, %v3135_v14  ;;  %v3287_v12 = vmax.f32 %v3239_v31, 1e-24 }
 0x46b   : > { %v3439_v5 = vmul.f32 %v4465_v10, %v3438_v42  ;;  %v3445_v47 = vmul.f32 %v4467_v59, %v3286_v25  ;;  %vm3451_vm10 = vweird.f32 %v4467_v59 }
 0x46c   : > { %4468 = vrsqrt.f32 %v3287_v12  ;;  %v3206_v26 = vmul.f32 %v6150_v8, %v6150_v8  ;;  %vm3452_vm12 = vmor %vm3450_vm11, %vm3451_vm10  ;;  %vm3460_vm14 = vweird.f32 %v3287_v12 }
 0x46d   : > { %v3443_v28 = vsel %vm3442_vm9, %v4465_v10, %v3439_v5  ;;  %v3446_v1 = vmul.f32 %v4467_v59, %v3445_v47 }
 0x46e   : > { %v3637_v22 = vmul.f32 %v3443_v28, %v6000_v62  ;;  %3268 = vadd.xlane.f32.xlu1 %v3206_v26 }
 0x46f   : > { %v3447_v15 = vmul.f32 0.5, %v3446_v1  ;;  %v3024_v51 = vpop.f32.mrf.mxu0 }
 0x470   : > { %v3669_v17 = vmax.f32 %v3637_v22, 0.0  ;;  %v3138_v16 = vadd.f32 %v3137_v6, %v3024_v51 }
 0x471   : > { %v3448_v53 = vsub.f32 1.5, %v3447_v15  ;;  %v3241_v57 = vpop.xlane.xlu2 %3240 }
 0x472   : > { %v4469_v21 = vpop.eup %4468  ;;  %3701 = vst [vmem:[%s6056_s15 + $0x68] sm:$0xff] %v3669_v17  ;;  %v6157_v49 = vadd.f32 %v5910_v3, %v3138_v16  ;;  %v3288_v48 = vmax.f32 %v3241_v57, 1e-24 }
 0x473   : > { %v3449_v7 = vmul.f32 %v4467_v59, %v3448_v53  ;;  %v3455_v27 = vmul.f32 %v4469_v21, %v3287_v12  ;;  %vm3461_vm13 = vweird.f32 %v4469_v21 }
 0x474   : > { %4470 = vrsqrt.f32 %v3288_v48  ;;  %v3207_v62 = vmul.f32 %v6157_v49, %v6157_v49  ;;  %vm3462_vm15 = vmor %vm3460_vm14, %vm3461_vm13  ;;  %vm3470_vm1 = vweird.f32 %v3288_v48 }
 0x475   : > { %v3453_v32 = vsel %vm3452_vm12, %v4467_v59, %v3449_v7  ;;  %v3456_v63 = vmul.f32 %v4469_v21, %v3455_v27 }
 0x476   : > { %v3638_v41 = vmul.f32 %v3453_v32, %v6006_v4  ;;  %3270 = vadd.xlane.f32.xlu2 %v3207_v62 }
 0x477   : > { %v3457_v18 = vmul.f32 0.5, %v3456_v63 }
 0x478   : > { %v3670_v40 = vmax.f32 %v3638_v41, 0.0 }
 0x479   : > { %v3458_v20 = vsub.f32 1.5, %v3457_v18  ;;  %v3243_v3 = vpop.xlane.xlu0 %3242 }
 0x47a   : > { %v4471_v52 = vpop.eup %4470  ;;  %3702 = vst [vmem:[%s6056_s15 + $0x70] sm:$0xff] %v3670_v40  ;;  %v3289_v34 = vmax.f32 %v3243_v3, 1e-24 }
 0x47b   : > { %v3459_v29 = vmul.f32 %v4469_v21, %v3458_v20  ;;  %v3465_v23 = vmul.f32 %v4471_v52, %v3288_v48  ;;  %vm3471_vm0 = vweird.f32 %v4471_v52 }
 0x47c   : > { %4472 = vrsqrt.f32 %v3289_v34  ;;  %vm3472_vm2 = vmor %vm3470_vm1, %vm3471_vm0  ;;  %vm3480_vm4 = vweird.f32 %v3289_v34 }
 0x47d   : > { %v3463_v10 = vsel %vm3462_vm15, %v4469_v21, %v3459_v29  ;;  %v3466_v25 = vmul.f32 %v4471_v52, %v3465_v23 }
 0x47e   : > { %v3639_v37 = vmul.f32 %v3463_v10, %v6012_v58 }
 0x47f   : > { %v3467_v4 = vmul.f32 0.5, %v3466_v25 }
 0x480   : > { %v3671_v43 = vmax.f32 %v3639_v37, 0.0 }
 0x481   : > { %v3468_v44 = vsub.f32 1.5, %v3467_v4  ;;  %v3245_v50 = vpop.xlane.xlu1 %3244 }
 0x482   : > { %v4473_v54 = vpop.eup %4472  ;;  %3703 = vst [vmem:[%s6056_s15 + $0x78] sm:$0xff] %v3671_v43  ;;  %v3290_v46 = vmax.f32 %v3245_v50, 1e-24 }
 0x483   : > { %v3469_v9 = vmul.f32 %v4471_v52, %v3468_v44  ;;  %v3475_v55 = vmul.f32 %v4473_v54, %v3289_v34  ;;  %vm3481_vm3 = vweird.f32 %v4473_v54 }
 0x484   : > { %4474 = vrsqrt.f32 %v3290_v46  ;;  %vm3482_vm5 = vmor %vm3480_vm4, %vm3481_vm3  ;;  %vm3490_vm7 = vweird.f32 %v3290_v46 }
 0x485   : > { %v3473_v19 = vsel %vm3472_vm2, %v4471_v52, %v3469_v9  ;;  %v3476_v39 = vmul.f32 %v4473_v54, %v3475_v55 }
 0x486   : > { %v3640_v14 = vmul.f32 %v3473_v19, %v6017_v36 }
 0x487   : > { %v3477_v42 = vmul.f32 0.5, %v3476_v39 }
 0x488   : > { %v3672_v58 = vmax.f32 %v3640_v14, 0.0 }
 0x489   : > { %v3478_v31 = vsub.f32 1.5, %v3477_v42  ;;  %v3247_v59 = vpop.xlane.xlu2 %3246 }
 0x48a   : > { %v4475_v12 = vpop.eup %4474  ;;  %3704 = vst [vmem:[%s6056_s15 + $0x80] sm:$0xff] %v3672_v58  ;;  %v3291_v5 = vmax.f32 %v3247_v59, 1e-24 }
 0x48b   : > { %v3479_v47 = vmul.f32 %v4473_v54, %v3478_v31  ;;  %v3485_v26 = vmul.f32 %v4475_v12, %v3290_v46  ;;  %vm3491_vm6 = vweird.f32 %v4475_v12 }
 0x48c   : > { %4476 = vrsqrt.f32 %v3291_v5  ;;  %vm3492_vm8 = vmor %vm3490_vm7, %vm3491_vm6  ;;  %vm3500_vm10 = vweird.f32 %v3291_v5 }
 0x48d   : > { %v3483_v28 = vsel %vm3482_vm5, %v4473_v54, %v3479_v47  ;;  %v3486_v1 = vmul.f32 %v4475_v12, %v3485_v26 }
 0x48e   : > { %v3641_v6 = vmul.f32 %v3483_v28, %v6022_v38 }
 0x48f   : > { %v3487_v22 = vmul.f32 0.5, %v3486_v1 }
 0x490   : > { %v3673_v36 = vmax.f32 %v3641_v6, 0.0 }
 0x491   : > { %v3488_v15 = vsub.f32 1.5, %v3487_v22  ;;  %v3249_v53 = vpop.xlane.xlu0 %3248 }
 0x492   : > { %v4477_v51 = vpop.eup %4476  ;;  %3705 = vst [vmem:[%s6056_s15 + $0x88] sm:$0xff] %v3673_v36  ;;  %v3292_v57 = vmax.f32 %v3249_v53, 1e-24 }
 0x493   : > { %v3489_v17 = vmul.f32 %v4475_v12, %v3488_v15  ;;  %v3495_v16 = vmul.f32 %v4477_v51, %v3291_v5  ;;  %vm3501_vm9 = vweird.f32 %v4477_v51 }
 0x494   : > { %4478 = vrsqrt.f32 %v3292_v57  ;;  %vm3502_vm11 = vmor %vm3500_vm10, %vm3501_vm9  ;;  %vm3510_vm13 = vweird.f32 %v3292_v57 }
 0x495   : > { %v3493_v21 = vsel %vm3492_vm8, %v4475_v12, %v3489_v17  ;;  %v3496_v48 = vmul.f32 %v4477_v51, %v3495_v16 }
 0x496   : > { %v3642_v7 = vmul.f32 %v3493_v21, %v6027_v45 }
 0x497   : > { %v3497_v27 = vmul.f32 0.5, %v3496_v48 }
 0x498   : > { %v3674_v38 = vmax.f32 %v3642_v7, 0.0 }
 0x499   : > { %v3498_v62 = vsub.f32 1.5, %v3497_v27  ;;  %v3251_v32 = vpop.xlane.xlu1 %3250 }
 0x49a   : > { %3706 = vst [vmem:[%s6056_s15 + $0x90] sm:$0xff] %v3674_v38  ;;  %v3293_v41 = vmax.f32 %v3251_v32, 1e-24  ;;  %v4479_v18 = vpop.eup %4478 }
 0x49b   : > { %v3499_v63 = vmul.f32 %v4477_v51, %v3498_v62  ;;  %v3505_v20 = vmul.f32 %v4479_v18, %v3292_v57  ;;  %vm3511_vm12 = vweird.f32 %v4479_v18 }
 0x49c   : > { %4480 = vrsqrt.f32 %v3293_v41  ;;  %vm3512_vm14 = vmor %vm3510_vm13, %vm3511_vm12  ;;  %vm3520_vm0 = vweird.f32 %v3293_v41 }
 0x49d   : > { %v3503_v40 = vsel %vm3502_vm11, %v4477_v51, %v3499_v63  ;;  %v3506_v52 = vmul.f32 %v4479_v18, %v3505_v20 }
 0x49e   : > { %v3643_v3 = vmul.f32 %v3503_v40, %v6032_v30 }
 0x49f   : > { %v3507_v34 = vmul.f32 0.5, %v3506_v52 }
 0x4a0   : > { %v3675_v45 = vmax.f32 %v3643_v3, 0.0 }
 0x4a1   : > { %v3253_v29 = vpop.xlane.xlu2 %3252  ;;  %v3508_v25 = vsub.f32 1.5, %v3507_v34 }
 0x4a2   : > { %3707 = vst [vmem:[%s6056_s15 + $0x98] sm:$0xff] %v3675_v45  ;;  %v3294_v23 = vmax.f32 %v3253_v29, 1e-24  ;;  %v4481_v10 = vpop.eup %4480 }
 0x4a3   : > { %v3515_v37 = vmul.f32 %v4481_v10, %v3293_v41  ;;  %v3509_v4 = vmul.f32 %v4479_v18, %v3508_v25  ;;  %vm3521_vm15 = vweird.f32 %v4481_v10 }
 0x4a4   : > { %4482 = vrsqrt.f32 %v3294_v23  ;;  %vm3522_vm1 = vmor %vm3520_vm0, %vm3521_vm15  ;;  %vm3530_vm3 = vweird.f32 %v3294_v23 }
 0x4a5   : > { %v3516_v43 = vmul.f32 %v4481_v10, %v3515_v37  ;;  %v3513_v44 = vsel %vm3512_vm14, %v4479_v18, %v3509_v4 }
 0x4a6   : > { %v3644_v50 = vmul.f32 %v3513_v44, %v6039_v2 }
 0x4a7   : > { %v3517_v30 = vmul.f32 0.5, %v3516_v43 }
 0x4a8   : > { %v3676_v9 = vmax.f32 %v3644_v50, 0.0 }
 0x4a9   : > { %v3255_v54 = vpop.xlane.xlu0 %3254  ;;  %v3518_v55 = vsub.f32 1.5, %v3517_v30 }
 0x4aa   : > { %v4483_v46 = vpop.eup %4482  ;;  %v3295_v19 = vmax.f32 %v3255_v54, 1e-24  ;;  %3708 = vst [vmem:[%s6056_s15 + $0xa0] sm:$0xff] %v3676_v9 }
 0x4ab   : > { %v3525_v39 = vmul.f32 %v4483_v46, %v3294_v23  ;;  %v3519_v14 = vmul.f32 %v4481_v10, %v3518_v55  ;;  %vm3531_vm2 = vweird.f32 %v4483_v46 }
 0x4ac   : > { %4484 = vrsqrt.f32 %v3295_v19  ;;  %vm3532_vm4 = vmor %vm3530_vm3, %vm3531_vm2  ;;  %vm3540_vm6 = vweird.f32 %v3295_v19 }
 0x4ad   : > { %v3526_v42 = vmul.f32 %v4483_v46, %v3525_v39  ;;  %v3523_v58 = vsel %vm3522_vm1, %v4481_v10, %v3519_v14 }
 0x4ae   : > { %v3645_v31 = vmul.f32 %v3523_v58, %v6061_v61 }
 0x4af   : > { %v3527_v59 = vmul.f32 0.5, %v3526_v42 }
 0x4b0   : > { %v3677_v2 = vmax.f32 %v3645_v31, 0.0 }
 0x4b1   : > { %v3528_v12 = vsub.f32 1.5, %v3527_v59  ;;  %v3257_v5 = vpop.xlane.xlu1 %3256 }
 0x4b2   : > { %v4485_v47 = vpop.eup %4484  ;;  %v3296_v26 = vmax.f32 %v3257_v5, 1e-24  ;;  %3709 = vst [vmem:[%s6056_s15 + $0xa8] sm:$0xff] %v3677_v2 }
 0x4b3   : > { %v3529_v28 = vmul.f32 %v4483_v46, %v3528_v12  ;;  %v3535_v1 = vmul.f32 %v4485_v47, %v3295_v19  ;;  %vm3541_vm5 = vweird.f32 %v4485_v47 }
 0x4b4   : > { %4486 = vrsqrt.f32 %v3296_v26  ;;  %vm3542_vm7 = vmor %vm3540_vm6, %vm3541_vm5  ;;  %vm3550_vm9 = vweird.f32 %v3296_v26 }
 0x4b5   : > { %v3533_v6 = vsel %vm3532_vm4, %v4483_v46, %v3529_v28  ;;  %v3536_v22 = vmul.f32 %v4485_v47, %v3535_v1 }
 0x4b6   : > { %v3646_v36 = vmul.f32 %v3533_v6, %v6077_v24 }
 0x4b7   : > { %v3537_v15 = vmul.f32 0.5, %v3536_v22 }
 0x4b8   : > { %v3678_v61 = vmax.f32 %v3646_v36, 0.0 }
 0x4b9   : > { %v3538_v51 = vsub.f32 1.5, %v3537_v15  ;;  %v3259_v17 = vpop.xlane.xlu2 %3258 }
 0x4ba   : > { %v4487_v16 = vpop.eup %4486  ;;  %3710 = vst [vmem:[%s6056_s15 + $0xb0] sm:$0xff] %v3678_v61  ;;  %v3297_v53 = vmax.f32 %v3259_v17, 1e-24 }
 0x4bb   : > { %v3539_v57 = vmul.f32 %v4485_v47, %v3538_v51  ;;  %v3545_v21 = vmul.f32 %v4487_v16, %v3296_v26  ;;  %vm3551_vm8 = vweird.f32 %v4487_v16 }
 0x4bc   : > { %4488 = vrsqrt.f32 %v3297_v53  ;;  %vm3552_vm10 = vmor %vm3550_vm9, %vm3551_vm8  ;;  %vm3560_vm12 = vweird.f32 %v3297_v53 }
 0x4bd   : > { %v3543_v48 = vsel %vm3542_vm7, %v4485_v47, %v3539_v57  ;;  %v3546_v7 = vmul.f32 %v4487_v16, %v3545_v21 }
 0x4be   : > { %v3647_v27 = vmul.f32 %v3543_v48, %v6095_v0 }
 0x4bf   : > { %v3547_v38 = vmul.f32 0.5, %v3546_v7 }
 0x4c0   : > { %v3679_v24 = vmax.f32 %v3647_v27, 0.0 }
 0x4c1   : > { %v3548_v62 = vsub.f32 1.5, %v3547_v38  ;;  %v3261_v32 = vpop.xlane.xlu0 %3260 }
 0x4c2   : > { %v4489_v63 = vpop.eup %4488  ;;  %3711 = vst [vmem:[%s6056_s15 + $0xb8] sm:$0xff] %v3679_v24  ;;  %v3298_v41 = vmax.f32 %v3261_v32, 1e-24 }
 0x4c3   : > { %v3549_v18 = vmul.f32 %v4487_v16, %v3548_v62  ;;  %v3555_v40 = vmul.f32 %v4489_v63, %v3297_v53  ;;  %vm3561_vm11 = vweird.f32 %v4489_v63 }
 0x4c4   : > { %4490 = vrsqrt.f32 %v3298_v41  ;;  %vm3562_vm13 = vmor %vm3560_vm12, %vm3561_vm11  ;;  %vm3570_vm15 = vweird.f32 %v3298_v41 }
 0x4c5   : > { %v3553_v20 = vsel %vm3552_vm10, %v4487_v16, %v3549_v18  ;;  %v3556_v3 = vmul.f32 %v4489_v63, %v3555_v40 }
 0x4c6   : > { %v3648_v52 = vmul.f32 %v3553_v20, %v6106_v13 }
 0x4c7   : > { %v3557_v45 = vmul.f32 0.5, %v3556_v3 }
 0x4c8   : > { %v3680_v0 = vmax.f32 %v3648_v52, 0.0 }
 0x4c9   : > { %v3558_v34 = vsub.f32 1.5, %v3557_v45  ;;  %v3263_v29 = vpop.xlane.xlu1 %3262 }
 0x4ca   : > { %v4491_v23 = vpop.eup %4490  ;;  %3712 = vst [vmem:[%s6056_s15 + $0xc0] sm:$0xff] %v3680_v0  ;;  %v3299_v10 = vmax.f32 %v3263_v29, 1e-24 }
 0x4cb   : > { %v3559_v25 = vmul.f32 %v4489_v63, %v3558_v34  ;;  %v3565_v37 = vmul.f32 %v4491_v23, %v3298_v41  ;;  %vm3571_vm14 = vweird.f32 %v4491_v23 }
 0x4cc   : > { %4492 = vrsqrt.f32 %v3299_v10  ;;  %vm3572_vm0 = vmor %vm3570_vm15, %vm3571_vm14  ;;  %vm3580_vm2 = vweird.f32 %v3299_v10 }
 0x4cd   : > { %v3563_v4 = vsel %vm3562_vm13, %v4489_v63, %v3559_v25  ;;  %v3566_v43 = vmul.f32 %v4491_v23, %v3565_v37 }
 0x4ce   : > { %v3649_v44 = vmul.f32 %v3563_v4, %v6115_v56 }
 0x4cf   : > { %v3567_v50 = vmul.f32 0.5, %v3566_v43 }
 0x4d0   : > { %v3681_v13 = vmax.f32 %v3649_v44, 0.0 }
 0x4d1   : > { %v3568_v30 = vsub.f32 1.5, %v3567_v50  ;;  %v3265_v54 = vpop.xlane.xlu2 %3264 }
 0x4d2   : > { %v4493_v46 = vpop.eup %4492  ;;  %3713 = vst [vmem:[%s6056_s15 + $0xc8] sm:$0xff] %v3681_v13  ;;  %v3300_v9 = vmax.f32 %v3265_v54, 1e-24 }
 0x4d3   : > { %v3569_v55 = vmul.f32 %v4491_v23, %v3568_v30  ;;  %v3575_v19 = vmul.f32 %v4493_v46, %v3299_v10  ;;  %vm3581_vm1 = vweird.f32 %v4493_v46 }
 0x4d4   : > { %4494 = vrsqrt.f32 %v3300_v9  ;;  %vm3582_vm3 = vmor %vm3580_vm2, %vm3581_vm1  ;;  %vm3590_vm5 = vweird.f32 %v3300_v9 }
 0x4d5   : > { %v3573_v39 = vsel %vm3572_vm0, %v4491_v23, %v3569_v55  ;;  %v3576_v14 = vmul.f32 %v4493_v46, %v3575_v19 }
 0x4d6   : > { %v3650_v42 = vmul.f32 %v3573_v39, %v6122_v33 }
 0x4d7   : > { %v3577_v58 = vmul.f32 0.5, %v3576_v14 }
 0x4d8   : > { %v3682_v56 = vmax.f32 %v3650_v42, 0.0 }
 0x4d9   : > { %v3578_v31 = vsub.f32 1.5, %v3577_v58  ;;  %v3267_v59 = vpop.xlane.xlu0 %3266 }
 0x4da   : > { %v4495_v2 = vpop.eup %4494  ;;  %3714 = vst [vmem:[%s6056_s15 + $0xd0] sm:$0xff] %v3682_v56  ;;  %v3301_v12 = vmax.f32 %v3267_v59, 1e-24 }
 0x4db   : > { %v3579_v5 = vmul.f32 %v4493_v46, %v3578_v31  ;;  %v3585_v47 = vmul.f32 %v4495_v2, %v3300_v9  ;;  %vm3591_vm4 = vweird.f32 %v4495_v2 }
 0x4dc   : > { %4496 = vrsqrt.f32 %v3301_v12  ;;  %vm3592_vm6 = vmor %vm3590_vm5, %vm3591_vm4  ;;  %vm3600_vm8 = vweird.f32 %v3301_v12 }
 0x4dd   : > { %v3583_v26 = vsel %vm3582_vm3, %v4493_v46, %v3579_v5  ;;  %v3586_v28 = vmul.f32 %v4495_v2, %v3585_v47 }
 0x4de   : > { %v3651_v1 = vmul.f32 %v3583_v26, %v6129_v35 }
 0x4df   : > { %v3587_v6 = vmul.f32 0.5, %v3586_v28 }
 0x4e0   : > { %v3683_v33 = vmax.f32 %v3651_v1, 0.0 }
 0x4e1   : > { %v3588_v22 = vsub.f32 1.5, %v3587_v6  ;;  %v3269_v36 = vpop.xlane.xlu1 %3268 }
 0x4e2   : > { %v4497_v15 = vpop.eup %4496  ;;  %3715 = vst [vmem:[%s6056_s15 + $0xd8] sm:$0xff] %v3683_v33  ;;  %v3302_v61 = vmax.f32 %v3269_v36, 1e-24 }
 0x4e3   : > { %v3589_v51 = vmul.f32 %v4495_v2, %v3588_v22  ;;  %v3595_v17 = vmul.f32 %v4497_v15, %v3301_v12  ;;  %vm3601_vm7 = vweird.f32 %v4497_v15 }
 0x4e4   : > { %4498 = vrsqrt.f32 %v3302_v61  ;;  %vm3602_vm9 = vmor %vm3600_vm8, %vm3601_vm7  ;;  %vm3610_vm11 = vweird.f32 %v3302_v61 }
 0x4e5   : > { %v3593_v16 = vsel %vm3592_vm6, %v4495_v2, %v3589_v51  ;;  %v3596_v53 = vmul.f32 %v4497_v15, %v3595_v17 }
 0x4e6   : > { %v3652_v57 = vmul.f32 %v3593_v16, %v6136_v11 }
 0x4e7   : > { %v3597_v21 = vmul.f32 0.5, %v3596_v53 }
 0x4e8   : > { %v3684_v35 = vmax.f32 %v3652_v57, 0.0 }
 0x4e9   : > { %v3598_v48 = vsub.f32 1.5, %v3597_v21  ;;  %v3271_v7 = vpop.xlane.xlu2 %3270 }
 0x4ea   : > { %v4499_v27 = vpop.eup %4498  ;;  %3716 = vst [vmem:[%s6056_s15 + $0xe0] sm:$0xff] %v3684_v35  ;;  %v3303_v38 = vmax.f32 %v3271_v7, 1e-24 }
 0x4eb   : > { %v3599_v24 = vmul.f32 %v4497_v15, %v3598_v48  ;;  %v3605_v62 = vmul.f32 %v4499_v27, %v3302_v61  ;;  %vm3611_vm10 = vweird.f32 %v4499_v27 }
 0x4ec   : > { %4500 = vrsqrt.f32 %v3303_v38  ;;  %vm3612_vm12 = vmor %vm3610_vm11, %vm3611_vm10  ;;  %vm3620_vm14 = vweird.f32 %v3303_v38 }
 0x4ed   : > { %v3603_v32 = vsel %vm3602_vm9, %v4497_v15, %v3599_v24  ;;  %v3606_v63 = vmul.f32 %v4499_v27, %v3605_v62 }
 0x4ee   : > { %v3653_v41 = vmul.f32 %v3603_v32, %v6143_v60 }
 0x4ef   : > { %v3607_v11 = vmul.f32 0.5, %v3606_v63 }
 0x4f0   : > { %v3685_v18 = vmax.f32 %v3653_v41, 0.0 }
 0x4f1   : > { %v3608_v40 = vsub.f32 1.5, %v3607_v11 }
 0x4f2   : > { %v4501_v20 = vpop.eup %4500  ;;  %3717 = vst [vmem:[%s6056_s15 + $0xe8] sm:$0xff] %v3685_v18 }
 0x4f3   : > { %v3609_v3 = vmul.f32 %v4499_v27, %v3608_v40  ;;  %v3615_v52 = vmul.f32 %v4501_v20, %v3303_v38  ;;  %vm3621_vm13 = vweird.f32 %v4501_v20 }
 0x4f4   : > { %vm3622_vm15 = vmor %vm3620_vm14, %vm3621_vm13 }
 0x4f5   : > { %v3613_v45 = vsel %vm3612_vm12, %v4499_v27, %v3609_v3  ;;  %v3616_v0 = vmul.f32 %v4501_v20, %v3615_v52 }
 0x4f6   : > { %v3654_v34 = vmul.f32 %v3613_v45, %v6150_v8 }
 0x4f7   : > { %v3617_v29 = vmul.f32 0.5, %v3616_v0 }
 0x4f8   : > { %v3686_v60 = vmax.f32 %v3654_v34, 0.0 }
 0x4f9   : > { %v3618_v23 = vsub.f32 1.5, %v3617_v29 }
 0x4fa   : > { %3718 = vst [vmem:[%s6056_s15 + $0xf0] sm:$0xff] %v3686_v60 }
 0x4fb   : > { %v3619_v10 = vmul.f32 %v4501_v20, %v3618_v23 }
 0x4fd   : > { %v3623_v25 = vsel %vm3622_vm15, %v4501_v20, %v3619_v10 }
 0x4fe   : > { %v3655_v8 = vmul.f32 %v3623_v25, %v6157_v49 }
 0x500   : > { %v3687_v37 = vmax.f32 %v3655_v8, 0.0 }
 0x502   : > { %3719 = vst [vmem:[%s6056_s15 + $0xf8] sm:$0xff] %v3687_v37 }
 0x503   : > { %4709 = shalt.err (!%p4706_p0)
}
 0x504   : > { %s4793_s2 = smov 128   ;;  %s4794_s28 = smov 8  }
 0x505   : > { %4273 = dma.vmem_to_hbm [thread:$0]  (%p4938_p7), %s3734_s13, 4096, %s3736_s8, %s3721_s27, %s4793_s2, %s4793_s2, %s4794_s28  }
 0x506 PF: > { %s3750_s12 = sand.u32 1, %s4760_s24   ;;  %p4296_p3 = pnand %p3892_p11, %p4880_p6 }
 0x507   : > { %s3751_s0 = scalar_lea.sflag [#allocation5], %s3750_s12 }
 0x508   : > { %p4297_p5 = pneg %p4296_p3 }
 0x50a   : > { %4755 = dma.done.wait (%p4297_p5), %s3751_s0, 4096  }
 0x50b   : > { %4757 = vsyncadd (%p4297_p5), %s3751_s0, 4294963200  ;;  %s28_s29 = sadd.s32 1, %s4780_s29   ;;  %s6347_s26 = sld [smem:[#allocation21_spill]] }
 0x50c   : > { %p25_p9 = scmp.ge.s32.totalorder %s28_s29, 4   ;;  %s6348_s14 = sld [smem:[#allocation24_spill]] }
 0x50d   : > { %s6349_s27 = sld [smem:[#allocation22_spill]]  ;;  %s6351_s24 = smov %s4764_s25 }
 0x50e   : > { %s6350_s28 = sld [smem:[#allocation23_spill]]  ;;  %27 = sbr.rel (!%p25_p9) target bundleno = 16 (0x10), region = 132 }
 0x511   : > { %s6352_s25 = smov %s6347_s26 }
 0x512   : > { %s6353_s26 = smov %s6348_s14 }
 0x513   :  { %3757 = vsyncpa [#allocation4], 1 }
 0x514   :  { %3759 = vsyncpa [#allocation4 + $0x1], 1 }
 0x515   :  { %3760 = vsyncpa [#allocation7], 1 }
 0x516   :  { %3761 = vsyncpa [#allocation10], 1 }
 0x517   :  { %3763 = vsyncpa [#allocation10 + $0x1], 1 }
 0x518   :  { %3764 = vsyncpa [#allocation13], 1 }
 0x519   :  { %3765 = vsyncpa [#allocation5], 1 }
 0x51a   :  { %3767 = vsyncpa [#allocation5 + $0x1], 1 }

</bundles_post_ra>
